<compile_context>
chip_gen: v5e
topology: v5e:2x2
jax: 0.10.0
libtpu: 0.0.40
codegen_flags: <defaults>
</compile_context>

<pallas_src>
from functools import partial

import numpy as np
import jax
import jax.numpy as jnp
from jax.experimental import pallas as pl
from jax.experimental.pallas import tpu as pltpu


# ---------------------------------------------------------------------------
# Pallas kernels
# ---------------------------------------------------------------------------

def pool_conv_relu_kernel(x_ref, pt_ref, wc_ref, bc_ref, o_ref):
    """Fused 5x5/s3 avgpool (pooling matrix P) + 1x1 conv + ReLU, transposed form.

    Per grid step (one batch element), all operands in native layouts:
      x_ref : (1, Cin, H*W)   pt_ref: (H*W, Po)      (= P.T, constant)
      wc_ref: (Cout, Cin)     bc_ref: (Cout, 1)      o_ref: (1, Cout, Po)
    """
    pooled_t = jnp.dot(x_ref[0], pt_ref[...],
                       preferred_element_type=jnp.float32)        # (Cin, Po)
    acc = jnp.dot(wc_ref[...], pooled_t,
                  preferred_element_type=jnp.float32)             # (Cout, Po)
    acc = acc + bc_ref[...]
    o_ref[0] = jnp.maximum(acc, 0.0).astype(o_ref.dtype)


def fc1_relu_fc2_kernel(x_ref, w1_ref, b1_ref, w2_ref, b2_ref, o_ref, acc_ref):
    """Fused  out = relu(x @ W1 + b1) @ W2 + b2, tiled over the hidden dim.

    Grid axis j walks TH-wide chunks of the hidden (1024) dimension:
      x_ref : (N, K)  (grid-invariant, stays resident in VMEM)
      w1_ref: (K, TH)         b1_ref: (1, TH)
      w2_ref: (TH, NCP)       b2_ref: (1, NCP)
      o_ref : (N, NCP)        acc_ref: VMEM (N, NCP) f32 accumulator
    """
    j = pl.program_id(0)

    @pl.when(j == 0)
    def _():
        acc_ref[...] = jnp.zeros_like(acc_ref)

    h = jnp.dot(x_ref[...], w1_ref[...], preferred_element_type=jnp.float32)
    h = jnp.maximum(h + b1_ref[...], 0.0)
    acc_ref[...] += jnp.dot(h, w2_ref[...], preferred_element_type=jnp.float32)

    @pl.when(j == pl.num_programs(0) - 1)
    def _():
        o_ref[...] = (acc_ref[...] + b2_ref[...]).astype(o_ref.dtype)


# ---------------------------------------------------------------------------
# pallas_call wrappers
# ---------------------------------------------------------------------------

def pool_conv_relu(x_chw, pt, wc, bc_col):
    """x_chw: (N, Cin, H*W); pt: (H*W, Po); wc: (Cout, Cin); bc_col: (Cout, 1).

    Returns (N, Cout, Po)  (c-major, i.e. PyTorch flatten order after reshape).
    """
    N, Cin, HW = x_chw.shape
    Po = pt.shape[1]
    Cout = wc.shape[0]
    flops = N * (2 * Cin * HW * Po + 2 * Cout * Cin * Po)
    bytes_accessed = 4 * (N * Cin * HW + HW * Po + Cout * Cin + Cout
                          + N * Cout * Po)
    return pl.pallas_call(
        pool_conv_relu_kernel,
        out_shape=jax.ShapeDtypeStruct((N, Cout, Po), x_chw.dtype),
        grid=(N,),
        in_specs=[
            pl.BlockSpec((1, Cin, HW), lambda b: (b, 0, 0)),
            pl.BlockSpec((HW, Po), lambda b: (0, 0)),
            pl.BlockSpec((Cout, Cin), lambda b: (0, 0)),
            pl.BlockSpec((Cout, 1), lambda b: (0, 0)),
        ],
        out_specs=pl.BlockSpec((1, Cout, Po), lambda b: (b, 0, 0)),
        compiler_params=pltpu.CompilerParams(
            dimension_semantics=("parallel",)),
        cost_estimate=pl.CostEstimate(flops=flops, transcendentals=0,
                                      bytes_accessed=bytes_accessed),
    )(x_chw, pt, wc, bc_col)


def fc1_relu_fc2(xf, w1, b1, w2p, b2p, *, tile_hidden=512):
    """xf: (N, K); w1: (K, HID); b1: (1, HID); w2p: (HID, NCP); b2p: (1, NCP)."""
    N, K = xf.shape
    HID = w1.shape[1]
    NCP = w2p.shape[1]
    assert HID % tile_hidden == 0
    n_tiles = HID // tile_hidden
    flops = 2 * N * K * HID + 2 * N * HID * NCP
    bytes_accessed = 4 * (N * K + K * HID + HID + HID * NCP + NCP + N * NCP)
    return pl.pallas_call(
        fc1_relu_fc2_kernel,
        out_shape=jax.ShapeDtypeStruct((N, NCP), xf.dtype),
        grid=(n_tiles,),
        in_specs=[
            pl.BlockSpec((N, K), lambda j: (0, 0)),               # resident
            pl.BlockSpec((K, tile_hidden), lambda j: (0, j)),     # stream W1
            pl.BlockSpec((1, tile_hidden), lambda j: (0, j)),
            pl.BlockSpec((tile_hidden, NCP), lambda j: (j, 0)),   # stream W2
            pl.BlockSpec((1, NCP), lambda j: (0, 0)),
        ],
        out_specs=pl.BlockSpec((N, NCP), lambda j: (0, 0)),
        scratch_shapes=[pltpu.VMEM((N, NCP), jnp.float32)],
        compiler_params=pltpu.CompilerParams(
            dimension_semantics=("arbitrary",)),
        cost_estimate=pl.CostEstimate(flops=flops, transcendentals=0,
                                      bytes_accessed=bytes_accessed),
    )(xf, w1, b1, w2p, b2p)


# ---------------------------------------------------------------------------
# Glue (constant pooling matrix, one-time parameter layout prep, init)
# ---------------------------------------------------------------------------

def make_pool_matrix_t(H, W, K, S):
    """Constant (H*W, Ho*Wo) matrix P.T implementing KxK/stride-S avg pooling."""
    Ho = (H - K) // S + 1
    Wo = (W - K) // S + 1
    P = np.zeros((Ho * Wo, H * W), np.float32)
    inv = 1.0 / (K * K)
    for ho in range(Ho):
        for wo in range(Wo):
            o = ho * Wo + wo
            for ky in range(K):
                for kx in range(K):
                    P[o, (ho * S + ky) * W + (wo * S + kx)] = inv
    return jnp.asarray(P.T)


def init_params(key, in_channels, num_classes):
    """PyTorch-style uniform(-1/sqrt(fan_in), 1/sqrt(fan_in)) init (torch layouts)."""
    ks = jax.random.split(key, 6)

    def u(k, shape, fan_in):
        b = 1.0 / (fan_in ** 0.5)
        return jax.random.uniform(k, shape, jnp.float32, -b, b)

    return dict(
        wc=u(ks[0], (128, in_channels, 1, 1), in_channels),   # 1x1 conv (O,I,1,1)
        bc=u(ks[1], (128,), in_channels),
        w1=u(ks[2], (1024, 2048), 2048),                       # fc1 (out, in)
        b1=u(ks[3], (1024,), 2048),
        w2=u(ks[4], (num_classes, 1024), 1024),                # fc2 (out, in)
        b2=u(ks[5], (num_classes,), 1024),
    )


def prepare_params(params, num_classes):
    """One-time layout prep (NOT in the per-call forward path).

    Moves the fc weight transposes and the lane-dense num_classes padding out of
    the jitted forward, so no large per-call HBM transpose/pad is materialized.
    """
    NCP = ((num_classes + 127) // 128) * 128                   # lane-dense pad
    w2_t = params['w2'].T                                      # (1024, nc)
    w2_pad = jnp.zeros((w2_t.shape[0], NCP), w2_t.dtype).at[:, :num_classes].set(w2_t)
    b2_pad = jnp.zeros((1, NCP), params['b2'].dtype).at[0, :num_classes].set(params['b2'])
    return dict(
        wc=params['wc'][:, :, 0, 0],                           # (Cout, Cin) native
        bc_col=params['bc'].reshape(-1, 1),                    # (Cout, 1)
        w1_mm=params['w1'].T,                                  # (2048, 1024)
        b1_row=params['b1'].reshape(1, -1),                    # (1, 1024)
        w2_pad=w2_pad,                                         # (1024, NCP)
        b2_pad=b2_pad,                                         # (1, NCP)
    )


def inception_aux_forward(x_nchw, prep, *, num_classes):
    N, C, H, W = x_nchw.shape
    x_chw = x_nchw.reshape(N, C, H * W)                        # free reshape
    pt = make_pool_matrix_t(H, W, 5, 3)                        # (H*W, Po) constant

    # fused avgpool + 1x1 conv + ReLU  -> (N, 128, Po) (c-major)
    y = pool_conv_relu(x_chw, pt, prep['wc'], prep['bc_col'])

    # PyTorch flatten(1) of the NCHW conv output: feature index = c*Po + s
    yf = y.reshape(N, -1)                                      # free reshape
    assert yf.shape[1] == prep['w1_mm'].shape[0]

    # fused fc1 + ReLU + fc2 (dropout == identity at inference)
    out_pad = fc1_relu_fc2(yf, prep['w1_mm'], prep['b1_row'],
                           prep['w2_pad'], prep['b2_pad'])     # (N, NCP)
    return out_pad[:, :num_classes]


# ---------------------------------------------------------------------------
# Pure-JAX reference (lax conv / reduce_window) for correctness check
# ---------------------------------------------------------------------------

def inception_aux_ref(x, params):
    pooled = jax.lax.reduce_window(x, 0.0, jax.lax.add,
                                   (1, 1, 5, 5), (1, 1, 3, 3), 'VALID') / 25.0
    y = jax.lax.conv_general_dilated(pooled, params['wc'], (1, 1), 'VALID',
                                     dimension_numbers=('NCHW', 'OIHW', 'NCHW'))
    y = jax.nn.relu(y + params['bc'][None, :, None, None])
    yf = y.reshape(y.shape[0], -1)
    h = jax.nn.relu(yf @ params['w1'].T + params['b1'])
    return h @ params['w2'].T + params['b2']


# ---------------------------------------------------------------------------

if __name__ == "__main__":
    key = jax.random.PRNGKey(0)
    kx, kp = jax.random.split(key)

    # InceptionAux hard-codes fc1 input = 2048 = 128 * 4 * 4, so the 5x5/s3
    # average pool must produce 4x4 -> input spatial size 14x14.
    N, Cin, H, W = 2, 16, 14, 14
    num_classes = 10

    x = jax.random.normal(kx, (N, Cin, H, W), jnp.float32)
    params = init_params(kp, Cin, num_classes)
    prep = jax.tree_util.tree_map(jnp.asarray,
                                  prepare_params(params, num_classes))  # one-time

    fwd = jax.jit(partial(inception_aux_forward, num_classes=num_classes))
    out = jax.block_until_ready(fwd(x, prep))
    assert out.shape == (N, num_classes), out.shape

    ref = jax.block_until_ready(inception_aux_ref(x, params))
    max_err = float(jnp.max(jnp.abs(out - ref)))
    assert jnp.allclose(out, ref, atol=2e-3, rtol=2e-3), max_err

    print("KERNEL_OK")
</pallas_src>

<mosaic_0001>
module attributes {stable_mosaic.version = 11 : i64} {
  func.func @pool_conv_relu_kernel(%arg0: i32, %arg1: memref<1x16x196xf32, #tpu.memory_space<vmem>>, %arg2: memref<196x16xf32, #tpu.memory_space<vmem>>, %arg3: memref<128x16xf32, #tpu.memory_space<vmem>>, %arg4: memref<128x1xf32, #tpu.memory_space<vmem>>, %arg5: memref<1x128x16xf32, #tpu.memory_space<vmem>>) attributes {dimension_semantics = [#tpu.dimension_semantics<parallel>], iteration_bounds = array<i64: 2>, scalar_prefetch = 0 : i64, scratch_operands = 0 : i64, tpu.core_type = #tpu.core_type<tc>, window_params = [{transform_indices = @transform_0, window_bounds = array<i64: 1, 16, 196>}, {pipeline_mode = #tpu.pipeline_mode<synchronous>, transform_indices = @transform_1, window_bounds = array<i64: 196, 16>}, {pipeline_mode = #tpu.pipeline_mode<synchronous>, transform_indices = @transform_2, window_bounds = array<i64: 128, 16>}, {pipeline_mode = #tpu.pipeline_mode<synchronous>, transform_indices = @transform_3, window_bounds = array<i64: 128, 1>}, {transform_indices = @transform_4, window_bounds = array<i64: 1, 128, 16>}]} {
    %c0 = arith.constant 0 : index
    %c0_0 = arith.constant 0 : index
    %c0_1 = arith.constant 0 : index
    %0 = vector.load %arg1[%c0, %c0_0, %c0_1] : memref<1x16x196xf32, #tpu.memory_space<vmem>>, vector<1x16x196xf32>
    %1 = vector.shape_cast %0 : vector<1x16x196xf32> to vector<16x196xf32>
    %c0_2 = arith.constant 0 : index
    %c0_3 = arith.constant 0 : index
    %2 = vector.load %arg2[%c0_2, %c0_3] : memref<196x16xf32, #tpu.memory_space<vmem>>, vector<196x16xf32>
    %cst = arith.constant dense<0.000000e+00> : vector<16x16xf32>
    %3 = tpu.matmul %1, %2, %cst {dimension_numbers = #tpu.dot_dimension_numbers<[1], [0], [0], [1], [0, 0, 1, 1], [], []>} : vector<16x196xf32>, vector<196x16xf32>, vector<16x16xf32> -> vector<16x16xf32>
    %c0_4 = arith.constant 0 : index
    %c0_5 = arith.constant 0 : index
    %4 = vector.load %arg3[%c0_4, %c0_5] : memref<128x16xf32, #tpu.memory_space<vmem>>, vector<128x16xf32>
    %cst_6 = arith.constant dense<0.000000e+00> : vector<128x16xf32>
    %5 = tpu.matmul %4, %3, %cst_6 {dimension_numbers = #tpu.dot_dimension_numbers<[1], [0], [0], [1], [0, 0, 1, 1], [], []>} : vector<128x16xf32>, vector<16x16xf32>, vector<128x16xf32> -> vector<128x16xf32>
    %c0_7 = arith.constant 0 : index
    %c0_8 = arith.constant 0 : index
    %6 = vector.load %arg4[%c0_7, %c0_8] : memref<128x1xf32, #tpu.memory_space<vmem>>, vector<128x1xf32>
    %7 = vector.broadcast %6 : vector<128x1xf32> to vector<128x16xf32>
    %8 = arith.addf %5, %7 : vector<128x16xf32>
    %cst_9 = arith.constant 0.000000e+00 : f32
    %9 = vector.broadcast %cst_9 : f32 to vector<128x16xf32>
    %10 = arith.maximumf %8, %9 : vector<128x16xf32>
    %c0_10 = arith.constant 0 : index
    %c0_11 = arith.constant 0 : index
    %c0_12 = arith.constant 0 : index
    %11 = vector.load %arg5[%c0_10, %c0_11, %c0_12] : memref<1x128x16xf32, #tpu.memory_space<vmem>>, vector<1x128x16xf32>
    %12 = vector.shape_cast %11 : vector<1x128x16xf32> to vector<128x16xf32>
    %13 = vector.shape_cast %10 : vector<128x16xf32> to vector<1x128x16xf32>
    tpu.vector_store %arg5[%c0_10, %c0_11, %c0_12], %13 {strides = array<i32>} : memref<1x128x16xf32, #tpu.memory_space<vmem>>, vector<1x128x16xf32>,
    return
  }
  func.func @transform_0(%arg0: i32) -> (i32, i32, i32) {
    %c0_i32 = arith.constant 0 : i32
    %c0_i32_0 = arith.constant 0 : i32
    %c0_i32_1 = arith.constant 0 : i32
    return %arg0, %c0_i32, %c0_i32_0 : i32, i32, i32
  }
  func.func @transform_1(%arg0: i32) -> (i32, i32) {
    %c0_i32 = arith.constant 0 : i32
    %c0_i32_0 = arith.constant 0 : i32
    %c0_i32_1 = arith.constant 0 : i32
    return %c0_i32, %c0_i32_0 : i32, i32
  }
  func.func @transform_2(%arg0: i32) -> (i32, i32) {
    %c0_i32 = arith.constant 0 : i32
    %c0_i32_0 = arith.constant 0 : i32
    %c0_i32_1 = arith.constant 0 : i32
    return %c0_i32, %c0_i32_0 : i32, i32
  }
  func.func @transform_3(%arg0: i32) -> (i32, i32) {
    %c0_i32 = arith.constant 0 : i32
    %c0_i32_0 = arith.constant 0 : i32
    %c0_i32_1 = arith.constant 0 : i32
    return %c0_i32, %c0_i32_0 : i32, i32
  }
  func.func @transform_4(%arg0: i32) -> (i32, i32, i32) {
    %c0_i32 = arith.constant 0 : i32
    %c0_i32_0 = arith.constant 0 : i32
    %c0_i32_1 = arith.constant 0 : i32
    return %arg0, %c0_i32, %c0_i32_0 : i32, i32, i32
  }
}

module attributes {stable_mosaic.version = 11 : i64} {
  func.func @fc1_relu_fc2_kernel(%arg0: i32, %arg1: memref<2x2048xf32, #tpu.memory_space<vmem>>, %arg2: memref<2048x512xf32, #tpu.memory_space<vmem>>, %arg3: memref<1x512xf32, #tpu.memory_space<vmem>>, %arg4: memref<512x128xf32, #tpu.memory_space<vmem>>, %arg5: memref<1x128xf32, #tpu.memory_space<vmem>>, %arg6: memref<2x128xf32, #tpu.memory_space<vmem>>, %arg7: memref<2x128xf32, #tpu.memory_space<vmem>>) attributes {dimension_semantics = [#tpu.dimension_semantics<arbitrary>], iteration_bounds = array<i64: 2>, scalar_prefetch = 0 : i64, scratch_operands = 1 : i64, tpu.core_type = #tpu.core_type<tc>, window_params = [{pipeline_mode = #tpu.pipeline_mode<synchronous>, transform_indices = @transform_0, window_bounds = array<i64: 2, 2048>}, {transform_indices = @transform_1, window_bounds = array<i64: 2048, 512>}, {transform_indices = @transform_2, window_bounds = array<i64: 1, 512>}, {transform_indices = @transform_3, window_bounds = array<i64: 512, 128>}, {pipeline_mode = #tpu.pipeline_mode<synchronous>, transform_indices = @transform_4, window_bounds = array<i64: 1, 128>}, {pipeline_mode = #tpu.pipeline_mode<synchronous>, transform_indices = @transform_5, window_bounds = array<i64: 2, 128>}]} {
    %c0_i32 = arith.constant 0 : i32
    %0 = arith.cmpi eq, %arg0, %c0_i32 : i32
    %1 = arith.extui %0 : i1 to i32
    %c0_i32_0 = arith.constant 0 : i32
    %2 = arith.cmpi ne, %1, %c0_i32_0 : i32
    scf.if %2 {
      %cst_15 = arith.constant 0.000000e+00 : f32
      %19 = vector.broadcast %cst_15 : f32 to vector<2x128xf32>
      %c0_16 = arith.constant 0 : index
      %c0_17 = arith.constant 0 : index
      %20 = vector.load %arg7[%c0_16, %c0_17] : memref<2x128xf32, #tpu.memory_space<vmem>>, vector<2x128xf32>
      tpu.vector_store %arg7[%c0_16, %c0_17], %19 {strides = array<i32>} : memref<2x128xf32, #tpu.memory_space<vmem>>, vector<2x128xf32>,
    } else {
    }
    %c0 = arith.constant 0 : index
    %c0_1 = arith.constant 0 : index
    %3 = vector.load %arg1[%c0, %c0_1] : memref<2x2048xf32, #tpu.memory_space<vmem>>, vector<2x2048xf32>
    %c0_2 = arith.constant 0 : index
    %c0_3 = arith.constant 0 : index
    %4 = vector.load %arg2[%c0_2, %c0_3] : memref<2048x512xf32, #tpu.memory_space<vmem>>, vector<2048x512xf32>
    %cst = arith.constant dense<0.000000e+00> : vector<2x512xf32>
    %5 = tpu.matmul %3, %4, %cst {dimension_numbers = #tpu.dot_dimension_numbers<[1], [0], [0], [1], [0, 0, 1, 1], [], []>} : vector<2x2048xf32>, vector<2048x512xf32>, vector<2x512xf32> -> vector<2x512xf32>
    %c0_4 = arith.constant 0 : index
    %c0_5 = arith.constant 0 : index
    %6 = vector.load %arg3[%c0_4, %c0_5] : memref<1x512xf32, #tpu.memory_space<vmem>>, vector<1x512xf32>
    %7 = vector.broadcast %6 : vector<1x512xf32> to vector<2x512xf32>
    %8 = arith.addf %5, %7 : vector<2x512xf32>
    %cst_6 = arith.constant 0.000000e+00 : f32
    %9 = vector.broadcast %cst_6 : f32 to vector<2x512xf32>
    %10 = arith.maximumf %8, %9 : vector<2x512xf32>
    %c0_7 = arith.constant 0 : index
    %c0_8 = arith.constant 0 : index
    %11 = vector.load %arg7[%c0_7, %c0_8] : memref<2x128xf32, #tpu.memory_space<vmem>>, vector<2x128xf32>
    %c0_9 = arith.constant 0 : index
    %c0_10 = arith.constant 0 : index
    %12 = vector.load %arg4[%c0_9, %c0_10] : memref<512x128xf32, #tpu.memory_space<vmem>>, vector<512x128xf32>
    %cst_11 = arith.constant dense<0.000000e+00> : vector<2x128xf32>
    %13 = tpu.matmul %10, %12, %cst_11 {dimension_numbers = #tpu.dot_dimension_numbers<[1], [0], [0], [1], [0, 0, 1, 1], [], []>} : vector<2x512xf32>, vector<512x128xf32>, vector<2x128xf32> -> vector<2x128xf32>
    %14 = arith.addf %11, %13 : vector<2x128xf32>
    %c0_12 = arith.constant 0 : index
    %c0_13 = arith.constant 0 : index
    %15 = vector.load %arg7[%c0_12, %c0_13] : memref<2x128xf32, #tpu.memory_space<vmem>>, vector<2x128xf32>
    tpu.vector_store %arg7[%c0_12, %c0_13], %14 {strides = array<i32>} : memref<2x128xf32, #tpu.memory_space<vmem>>, vector<2x128xf32>,
    %c1_i32 = arith.constant 1 : i32
    %16 = arith.cmpi eq, %arg0, %c1_i32 : i32
    %17 = arith.extui %16 : i1 to i32
    %c0_i32_14 = arith.constant 0 : i32
    %18 = arith.cmpi ne, %17, %c0_i32_14 : i32
    scf.if %18 {
      %c0_15 = arith.constant 0 : index
      %c0_16 = arith.constant 0 : index
      %19 = vector.load %arg7[%c0_15, %c0_16] : memref<2x128xf32, #tpu.memory_space<vmem>>, vector<2x128xf32>
      %c0_17 = arith.constant 0 : index
      %c0_18 = arith.constant 0 : index
      %20 = vector.load %arg5[%c0_17, %c0_18] : memref<1x128xf32, #tpu.memory_space<vmem>>, vector<1x128xf32>
      %21 = vector.broadcast %20 : vector<1x128xf32> to vector<2x128xf32>
      %22 = arith.addf %19, %21 : vector<2x128xf32>
      %c0_19 = arith.constant 0 : index
      %c0_20 = arith.constant 0 : index
      %23 = vector.load %arg6[%c0_19, %c0_20] : memref<2x128xf32, #tpu.memory_space<vmem>>, vector<2x128xf32>
      tpu.vector_store %arg6[%c0_19, %c0_20], %22 {strides = array<i32>} : memref<2x128xf32, #tpu.memory_space<vmem>>, vector<2x128xf32>,
    } else {
    }
    return
  }
  func.func @transform_0(%arg0: i32) -> (i32, i32) {
    %c0_i32 = arith.constant 0 : i32
    %c0_i32_0 = arith.constant 0 : i32
    %c0_i32_1 = arith.constant 0 : i32
    return %c0_i32, %c0_i32_0 : i32, i32
  }
  func.func @transform_1(%arg0: i32) -> (i32, i32) {
    %c0_i32 = arith.constant 0 : i32
    %c0_i32_0 = arith.constant 0 : i32
    return %c0_i32, %arg0 : i32, i32
  }
  func.func @transform_2(%arg0: i32) -> (i32, i32) {
    %c0_i32 = arith.constant 0 : i32
    %c0_i32_0 = arith.constant 0 : i32
    return %c0_i32, %arg0 : i32, i32
  }
  func.func @transform_3(%arg0: i32) -> (i32, i32) {
    %c0_i32 = arith.constant 0 : i32
    %c0_i32_0 = arith.constant 0 : i32
    return %arg0, %c0_i32 : i32, i32
  }
  func.func @transform_4(%arg0: i32) -> (i32, i32) {
    %c0_i32 = arith.constant 0 : i32
    %c0_i32_0 = arith.constant 0 : i32
    %c0_i32_1 = arith.constant 0 : i32
    return %c0_i32, %c0_i32_0 : i32, i32
  }
  func.func @transform_5(%arg0: i32) -> (i32, i32) {
    %c0_i32 = arith.constant 0 : i32
    %c0_i32_0 = arith.constant 0 : i32
    %c0_i32_1 = arith.constant 0 : i32
    return %c0_i32, %c0_i32_0 : i32, i32
  }
}

</mosaic_0001>

<bundles_post_ra>
// kernel: inception_aux_forward.2
= control target key start
LH: loop header
LB: loop body
LE: loop exit
PB: predicated region body
PF: predicated region fallthrough
CT: control target
= control target key end

     0   :  { %9 = vsyncpa [#allocation3], 0  ;;  %s760_s15 = smov 0   ;;  %s935_s0 = inlined_call_operand.vmem [shape: f32[2,16,196], index: 0, kind: input, shape index: {}]   ;;  %s936_s1 = inlined_call_operand.hbm [shape: f32[196,16], index: 1, kind: input, shape index: {}]   ;;  %s937_s2 = inlined_call_operand.vmem [shape: f32[128,16], index: 2, kind: input, shape index: {}]   ;;  %s938_s3 = inlined_call_operand.vmem [shape: f32[128,1], index: 3, kind: input, shape index: {}]   ;;  %s939_s4 = inlined_call_operand.vmem [shape: f32[2,128,16], index: 4, kind: output, shape index: {}]  }
   0x1 LB: > { %s146_s18 = sshll.u32 %s936_s1, 4  ;;  %s769_s19 = sadd.s32 4294967295, %s729_s15   ;;  %s729_s15 = sphi %s760_s15, %s15_s15   ;;  %s147_s18 = int_to_ptr.hbm [resolvable:$true] %s146_s18 }
   0x2   : > { %p628_p0 = scmp.ge.s32.totalorder %s729_s15, 1  ;;  %p135_p1 = scmp.lt.s32.totalorder %s729_s15, 3 }
   0x3   : > { %p672_p2 = scmp.eq.s32.totalorder %s769_s19, 0  ;;  %s731_s20 = smov [#allocation2]  }
   0x4   : > { %p136_p3 = pnand %p628_p0, %p135_p1  ;;  %s148_s21 = sshll.u32 %s731_s20, 4  ;;  %s149_s21 = int_to_ptr.vmem [resolvable:$true] %s148_s21 }
   0x5   : > { %s732_s22 = smov 128   ;;  %s733_s23 = smov 8  }
   0x6   : > { %p668_p4 = pneg %p136_p3  ;;  %178 = sbr.rel (%p136_p3) target bundleno = 369 (0x171), region = 36 }
   0x8   : > { %p669_p5 = pnand %p672_p2, %p668_p4 }
   0xa   : > { %671 = dma.hbm_to_vmem [thread:$0]  (!%p669_p5), %s147_s18, 3200, %s149_s21, [#allocation3], %s732_s22, %s732_s22, %s733_s23  }
   0xb   : > { %724 = dma.done.wait (%p672_p2), [#allocation3], 3200  }
   0xc   : > { %726 = vsyncadd (%p672_p2), [#allocation3], 4294964096  ;;  %v234_v0 = vld [vmem:[#allocation2 + $0x78] sm:$0xff]  ;;  %v233_v1 = vld [vmem:[#allocation2 + $0x70] sm:$0xff]  ;;  %vm251_vm0 = vcmask 1043456   ;;  %p205_p6 = scmp.lt.s32.totalorder %s769_s19, 1 }
   0xd   : > { %255 = vmatpush.msra.mxu0 %v234_v0  ;;  %v232_v2 = vld [vmem:[#allocation2 + $0x68] sm:$0xff]  ;;  %v243_v3 = vld [vmem:[#allocation2 + $0xc0] sm:$0xf]  ;;  %v242_v4 = vld [vmem:[#allocation2 + $0xb8] sm:$0xff]  ;;  %v734_v14 = vmov 0   ;;  %vm244_vm1 = vcmask 556032  }
   0xe   : > { %637 = vmatpush.msk.msra.mxu1 %vm251_vm0, %v243_v3  ;;  %v231_v5 = vld [vmem:[#allocation2 + $0x60] sm:$0xff]  ;;  %v241_v6 = vld [vmem:[#allocation2 + $0xb0] sm:$0xff]  ;;  %v230_v7 = vld [vmem:[#allocation2 + $0x58] sm:$0xff]  ;;  %s941_s19 = smov (!%p205_p6, %s769_s19), 1  ;;  %686 = vset.pattern.permute.xlu0 %v734_v14  ;;  %vm413_vm2 = vcmask 130048  }
   0xf   : > { %256 = vmatpush.msra.mxu0 %v233_v1  ;;  %v240_v8 = vld [vmem:[#allocation2 + $0xa8] sm:$0xff]  ;;  %v229_v9 = vld [vmem:[#allocation2 + $0x50] sm:$0xff]  ;;  %v239_v10 = vld [vmem:[#allocation2 + $0xa0] sm:$0xff]  ;;  %687 = vset.pattern.permute.xlu1 %v734_v14  ;;  %s658_s26 = sshll.u32 %s941_s19, 5  ;;  %s659_s20 = sshll.u32 %s941_s19, 7 }
  0x10   : > { %286 = vmatpush.msra.mxu1 %v242_v4  ;;  %v317_v11 = vld [vmem:[%s938_s3] sm:$0xff]  ;;  %v228_v12 = vld [vmem:[#allocation2 + $0x48] sm:$0xff]  ;;  %v238_v13 = vld [vmem:[#allocation2 + $0x98] sm:$0xff]  ;;  %688 = vset.pattern.permute.xlu2 %v734_v14  ;;  %s209_s29 = scalar_lea.vmem %s935_s0, %s658_s26  ;;  %s898_s23 = scalar_lea.vmem %s939_s4, %s659_s20 }
  0x11   : > { %257 = vmatpush.msra.mxu0 %v232_v2  ;;  %v227_v15 = vld [vmem:[#allocation2 + $0x40] sm:$0xff]  ;;  %v237_v16 = vld [vmem:[#allocation2 + $0x90] sm:$0xff]  ;;  %335 = vperm.xlu0 %686, %v317_v11   ;;  %v226_v17 = vld [vmem:[#allocation2 + $0x38] sm:$0xff] }
  0x12   : > { %287 = vmatpush.msra.mxu1 %v241_v6  ;;  %v236_v18 = vld [vmem:[#allocation2 + $0x88] sm:$0xff]  ;;  %v225_v19 = vld [vmem:[#allocation2 + $0x30] sm:$0xff]  ;;  %v235_v20 = vld [vmem:[#allocation2 + $0x80] sm:$0xff] }
  0x13   : > { %258 = vmatpush.msra.mxu0 %v231_v5  ;;  %v216_v21 = vld [vmem:[%s209_s29 + $0x8] sm:$0xff]  ;;  %v223_v23 = vld [vmem:[#allocation2 + $0x20] sm:$0xff]  ;;  %v222_v24 = vld [vmem:[#allocation2 + $0x18] sm:$0xff] }
  0x14   : > { %288 = vmatpush.msra.mxu1 %v240_v8  ;;  %v224_v22 = vld [vmem:[#allocation2 + $0x28] sm:$0xff]  ;;  %v221_v25 = vld [vmem:[#allocation2 + $0x10] sm:$0xff]  ;;  %v218_v26 = vld [vmem:[%s209_s29 + $0x18] sm:$0xff] }
  0x15   : > { %259 = vmatpush.msra.mxu0 %v230_v7  ;;  %v220_v27 = vld [vmem:[#allocation2 + $0x8] sm:$0xff]  ;;  %v219_v28 = vld [vmem:[#allocation2] sm:$0xff]  ;;  %v217_v30 = vld [vmem:[%s209_s29 + $0x10] sm:$0xff] }
  0x16   : > { %289 = vmatpush.msra.mxu1 %v239_v10  ;;  %v215_v29 = vld [vmem:[%s209_s29] sm:$0xff]  ;;  %v318_v31 = vld [vmem:[%s938_s3 + $0x8] sm:$0xff]  ;;  %v319_v32 = vld [vmem:[%s938_s3 + $0x10] sm:$0xff] }
  0x17   : > { %260 = vmatpush.msra.mxu0 %v229_v9  ;;  %v323_v33 = vld [vmem:[%s938_s3 + $0x30] sm:$0xff]  ;;  %345 = vperm.xlu1 %687, %v319_v32   ;;  %v320_v34 = vld [vmem:[%s938_s3 + $0x18] sm:$0xff]  ;;  %v326_v35 = vld [vmem:[%s938_s3 + $0x48] sm:$0xff] }
  0x18   : > { %290 = vmatpush.msra.mxu1 %v238_v13  ;;  %v324_v37 = vld [vmem:[%s938_s3 + $0x38] sm:$0xff]  ;;  %v329_v38 = vld [vmem:[%s938_s3 + $0x60] sm:$0xff]  ;;  %v327_v42 = vld [vmem:[%s938_s3 + $0x50] sm:$0xff] }
  0x19   : > { %261 = vmatpush.msra.mxu0 %v228_v12  ;;  %340 = vperm.xlu0 %686, %v318_v31   ;;  %v321_v41 = vld [vmem:[%s938_s3 + $0x20] sm:$0xff]  ;;  %v332_v43 = vld [vmem:[%s938_s3 + $0x78] sm:$0xff]  ;;  %v303_v47 = vld [vmem:[%s937_s2 + $0x10] sm:$0xff] }
  0x1a   : > { %291 = vmatpush.msra.mxu1 %v237_v16  ;;  %355 = vperm.xlu2 %688, %v321_v41   ;;  %v310_v48 = vld [vmem:[%s937_s2 + $0x48] sm:$0xff]  ;;  %v301_v49 = vld [vmem:[%s937_s2] sm:$0xff]  ;;  %v304_v52 = vld [vmem:[%s937_s2 + $0x18] sm:$0xff] }
  0x1b   : > { %262 = vmatpush.msra.mxu0 %v227_v15  ;;  %v322_v50 = vld [vmem:[%s938_s3 + $0x28] sm:$0xff]  ;;  %v311_v53 = vld [vmem:[%s937_s2 + $0x50] sm:$0xff]  ;;  %v325_v55 = vld [vmem:[%s938_s3 + $0x40] sm:$0xff] }
  0x1c   : > { %292 = vmatpush.msra.mxu1 %v236_v18  ;;  %v330_v51 = vld [vmem:[%s938_s3 + $0x68] sm:$0xff]  ;;  %v305_v56 = vld [vmem:[%s937_s2 + $0x20] sm:$0xff]  ;;  %v312_v57 = vld [vmem:[%s937_s2 + $0x58] sm:$0xff] }
  0x1d   : > { %263 = vmatpush.msra.mxu0 %v226_v17  ;;  %v302_v54 = vld [vmem:[%s937_s2 + $0x8] sm:$0xff]  ;;  %v328_v58 = vld [vmem:[%s938_s3 + $0x58] sm:$0xff]  ;;  %v313_v60 = vld [vmem:[%s937_s2 + $0x60] sm:$0xff] }
  0x1e   : > { %293 = vmatpush.msra.mxu1 %v235_v20  ;;  %v306_v59 = vld [vmem:[%s937_s2 + $0x28] sm:$0xff]  ;;  %v331_v61 = vld [vmem:[%s938_s3 + $0x70] sm:$0xff]  ;;  %v308_v0 = vld [vmem:[%s937_s2 + $0x38] sm:$0xff] }
  0x1f   : > { %264 = vmatpush.msra.mxu0 %v225_v19  ;;  %638 = vmatmul.msk.f32.vlgmr.msra.gmra.mxu1 %vm244_vm1, %v216_v21  ;;  %v307_v62 = vld [vmem:[%s937_s2 + $0x30] sm:$0xff]  ;;  %v314_v63 = vld [vmem:[%s937_s2 + $0x68] sm:$0xff]  ;;  %v309_v2 = vld [vmem:[%s937_s2 + $0x40] sm:$0xff] }
  0x20   : > { %350 = vperm.xlu1 %687, %v320_v34   ;;  %v315_v1 = vld [vmem:[%s937_s2 + $0x70] sm:$0xff]  ;;  %v316_v3 = vld [vmem:[%s937_s2 + $0x78] sm:$0xff] }
  0x21   : > { %265 = vmatpush.msra.mxu0 %v224_v22  ;;  %365 = vperm.xlu0 %686, %v323_v33  }
  0x22   : > { %360 = vperm.xlu2 %688, %v322_v50  }
  0x23   : > { %266 = vmatpush.msra.mxu0 %v223_v23 }
  0x25   : > { %267 = vmatpush.msra.mxu0 %v222_v24 }
  0x27   : > { %268 = vmatpush.msra.mxu0 %v221_v25  ;;  %639 = vmatmul.msk.f32.gmra.mxu1 %vm244_vm1, %v218_v26 }
  0x28   : > { %370 = vperm.xlu1 %687, %v324_v37  }
  0x29   : > { %269 = vmatpush.msra.mxu0 %v220_v27  ;;  %380 = vperm.xlu0 %686, %v326_v35  }
  0x2a   : > { %375 = vperm.xlu2 %688, %v325_v55  }
  0x2b   : > { %270 = vmatpush.msra.mxu0 %v219_v28 }
  0x2c   : > { %271 = vmatmul.f32.vlgmr.msra.gmra.mxu0 %v215_v29 }
  0x30   : > { %385 = vperm.xlu1 %687, %v327_v42  }
  0x31   : > { %395 = vperm.xlu0 %686, %v329_v38  }
  0x32   : > { %390 = vperm.xlu2 %688, %v328_v58  }
  0x34   : > { %274 = vmatmul.f32.gmra.mxu0 %v217_v30 }
  0x38   : > { %400 = vperm.xlu1 %687, %v330_v51  }
  0x39   : > { %410 = vperm.xlu0 %686, %v332_v43  }
  0x3a   : > { %405 = vperm.xlu2 %688, %v331_v61  }
  0x74   : > { %v356_v7 = vpop.permute.xlu2 %355 }
  0x7c   : > { %v361_v12 = vpop.permute.xlu2 %360 }
  0x83   : > { %v336_v4 = vpop.permute.xlu0 %335 }
  0x84   : > { %v376_v25 = vpop.permute.xlu2 %375 }
  0x89   : > { %v346_v5 = vpop.permute.xlu1 %345 }
  0x8b   : > { %v341_v6 = vpop.permute.xlu0 %340 }
  0x8c   : > { %v391_v34 = vpop.permute.xlu2 %390 }
  0x92   : > { %v351_v8 = vpop.permute.xlu1 %350 }
  0x93   : > { %v366_v9 = vpop.permute.xlu0 %365 }
  0x94   : > { %v406_v55 = vpop.permute.xlu2 %405 }
  0x9a   : > { %v371_v13 = vpop.permute.xlu1 %370 }
  0x9b   : > { %v381_v16 = vpop.permute.xlu0 %380 }
  0x9c   : > { %v295_v36 = vpop.f32.mrf.mxu1 }
  0xa2   : > { %v386_v26 = vpop.permute.xlu1 %385 }
  0xa3   : > { %v396_v41 = vpop.permute.xlu0 %395 }
  0xa4   : > { %v298_v40 = vpop.f32.mrf.mxu1 }
  0xa9   : > { %v272_v39 = vpop.f32.mrf.mxu0 }
  0xaa   : > { %v296_v46 = vadd.f32 %v295_v36, %v272_v39 }
  0xb1   : > { %v275_v44 = vpop.f32.mrf.mxu0 }
  0xb2   : > { %v299_v45 = vadd.f32 %v298_v40, %v275_v44 }
  0xb4   : > { %476 = vmatpush.msrb.mxu1 %v299_v45  ;;  %660 = vmatpush.msra.mxu2 %v299_v45 }
  0xb5   : > { %661 = vmatpush.msra.mxu3 %v299_v45 }
  0xb6   : > { %477 = vmatpush.msrb.mxu1 %v296_v46  ;;  %662 = vmatpush.msra.mxu2 %v296_v46 }
  0xb7   : > { %663 = vmatpush.msra.mxu3 %v296_v46  ;;  %642 = vmatmul.msk.f32.vlgmr.msra.gmra.mxu2 %vm413_vm2, %v303_v47 }
  0xb8   : > { %649 = vmatmul.msk.f32.vlgmr.msra.gmra.mxu3 %vm413_vm2, %v310_v48  ;;  %640 = vmatmul.msk.f32.vlgmr.msrb.gmra.mxu1 %vm413_vm2, %v301_v49  ;;  %v401_v48 = vpop.permute.xlu1 %400 }
  0xbf   : > { %643 = vmatmul.msk.f32.gmra.mxu2 %vm413_vm2, %v304_v52 }
  0xc0   : > { %650 = vmatmul.msk.f32.gmra.mxu3 %vm413_vm2, %v311_v53  ;;  %641 = vmatmul.msk.f32.gmra.mxu1 %vm413_vm2, %v302_v54 }
  0xc7   : > { %644 = vmatmul.msk.f32.gmra.mxu2 %vm413_vm2, %v305_v56 }
  0xc8   : > { %651 = vmatmul.msk.f32.gmra.mxu3 %vm413_vm2, %v312_v57 }
  0xcf   : > { %645 = vmatmul.msk.f32.gmra.mxu2 %vm413_vm2, %v306_v59 }
  0xd0   : > { %652 = vmatmul.msk.f32.gmra.mxu3 %vm413_vm2, %v313_v60 }
  0xd7   : > { %646 = vmatmul.msk.f32.gmra.mxu2 %vm413_vm2, %v307_v62  ;;  %v411_v62 = vpop.permute.xlu0 %410 }
  0xd8   : > { %653 = vmatmul.msk.f32.gmra.mxu3 %vm413_vm2, %v314_v63 }
  0xdf   : > { %647 = vmatmul.msk.f32.gmra.mxu2 %vm413_vm2, %v308_v0 }
  0xe0   : > { %654 = vmatmul.msk.f32.gmra.mxu3 %vm413_vm2, %v315_v1 }
  0xe7   : > { %648 = vmatmul.msk.f32.gmra.mxu2 %vm413_vm2, %v309_v2 }
  0xe8   : > { %655 = vmatmul.msk.f32.gmra.mxu3 %vm413_vm2, %v316_v3 }
 0x135   : > { %v479_v10 = vpop.f32.mrf.mxu1 }
 0x136   : > { %v480_v11 = vadd.f32 %v479_v10, %v336_v4 }
 0x138   : > { %v527_v14 = vmax.f32 %v480_v11, 0.0 }
 0x13a   : > { %543 = vst.msk [vmem:[%s898_s23] sm:$0xff] %vm413_vm2, %v527_v14  ;;  %v485_v15 = vpop.f32.mrf.mxu2 }
 0x13b   : > { %v486_v17 = vadd.f32 %v485_v15, %v346_v5  ;;  %v506_v18 = vpop.f32.mrf.mxu3 }
 0x13c   : > { %v507_v19 = vadd.f32 %v506_v18, %v381_v16 }
 0x13d   : > { %v529_v20 = vmax.f32 %v486_v17, 0.0  ;;  %v482_v21 = vpop.f32.mrf.mxu1 }
 0x13e   : > { %v536_v22 = vmax.f32 %v507_v19, 0.0  ;;  %v483_v23 = vadd.f32 %v482_v21, %v341_v6 }
 0x13f   : > { %545 = vst.msk [vmem:[%s898_s23 + $0x10] sm:$0xff] %vm413_vm2, %v529_v20 }
 0x140   : > { %552 = vst.msk [vmem:[%s898_s23 + $0x48] sm:$0xff] %vm413_vm2, %v536_v22  ;;  %v528_v24 = vmax.f32 %v483_v23, 0.0 }
 0x142   : > { %544 = vst.msk [vmem:[%s898_s23 + $0x8] sm:$0xff] %vm413_vm2, %v528_v24  ;;  %v488_v27 = vpop.f32.mrf.mxu2 }
 0x143   : > { %v489_v28 = vadd.f32 %v488_v27, %v351_v8  ;;  %v509_v29 = vpop.f32.mrf.mxu3 }
 0x144   : > { %v510_v30 = vadd.f32 %v509_v29, %v386_v26 }
 0x145   : > { %v530_v31 = vmax.f32 %v489_v28, 0.0 }
 0x146   : > { %v537_v32 = vmax.f32 %v510_v30, 0.0 }
 0x147   : > { %546 = vst.msk [vmem:[%s898_s23 + $0x18] sm:$0xff] %vm413_vm2, %v530_v31 }
 0x148   : > { %553 = vst.msk [vmem:[%s898_s23 + $0x50] sm:$0xff] %vm413_vm2, %v537_v32 }
 0x14a   : > { %v491_v33 = vpop.f32.mrf.mxu2 }
 0x14b   : > { %v492_v35 = vadd.f32 %v491_v33, %v356_v7  ;;  %v512_v36 = vpop.f32.mrf.mxu3 }
 0x14c   : > { %v513_v37 = vadd.f32 %v512_v36, %v391_v34 }
 0x14d   : > { %v531_v38 = vmax.f32 %v492_v35, 0.0 }
 0x14e   : > { %v538_v39 = vmax.f32 %v513_v37, 0.0 }
 0x14f   : > { %547 = vst.msk [vmem:[%s898_s23 + $0x20] sm:$0xff] %vm413_vm2, %v531_v38 }
 0x150   : > { %554 = vst.msk [vmem:[%s898_s23 + $0x58] sm:$0xff] %vm413_vm2, %v538_v39 }
 0x152   : > { %v494_v40 = vpop.f32.mrf.mxu2 }
 0x153   : > { %v495_v42 = vadd.f32 %v494_v40, %v361_v12  ;;  %v515_v43 = vpop.f32.mrf.mxu3 }
 0x154   : > { %v516_v44 = vadd.f32 %v515_v43, %v396_v41 }
 0x155   : > { %v532_v45 = vmax.f32 %v495_v42, 0.0 }
 0x156   : > { %v539_v46 = vmax.f32 %v516_v44, 0.0 }
 0x157   : > { %548 = vst.msk [vmem:[%s898_s23 + $0x28] sm:$0xff] %vm413_vm2, %v532_v45 }
 0x158   : > { %555 = vst.msk [vmem:[%s898_s23 + $0x60] sm:$0xff] %vm413_vm2, %v539_v46 }
 0x15a   : > { %v497_v47 = vpop.f32.mrf.mxu2 }
 0x15b   : > { %v498_v49 = vadd.f32 %v497_v47, %v366_v9  ;;  %v518_v50 = vpop.f32.mrf.mxu3 }
 0x15c   : > { %v519_v51 = vadd.f32 %v518_v50, %v401_v48 }
 0x15d   : > { %v533_v52 = vmax.f32 %v498_v49, 0.0 }
 0x15e   : > { %v540_v53 = vmax.f32 %v519_v51, 0.0 }
 0x15f   : > { %549 = vst.msk [vmem:[%s898_s23 + $0x30] sm:$0xff] %vm413_vm2, %v533_v52 }
 0x160   : > { %556 = vst.msk [vmem:[%s898_s23 + $0x68] sm:$0xff] %vm413_vm2, %v540_v53 }
 0x162   : > { %v500_v54 = vpop.f32.mrf.mxu2 }
 0x163   : > { %v501_v56 = vadd.f32 %v500_v54, %v371_v13  ;;  %v521_v57 = vpop.f32.mrf.mxu3 }
 0x164   : > { %v522_v58 = vadd.f32 %v521_v57, %v406_v55 }
 0x165   : > { %v534_v59 = vmax.f32 %v501_v56, 0.0 }
 0x166   : > { %v541_v60 = vmax.f32 %v522_v58, 0.0 }
 0x167   : > { %550 = vst.msk [vmem:[%s898_s23 + $0x38] sm:$0xff] %vm413_vm2, %v534_v59 }
 0x168   : > { %557 = vst.msk [vmem:[%s898_s23 + $0x70] sm:$0xff] %vm413_vm2, %v541_v60 }
 0x16a   : > { %v503_v61 = vpop.f32.mrf.mxu2 }
 0x16b   : > { %v504_v63 = vadd.f32 %v503_v61, %v376_v25  ;;  %v524_v0 = vpop.f32.mrf.mxu3 }
 0x16c   : > { %v525_v1 = vadd.f32 %v524_v0, %v411_v62 }
 0x16d   : > { %v535_v2 = vmax.f32 %v504_v63, 0.0 }
 0x16e   : > { %v542_v3 = vmax.f32 %v525_v1, 0.0 }
 0x16f   : > { %551 = vst.msk [vmem:[%s898_s23 + $0x40] sm:$0xff] %vm413_vm2, %v535_v2 }
 0x170   : > { %558 = vst.msk [vmem:[%s898_s23 + $0x78] sm:$0xff] %vm413_vm2, %v542_v3 }
 0x171 PF: > { %s15_s15 = sadd.s32 1, %s729_s15  }
 0x172   : > { %p12_p7 = scmp.ge.s32.totalorder %s15_s15, 4  }
 0x174   :  { %14 = sbr.rel (!%p12_p7) target bundleno = 1 (0x1), region = 71 }
 0x179   :  { %580 = vsyncpa [#allocation3], 1 }
 0x17a   :  { %582 = vsyncpa [#allocation3 + $0x1], 1 }

// kernel: inception_aux_forward.3
= control target key start
LH: loop header
LB: loop body
LE: loop exit
PB: predicated region body
PF: predicated region fallthrough
CT: control target
= control target key end

     0   :  { %s4743_s0 = inlined_call_operand.vmem [shape: f32[2,2048], index: 0, kind: input, shape index: {}]   ;;  %s4744_s1 = inlined_call_operand.hbm [shape: f32[2048,1024], index: 1, kind: input, shape index: {}]   ;;  %s4745_s2 = inlined_call_operand.hbm [shape: f32[1,1024], index: 2, kind: input, shape index: {}]   ;;  %s4746_s3 = inlined_call_operand.hbm [shape: f32[1024,128], index: 3, kind: input, shape index: {}]   ;;  %s4747_s4 = inlined_call_operand.hbm [shape: f32[1,128], index: 4, kind: input, shape index: {}]   ;;  %s4748_s5 = inlined_call_operand.hbm [shape: f32[2,128], index: 5, kind: output, shape index: {}]  }
   0x1   :  { %4749 = sst [smem:[#allocation16_spill]] %s4745_s2 }
   0x2   :  { %4750 = sst [smem:[#allocation17_spill]] %s4747_s4 }
   0x3   :  { %10 = vsyncpa [#allocation4], 0 }
   0x4   :  { %12 = vsyncpa [#allocation4 + $0x1], 0 }
   0x5   :  { %13 = vsyncpa [#allocation7], 0 }
   0x6   :  { %15 = vsyncpa [#allocation7 + $0x1], 0 }
   0x7   :  { %16 = vsyncpa [#allocation10], 0 }
   0x8   :  { %17 = vsyncpa [#allocation5], 0  ;;  %s3324_s18 = smov 0   ;;  %s3326_s19 = smov 0  }
   0x9   :  { %s3328_s20 = smov 0   ;;  %s3330_s21 = smov 0  }
   0xa LB: > { %s3345_s22 = sadd.s32 1, %s3284_s21   ;;  %s51_s23 = sadd.s32 1, %s3280_s20  ;;  %s3284_s21 = sphi %s3330_s21, %s4760_s21   ;;  %s3280_s20 = sphi %s3328_s20, %s4759_s20   ;;  %s3276_s19 = sphi %s3326_s19, %s4758_s19   ;;  %s3272_s18 = sphi %s3324_s18, %s4757_s18  }
   0xb   : > { %s48_s24 = ssub.s32 %s3284_s21, %s3345_s22  ;;  %p58_p0 = scmp.ne.s32.totalorder %s3280_s20, %s3276_s19 }
   0xc   : > { %p49_p1 = scmp.eq.s32.totalorder %s48_s24, 0  ;;  %p59_p2 = scmp.eq.s32.totalorder %s3284_s21, 0 }
   0xd   : > { %p3021_p3 = scmp.lt.s32.totalorder %s3284_s21, 2  ;;  %s3358_s26 = sand.u32 1, %s3280_s20  }
   0xe   : > { %s3355_s25 = scalar_select %p49_p1, %s3280_s20, %s51_s23  }
   0xf   : > { %p60_p4 = por %p59_p2, %p58_p0  ;;  %s2971_s27 = sshll.u32 %s3358_s26, 13 }
  0x10   : > { %s219_s28 = sand.u32 1, %s3284_s21   ;;  %s2974_s30 = sshll.u32 %s3358_s26, 2 }
  0x11   : > { %p3362_p5 = pnand %p3021_p3, %p60_p4  ;;  %s2975_s6 = sshll.u32 %s3284_s21, 2 }
  0x12   : > { %s4752_s2 = sld [smem:[#allocation16_spill]]  ;;  %s223_s10 = scalar_lea.vmem [#allocation6], %s2974_s30 }
  0x13   : > { %s231_s11 = sshll.u32 %s223_s10, 4  ;;  %s3372_s14 = scalar_lea.sflag [#allocation7], %s219_s28  ;;  %s232_s11 = int_to_ptr.vmem [resolvable:$true] %s231_s11 }
  0x14   : > { %p3094_p7 = pneg %p3362_p5 }
  0x18   : > { %s227_s9 = scalar_lea.hbm %s4752_s2, %s2975_s6  ;;  %s3097_s24 = scalar_lea.hbm %s4752_s2, 8 }
  0x19   : > { %s229_s12 = sshll.u32 %s227_s9, 4  ;;  %s230_s12 = int_to_ptr.hbm [resolvable:$true] %s229_s12 }
  0x1a   : > { %s3090_s15 = sshra.s32 %s230_s12, 4  ;;  %s3091_s15 = int_to_ptr.hbm [resolvable:$true] %s3090_s15 }
  0x1b   : > { %s3092_s16 = scalar_lea.hbm %s3091_s15, 4  ;;  %p3098_p10 = scmp.lt.s32.totalorder %s3091_s15, %s4752_s2 }
  0x1c   : > { %p3093_p6 = scmp.ne.s32.totalorder %s3091_s15, %s3092_s16  ;;  %p3099_p11 = scmp.lt.s32.totalorder %s3097_s24, %s3092_s16 }
  0x1e   : > { %p3095_p8 = pnand %p3094_p7, %p3093_p6  ;;  %p3100_p12 = por %p3099_p11, %p3098_p10 }
  0x20   : > { %p3096_p9 = pneg %p3095_p8 }
  0x22   : > { %p3101_p13 = pnand %p3100_p12, %p3096_p9 }
  0x24   : > { %3104 = shalt.err (!%p3101_p13)
}
  0x25   : > { %3016 = dma.hbm_to_vmem [thread:$0]  (!%p3362_p5), %s230_s12, 64, %s232_s11, %s3372_s14  }
  0x26   : > { %s3389_s28 = sadd.s32 4294967295, %s3284_s21   ;;  %p64_p1 = scmp.ne.s32.totalorder %s3276_s19, %s3272_s18 }
  0x27   : > { %p65_p0 = scmp.eq.s32.totalorder %s3389_s28, 0  ;;  %p2968_p2 = scmp.ge.s32.totalorder %s3284_s21, 1 }
  0x28   : > { %p169_p3 = scmp.lt.s32.totalorder %s3284_s21, 3  ;;  %p2969_p4 = scmp.ne.s32.totalorder %s3389_s28, 0 }
  0x29   : > { %p3399_p6 = por %p65_p0, %p64_p1  ;;  %s4754_s4 = sld [smem:[#allocation17_spill]] }
  0x2a   : > { %p3406_p8 = pnand %p2968_p2, %p169_p3  ;;  %s3286_s18 = smov [#allocation9]  }
  0x2b   : > { %s186_s12 = sshll.u32 %s3286_s18, 4  ;;  %s2990_s15 = sshll.u32 %s3284_s21, 5  ;;  %s187_s12 = int_to_ptr.vmem [resolvable:$true] %s186_s12 }
  0x2c   : > { %p3006_p9 = pneg %p3406_p8  ;;  %s206_s23 = scalar_lea.hbm %s4744_s1, %s2990_s15 }
  0x2d   : > { %s201_s24 = scalar_lea.vmem [#allocation3], %s2971_s27  ;;  %s207_s6 = sshll.u32 %s206_s23, 4  ;;  %s208_s6 = int_to_ptr.hbm [resolvable:$true] %s207_s6 }
  0x2e   : > { %p3007_p10 = pnand %p3006_p9, %p65_p0  ;;  %s209_s30 = sshll.u32 %s201_s24, 4  ;;  %s210_s30 = int_to_ptr.vmem [resolvable:$true] %s209_s30 }
  0x2f   : > { %s184_s10 = sshll.u32 %s4754_s4, 4  ;;  %s198_s8 = scalar_lea.sflag [#allocation4], %s3358_s26  ;;  %s185_s10 = int_to_ptr.hbm [resolvable:$true] %s184_s10 }
  0x30   : > { %3009 = dma.hbm_to_vmem [thread:$0]  (!%p3007_p10), %s185_s10, 16, %s187_s12, [#allocation10]  }
  0x31   : > { %s3150_s9 = sshra.s32 %s208_s6, 4  ;;  %s3157_s15 = scalar_lea.hbm %s4744_s1, 16384  ;;  %s3151_s9 = int_to_ptr.hbm [resolvable:$true] %s3150_s9 }
  0x32   : > { %s3152_s18 = scalar_lea.hbm %s3151_s9, 8192  ;;  %p3158_p1 = scmp.lt.s32.totalorder %s3151_s9, %s4744_s1 }
  0x33   : > { %p3153_p11 = scmp.ne.s32.totalorder %s3151_s9, %s3152_s18  ;;  %p3159_p2 = scmp.lt.s32.totalorder %s3157_s15, %s3152_s18 }
  0x35   : > { %p3155_p12 = pnand %p3153_p11, %p3094_p7  ;;  %p3160_p3 = por %p3159_p2, %p3158_p1 }
  0x37   : > { %p3156_p13 = pneg %p3155_p12 }
  0x39   : > { %p3161_p9 = pnand %p3160_p3, %p3156_p13 }
  0x3b   : > { %3164 = shalt.err (!%p3161_p9)
}
  0x3c   : > { %s3287_s10 = smov 1024   ;;  %s3288_s12 = smov 512  }
  0x3d   : > { %s3289_s17 = smov 32   ;;  %s2991_s23 = sshll.u32 %s3284_s21, 9 }
  0x3e   : > { %3013 = dma.hbm_to_vmem [thread:$0]  (!%p3362_p5), %s208_s6, 131072, %s210_s30, %s198_s8, %s3287_s10, %s3288_s12, %s3289_s17  }
  0x3f   : > { %s4756_s2 = sshll.u32 %s3358_s26, 9  ;;  %s247_s9 = scalar_lea.hbm %s4746_s3, %s2991_s23 }
  0x40   : > { %s242_s13 = scalar_lea.vmem [#allocation8], %s4756_s2  ;;  %s248_s18 = sshll.u32 %s247_s9, 4  ;;  %s249_s18 = int_to_ptr.hbm [resolvable:$true] %s248_s18 }
  0x41   : > { %s250_s24 = sshll.u32 %s242_s13, 4  ;;  %s3180_s15 = sshra.s32 %s249_s18, 4  ;;  %s251_s24 = int_to_ptr.vmem [resolvable:$true] %s250_s24  ;;  %s3181_s15 = int_to_ptr.hbm [resolvable:$true] %s3180_s15 }
  0x42   : > { %s3182_s27 = scalar_lea.hbm %s3181_s15, 512  ;;  %s3187_s26 = scalar_lea.hbm %s4746_s3, 1024 }
  0x43   : > { %p3183_p10 = scmp.ne.s32.totalorder %s3181_s15, %s3182_s27  ;;  %p3188_p13 = scmp.lt.s32.totalorder %s3181_s15, %s4746_s3 }
  0x44   : > { %p3189_p1 = scmp.lt.s32.totalorder %s3187_s26, %s3182_s27 }
  0x45   : > { %p3185_p11 = pnand %p3183_p10, %p3094_p7 }
  0x46   : > { %p3190_p2 = por %p3189_p1, %p3188_p13 }
  0x47   : > { %p3186_p12 = pneg %p3185_p11 }
  0x49   : > { %p3191_p3 = pnand %p3190_p2, %p3186_p12 }
  0x4b   : > { %3194 = shalt.err (!%p3191_p3)
}
  0x4c   : > { %s3290_s4 = smov 128   ;;  %s3291_s10 = smov 8  }
  0x4d   : > { %3019 = dma.hbm_to_vmem [thread:$0]  (!%p3362_p5), %s249_s18, 8192, %s251_s24, %s3372_s14, %s3290_s4, %s3290_s4, %s3291_s10  }
  0x4e   : > { %262 = sbr.rel (%p3406_p8) target bundleno = 1268 (0x4f4), region = 40  ;;  %s264_s12 = sand.u32 (!%p3406_p8), 1, %s3276_s19  }
  0x4f   : > { %s2980_s17 = sshll.u32 (!%p3406_p8), %s264_s12, 13  ;;  %s265_s23 = scalar_lea.sflag (!%p3406_p8), [#allocation4], %s264_s12 }
  0x50   : > { %s3453_s2 = scalar_lea.vmem (!%p3406_p8), [#allocation3], %s2980_s17 }
  0x53   : > { %3255 = dma.done.wait (%p3399_p6), %s265_s23, 131072  }
  0x54   : > { %3257 = vsyncadd (%p3399_p6), %s265_s23, 4294836224  ;;  %s274_s13 = sand.u32 1, %s3389_s28   ;;  %s2981_s29 = sshll.u32 %s264_s12, 2 }
  0x55   : > { %s275_s14 = scalar_lea.sflag [#allocation7], %s274_s13  ;;  %s3460_s24 = scalar_lea.vmem [#allocation6], %s2981_s29 }
  0x56   : > { %3259 = dma.done.wait (%p3399_p6), %s275_s14, 8256  }
  0x57   : > { %3261 = vsyncadd (%p3399_p6), %s275_s14, 4294959040  ;;  %s2982_s11 = sshll.u32 %s264_s12, 9 }
  0x58   : > { %s3466_s16 = scalar_lea.vmem [#allocation8], %s2982_s11 }
  0x59   : > { %3263 = dma.done.wait (%p65_p0), [#allocation10], 16  }
  0x5a   : > { %3265 = vsyncadd (%p65_p0), [#allocation10], 4294967280  ;;  %332 = sbr.rel (%p2969_p4) target bundleno = 97 (0x61), region = 60 }
  0x5f   : > { %v3292_v0 = vmov 0.0  }
  0x60   : > { %333 = vst [vmem:[#allocation2] sm:$0x3] %v3292_v0 }
  0x61 PF: > { %v398_v1 = vld [vmem:[%s3453_s2 + $0x1e0] sm:$0xff]  ;;  %p2985_p5 = scmp.ne.s32.totalorder %s3389_s28, 1 }
  0x62   : > { %v462_v2 = vld [vmem:[%s3453_s2 + $0x3e0] sm:$0xff]  ;;  %1413 = vmatpush.msra.mxu0 %v398_v1 }
  0x63   : > { %v526_v3 = vld [vmem:[%s3453_s2 + $0x5e0] sm:$0xff]  ;;  %1433 = vmatpush.msra.mxu1 %v462_v2 }
  0x64   : > { %v394_v4 = vld [vmem:[%s3453_s2 + $0x1c0] sm:$0xff]  ;;  %1453 = vmatpush.msra.mxu2 %v526_v3 }
  0x65   : > { %v458_v5 = vld [vmem:[%s3453_s2 + $0x3c0] sm:$0xff]  ;;  %1414 = vmatpush.msra.mxu0 %v394_v4 }
  0x66   : > { %v522_v6 = vld [vmem:[%s3453_s2 + $0x5c0] sm:$0xff]  ;;  %1434 = vmatpush.msra.mxu1 %v458_v5 }
  0x67   : > { %v590_v7 = vld [vmem:[%s3453_s2 + $0x7e0] sm:$0xff]  ;;  %1454 = vmatpush.msra.mxu2 %v522_v6 }
  0x68   : > { %v390_v8 = vld [vmem:[%s3453_s2 + $0x1a0] sm:$0xff]  ;;  %1473 = vmatpush.msra.mxu3 %v590_v7 }
  0x69   : > { %v454_v9 = vld [vmem:[%s3453_s2 + $0x3a0] sm:$0xff]  ;;  %1415 = vmatpush.msra.mxu0 %v390_v8 }
  0x6a   : > { %v518_v10 = vld [vmem:[%s3453_s2 + $0x5a0] sm:$0xff]  ;;  %1435 = vmatpush.msra.mxu1 %v454_v9 }
  0x6b   : > { %v586_v11 = vld [vmem:[%s3453_s2 + $0x7c0] sm:$0xff]  ;;  %1455 = vmatpush.msra.mxu2 %v518_v10 }
  0x6c   : > { %v386_v12 = vld [vmem:[%s3453_s2 + $0x180] sm:$0xff]  ;;  %1474 = vmatpush.msra.mxu3 %v586_v11 }
  0x6d   : > { %v450_v13 = vld [vmem:[%s3453_s2 + $0x380] sm:$0xff]  ;;  %1416 = vmatpush.msra.mxu0 %v386_v12 }
  0x6e   : > { %v514_v14 = vld [vmem:[%s3453_s2 + $0x580] sm:$0xff]  ;;  %1436 = vmatpush.msra.mxu1 %v450_v13 }
  0x6f   : > { %v582_v15 = vld [vmem:[%s3453_s2 + $0x7a0] sm:$0xff]  ;;  %1456 = vmatpush.msra.mxu2 %v514_v14 }
  0x70   : > { %v382_v16 = vld [vmem:[%s3453_s2 + $0x160] sm:$0xff]  ;;  %1475 = vmatpush.msra.mxu3 %v582_v15 }
  0x71   : > { %v446_v17 = vld [vmem:[%s3453_s2 + $0x360] sm:$0xff]  ;;  %1417 = vmatpush.msra.mxu0 %v382_v16 }
  0x72   : > { %v510_v18 = vld [vmem:[%s3453_s2 + $0x560] sm:$0xff]  ;;  %1437 = vmatpush.msra.mxu1 %v446_v17 }
  0x73   : > { %v578_v19 = vld [vmem:[%s3453_s2 + $0x780] sm:$0xff]  ;;  %1457 = vmatpush.msra.mxu2 %v510_v18 }
  0x74   : > { %v378_v20 = vld [vmem:[%s3453_s2 + $0x140] sm:$0xff]  ;;  %1476 = vmatpush.msra.mxu3 %v578_v19 }
  0x75   : > { %v442_v21 = vld [vmem:[%s3453_s2 + $0x340] sm:$0xff]  ;;  %1418 = vmatpush.msra.mxu0 %v378_v20 }
  0x76   : > { %v506_v22 = vld [vmem:[%s3453_s2 + $0x540] sm:$0xff]  ;;  %1438 = vmatpush.msra.mxu1 %v442_v21 }
  0x77   : > { %v574_v23 = vld [vmem:[%s3453_s2 + $0x760] sm:$0xff]  ;;  %1458 = vmatpush.msra.mxu2 %v506_v22 }
  0x78   : > { %v374_v24 = vld [vmem:[%s3453_s2 + $0x120] sm:$0xff]  ;;  %1477 = vmatpush.msra.mxu3 %v574_v23 }
  0x79   : > { %v438_v25 = vld [vmem:[%s3453_s2 + $0x320] sm:$0xff]  ;;  %1419 = vmatpush.msra.mxu0 %v374_v24 }
  0x7a   : > { %v502_v26 = vld [vmem:[%s3453_s2 + $0x520] sm:$0xff]  ;;  %1439 = vmatpush.msra.mxu1 %v438_v25 }
  0x7b   : > { %v570_v27 = vld [vmem:[%s3453_s2 + $0x740] sm:$0xff]  ;;  %1459 = vmatpush.msra.mxu2 %v502_v26  ;;  %v334_v26 = vld [vmem:[%s4743_s0] sm:$0xff] }
  0x7c   : > { %v370_v28 = vld [vmem:[%s3453_s2 + $0x100] sm:$0xff]  ;;  %1478 = vmatpush.msra.mxu3 %v570_v27  ;;  %1376 = vst [vmem:[#allocation1] ss:$4 sm:$0xff] %v334_v26 }
  0x7d   : > { %v434_v29 = vld [vmem:[%s3453_s2 + $0x300] sm:$0xff]  ;;  %1420 = vmatpush.msra.mxu0 %v370_v28 }
  0x7e   : > { %v498_v30 = vld [vmem:[%s3453_s2 + $0x500] sm:$0xff]  ;;  %1440 = vmatpush.msra.mxu1 %v434_v29 }
  0x7f   : > { %v566_v31 = vld [vmem:[%s3453_s2 + $0x720] sm:$0xff]  ;;  %1460 = vmatpush.msra.mxu2 %v498_v30 }
  0x80   : > { %v366_v32 = vld [vmem:[%s3453_s2 + $0xe0] sm:$0xff]  ;;  %1479 = vmatpush.msra.mxu3 %v566_v31 }
  0x81   : > { %v430_v33 = vld [vmem:[%s3453_s2 + $0x2e0] sm:$0xff]  ;;  %1421 = vmatpush.msra.mxu0 %v366_v32 }
  0x82   : > { %v494_v34 = vld [vmem:[%s3453_s2 + $0x4e0] sm:$0xff]  ;;  %1441 = vmatpush.msra.mxu1 %v430_v33 }
  0x83   : > { %v562_v35 = vld [vmem:[%s3453_s2 + $0x700] sm:$0xff]  ;;  %1461 = vmatpush.msra.mxu2 %v494_v34 }
  0x84   : > { %v362_v36 = vld [vmem:[%s3453_s2 + $0xc0] sm:$0xff]  ;;  %1480 = vmatpush.msra.mxu3 %v562_v35 }
  0x85   : > { %v426_v37 = vld [vmem:[%s3453_s2 + $0x2c0] sm:$0xff]  ;;  %1422 = vmatpush.msra.mxu0 %v362_v36 }
  0x86   : > { %v490_v38 = vld [vmem:[%s3453_s2 + $0x4c0] sm:$0xff]  ;;  %1442 = vmatpush.msra.mxu1 %v426_v37 }
  0x87   : > { %v558_v39 = vld [vmem:[%s3453_s2 + $0x6e0] sm:$0xff]  ;;  %1462 = vmatpush.msra.mxu2 %v490_v38 }
  0x88   : > { %v358_v40 = vld [vmem:[%s3453_s2 + $0xa0] sm:$0xff]  ;;  %1481 = vmatpush.msra.mxu3 %v558_v39 }
  0x89   : > { %v422_v41 = vld [vmem:[%s3453_s2 + $0x2a0] sm:$0xff]  ;;  %1423 = vmatpush.msra.mxu0 %v358_v40 }
  0x8a   : > { %v486_v42 = vld [vmem:[%s3453_s2 + $0x4a0] sm:$0xff]  ;;  %1443 = vmatpush.msra.mxu1 %v422_v41 }
  0x8b   : > { %v554_v43 = vld [vmem:[%s3453_s2 + $0x6c0] sm:$0xff]  ;;  %1463 = vmatpush.msra.mxu2 %v486_v42 }
  0x8c   : > { %v354_v44 = vld [vmem:[%s3453_s2 + $0x80] sm:$0xff]  ;;  %1482 = vmatpush.msra.mxu3 %v554_v43 }
  0x8d   : > { %v418_v45 = vld [vmem:[%s3453_s2 + $0x280] sm:$0xff]  ;;  %1424 = vmatpush.msra.mxu0 %v354_v44 }
  0x8e   : > { %v482_v46 = vld [vmem:[%s3453_s2 + $0x480] sm:$0xff]  ;;  %1444 = vmatpush.msra.mxu1 %v418_v45 }
  0x8f   : > { %v550_v47 = vld [vmem:[%s3453_s2 + $0x6a0] sm:$0xff]  ;;  %1464 = vmatpush.msra.mxu2 %v482_v46 }
  0x90   : > { %v350_v48 = vld [vmem:[%s3453_s2 + $0x60] sm:$0xff]  ;;  %1483 = vmatpush.msra.mxu3 %v550_v47 }
  0x91   : > { %v414_v49 = vld [vmem:[%s3453_s2 + $0x260] sm:$0xff]  ;;  %1425 = vmatpush.msra.mxu0 %v350_v48  ;;  %v3591_v48 = vld.sshfl [vmem:[#allocation1] sm:$0xff pattern:$0x73625140] }
  0x92   : > { %v478_v50 = vld [vmem:[%s3453_s2 + $0x460] sm:$0xff]  ;;  %1445 = vmatpush.msra.mxu1 %v414_v49 }
  0x93   : > { %v546_v51 = vld [vmem:[%s3453_s2 + $0x680] sm:$0xff]  ;;  %1465 = vmatpush.msra.mxu2 %v478_v50 }
  0x94   : > { %v346_v52 = vld [vmem:[%s3453_s2 + $0x40] sm:$0xff]  ;;  %1484 = vmatpush.msra.mxu3 %v546_v51  ;;  %v3597_v51 = vld.sshfl [vmem:[#allocation1 + $0x18] sm:$0xff pattern:$0x73625140] }
  0x95   : > { %v410_v53 = vld [vmem:[%s3453_s2 + $0x240] sm:$0xff]  ;;  %1426 = vmatpush.msra.mxu0 %v346_v52 }
  0x96   : > { %v474_v54 = vld [vmem:[%s3453_s2 + $0x440] sm:$0xff]  ;;  %1446 = vmatpush.msra.mxu1 %v410_v53 }
  0x97   : > { %v542_v55 = vld [vmem:[%s3453_s2 + $0x660] sm:$0xff]  ;;  %1466 = vmatpush.msra.mxu2 %v474_v54 }
  0x98   : > { %v342_v56 = vld [vmem:[%s3453_s2 + $0x20] sm:$0xff]  ;;  %1485 = vmatpush.msra.mxu3 %v542_v55 }
  0x99   : > { %v406_v57 = vld [vmem:[%s3453_s2 + $0x220] sm:$0xff]  ;;  %1427 = vmatpush.msra.mxu0 %v342_v56 }
  0x9a   : > { %v470_v58 = vld [vmem:[%s3453_s2 + $0x420] sm:$0xff]  ;;  %1447 = vmatpush.msra.mxu1 %v406_v57 }
  0x9b   : > { %v538_v59 = vld [vmem:[%s3453_s2 + $0x640] sm:$0xff]  ;;  %1467 = vmatpush.msra.mxu2 %v470_v58 }
  0x9c   : > { %v338_v60 = vld [vmem:[%s3453_s2] sm:$0xff]  ;;  %1486 = vmatpush.msra.mxu3 %v538_v59 }
  0x9d   : > { %v402_v61 = vld [vmem:[%s3453_s2 + $0x200] sm:$0xff]  ;;  %1428 = vmatpush.msra.mxu0 %v338_v60 }
  0x9e   : > { %v466_v62 = vld [vmem:[%s3453_s2 + $0x400] sm:$0xff]  ;;  %1448 = vmatpush.msra.mxu1 %v402_v61  ;;  %1429 = vmatmul.f32.vlgmr.msra.gmra.mxu0 %v3591_v48 }
  0x9f   : > { %v534_v63 = vld [vmem:[%s3453_s2 + $0x620] sm:$0xff]  ;;  %1468 = vmatpush.msra.mxu2 %v466_v62 }
  0xa0   : > { %v654_v0 = vld [vmem:[%s3453_s2 + $0x9e0] sm:$0xff]  ;;  %1487 = vmatpush.msra.mxu3 %v534_v63  ;;  %v337_v63 = vld [vmem:[%s4743_s0 + $0x18] sm:$0xff] }
  0xa1   : > { %v718_v1 = vld [vmem:[%s3453_s2 + $0xbe0] sm:$0xff]  ;;  %1493 = vmatpush.msrb.mxu0 %v654_v0 }
  0xa2   : > { %v782_v2 = vld [vmem:[%s3453_s2 + $0xde0] sm:$0xff]  ;;  %1513 = vmatpush.msrb.mxu1 %v718_v1 }
  0xa3   : > { %v530_v3 = vld [vmem:[%s3453_s2 + $0x600] sm:$0xff]  ;;  %1533 = vmatpush.msrb.mxu2 %v782_v2 }
  0xa4   : > { %v650_v4 = vld [vmem:[%s3453_s2 + $0x9c0] sm:$0xff]  ;;  %1488 = vmatpush.msra.mxu3 %v530_v3 }
  0xa5   : > { %v714_v5 = vld [vmem:[%s3453_s2 + $0xbc0] sm:$0xff]  ;;  %1494 = vmatpush.msrb.mxu0 %v650_v4  ;;  %1489 = vmatmul.f32.vlgmr.msra.gmra.mxu3 %v3597_v51 }
  0xa6   : > { %v778_v6 = vld [vmem:[%s3453_s2 + $0xdc0] sm:$0xff]  ;;  %1514 = vmatpush.msrb.mxu1 %v714_v5 }
  0xa7   : > { %v846_v7 = vld [vmem:[%s3453_s2 + $0xfe0] sm:$0xff]  ;;  %1534 = vmatpush.msrb.mxu2 %v778_v6 }
  0xa8   : > { %v646_v8 = vld [vmem:[%s3453_s2 + $0x9a0] sm:$0xff]  ;;  %1553 = vmatpush.msrb.mxu3 %v846_v7 }
  0xa9   : > { %v710_v9 = vld [vmem:[%s3453_s2 + $0xba0] sm:$0xff]  ;;  %1495 = vmatpush.msrb.mxu0 %v646_v8 }
  0xaa   : > { %v774_v10 = vld [vmem:[%s3453_s2 + $0xda0] sm:$0xff]  ;;  %1515 = vmatpush.msrb.mxu1 %v710_v9 }
  0xab   : > { %v842_v11 = vld [vmem:[%s3453_s2 + $0xfc0] sm:$0xff]  ;;  %1535 = vmatpush.msrb.mxu2 %v774_v10 }
  0xac   : > { %v642_v12 = vld [vmem:[%s3453_s2 + $0x980] sm:$0xff]  ;;  %1554 = vmatpush.msrb.mxu3 %v842_v11 }
  0xad   : > { %v706_v13 = vld [vmem:[%s3453_s2 + $0xb80] sm:$0xff]  ;;  %1496 = vmatpush.msrb.mxu0 %v642_v12 }
  0xae   : > { %v770_v14 = vld [vmem:[%s3453_s2 + $0xd80] sm:$0xff]  ;;  %1516 = vmatpush.msrb.mxu1 %v706_v13 }
  0xaf   : > { %v838_v15 = vld [vmem:[%s3453_s2 + $0xfa0] sm:$0xff]  ;;  %1536 = vmatpush.msrb.mxu2 %v770_v14 }
  0xb0   : > { %v638_v16 = vld [vmem:[%s3453_s2 + $0x960] sm:$0xff]  ;;  %1555 = vmatpush.msrb.mxu3 %v838_v15 }
  0xb1   : > { %v702_v17 = vld [vmem:[%s3453_s2 + $0xb60] sm:$0xff]  ;;  %1497 = vmatpush.msrb.mxu0 %v638_v16 }
  0xb2   : > { %v766_v18 = vld [vmem:[%s3453_s2 + $0xd60] sm:$0xff]  ;;  %1517 = vmatpush.msrb.mxu1 %v702_v17 }
  0xb3   : > { %v834_v19 = vld [vmem:[%s3453_s2 + $0xf80] sm:$0xff]  ;;  %1537 = vmatpush.msrb.mxu2 %v766_v18 }
  0xb4   : > { %v634_v20 = vld [vmem:[%s3453_s2 + $0x940] sm:$0xff]  ;;  %1556 = vmatpush.msrb.mxu3 %v834_v19 }
  0xb5   : > { %v698_v21 = vld [vmem:[%s3453_s2 + $0xb40] sm:$0xff]  ;;  %1498 = vmatpush.msrb.mxu0 %v634_v20 }
  0xb6   : > { %v762_v22 = vld [vmem:[%s3453_s2 + $0xd40] sm:$0xff]  ;;  %1518 = vmatpush.msrb.mxu1 %v698_v21 }
  0xb7   : > { %v830_v23 = vld [vmem:[%s3453_s2 + $0xf60] sm:$0xff]  ;;  %1538 = vmatpush.msrb.mxu2 %v762_v22 }
  0xb8   : > { %v630_v24 = vld [vmem:[%s3453_s2 + $0x920] sm:$0xff]  ;;  %1557 = vmatpush.msrb.mxu3 %v830_v23 }
  0xb9   : > { %v694_v25 = vld [vmem:[%s3453_s2 + $0xb20] sm:$0xff]  ;;  %1499 = vmatpush.msrb.mxu0 %v630_v24 }
  0xba   : > { %v758_v27 = vld [vmem:[%s3453_s2 + $0xd20] sm:$0xff]  ;;  %1519 = vmatpush.msrb.mxu1 %v694_v25 }
  0xbb   : > { %v826_v28 = vld [vmem:[%s3453_s2 + $0xf40] sm:$0xff]  ;;  %1539 = vmatpush.msrb.mxu2 %v758_v27 }
  0xbc   : > { %v626_v29 = vld [vmem:[%s3453_s2 + $0x900] sm:$0xff]  ;;  %1558 = vmatpush.msrb.mxu3 %v826_v28 }
  0xbd   : > { %v690_v30 = vld [vmem:[%s3453_s2 + $0xb00] sm:$0xff]  ;;  %1500 = vmatpush.msrb.mxu0 %v626_v29 }
  0xbe   : > { %v754_v31 = vld [vmem:[%s3453_s2 + $0xd00] sm:$0xff]  ;;  %1520 = vmatpush.msrb.mxu1 %v690_v30 }
  0xbf   : > { %v822_v32 = vld [vmem:[%s3453_s2 + $0xf20] sm:$0xff]  ;;  %1540 = vmatpush.msrb.mxu2 %v754_v31 }
  0xc0   : > { %v622_v33 = vld [vmem:[%s3453_s2 + $0x8e0] sm:$0xff]  ;;  %1559 = vmatpush.msrb.mxu3 %v822_v32 }
  0xc1   : > { %v686_v34 = vld [vmem:[%s3453_s2 + $0xae0] sm:$0xff]  ;;  %1501 = vmatpush.msrb.mxu0 %v622_v33 }
  0xc2   : > { %v750_v35 = vld [vmem:[%s3453_s2 + $0xce0] sm:$0xff]  ;;  %1521 = vmatpush.msrb.mxu1 %v686_v34 }
  0xc3   : > { %v818_v36 = vld [vmem:[%s3453_s2 + $0xf00] sm:$0xff]  ;;  %1541 = vmatpush.msrb.mxu2 %v750_v35 }
  0xc4   : > { %v618_v37 = vld [vmem:[%s3453_s2 + $0x8c0] sm:$0xff]  ;;  %1560 = vmatpush.msrb.mxu3 %v818_v36 }
  0xc5   : > { %v682_v38 = vld [vmem:[%s3453_s2 + $0xac0] sm:$0xff]  ;;  %1502 = vmatpush.msrb.mxu0 %v618_v37 }
  0xc6   : > { %v746_v39 = vld [vmem:[%s3453_s2 + $0xcc0] sm:$0xff]  ;;  %1522 = vmatpush.msrb.mxu1 %v682_v38 }
  0xc7   : > { %v814_v40 = vld [vmem:[%s3453_s2 + $0xee0] sm:$0xff]  ;;  %1542 = vmatpush.msrb.mxu2 %v746_v39 }
  0xc8   : > { %v614_v41 = vld [vmem:[%s3453_s2 + $0x8a0] sm:$0xff]  ;;  %1561 = vmatpush.msrb.mxu3 %v814_v40 }
  0xc9   : > { %v678_v42 = vld [vmem:[%s3453_s2 + $0xaa0] sm:$0xff]  ;;  %1503 = vmatpush.msrb.mxu0 %v614_v41 }
  0xca   : > { %v335_v43 = vld [vmem:[%s4743_s0 + $0x8] sm:$0xff]  ;;  %v336_v46 = vld [vmem:[%s4743_s0 + $0x10] sm:$0xff]  ;;  %1523 = vmatpush.msrb.mxu1 %v678_v42 }
  0xcb   : > { %v742_v44 = vld [vmem:[%s3453_s2 + $0xca0] sm:$0xff]  ;;  %1378 = vst [vmem:[#allocation1 + $0x20] ss:$4 sm:$0xff] %v335_v43 }
  0xcc   : > { %v810_v45 = vld [vmem:[%s3453_s2 + $0xec0] sm:$0xff]  ;;  %1543 = vmatpush.msrb.mxu2 %v742_v44 }
  0xcd   : > { %v610_v47 = vld [vmem:[%s3453_s2 + $0x880] sm:$0xff]  ;;  %1562 = vmatpush.msrb.mxu3 %v810_v45 }
  0xce   : > { %v3593_v49 = vld.sshfl [vmem:[#allocation1 + $0x8] sm:$0xff pattern:$0x73625140]  ;;  %v3595_v50 = vld.sshfl [vmem:[#allocation1 + $0x10] sm:$0xff pattern:$0x73625140]  ;;  %1504 = vmatpush.msrb.mxu0 %v610_v47 }
  0xcf   : > { %v674_v52 = vld [vmem:[%s3453_s2 + $0xa80] sm:$0xff]  ;;  %1387 = vst [vmem:[#allocation1] ss:$4 sm:$0xff] %v336_v46  ;;  %1449 = vmatmul.f32.vlgmr.msra.gmra.mxu1 %v3593_v49  ;;  %1469 = vmatmul.f32.vlgmr.msra.gmra.mxu2 %v3595_v50 }
  0xd0   : > { %v738_v53 = vld [vmem:[%s3453_s2 + $0xc80] sm:$0xff]  ;;  %1524 = vmatpush.msrb.mxu1 %v674_v52 }
  0xd1   : > { %v806_v54 = vld [vmem:[%s3453_s2 + $0xea0] sm:$0xff]  ;;  %1544 = vmatpush.msrb.mxu2 %v738_v53 }
  0xd2   : > { %v606_v55 = vld [vmem:[%s3453_s2 + $0x860] sm:$0xff]  ;;  %1563 = vmatpush.msrb.mxu3 %v806_v54  ;;  %v3615_v1 = vld.sshfl [vmem:[#allocation1 + $0x20] sm:$0xff pattern:$0x73625140] }
  0xd3   : > { %v670_v56 = vld [vmem:[%s3453_s2 + $0xa60] sm:$0xff]  ;;  %1505 = vmatpush.msrb.mxu0 %v606_v55  ;;  %v3617_v2 = vld.sshfl [vmem:[#allocation1 + $0x38] sm:$0xff pattern:$0x73625140] }
  0xd4   : > { %v734_v57 = vld [vmem:[%s3453_s2 + $0xc60] sm:$0xff]  ;;  %1525 = vmatpush.msrb.mxu1 %v670_v56 }
  0xd5   : > { %v802_v58 = vld [vmem:[%s3453_s2 + $0xe80] sm:$0xff]  ;;  %1545 = vmatpush.msrb.mxu2 %v734_v57 }
  0xd6   : > { %v602_v59 = vld [vmem:[%s3453_s2 + $0x840] sm:$0xff]  ;;  %1564 = vmatpush.msrb.mxu3 %v802_v58 }
  0xd7   : > { %v666_v60 = vld [vmem:[%s3453_s2 + $0xa40] sm:$0xff]  ;;  %1506 = vmatpush.msrb.mxu0 %v602_v59 }
  0xd8   : > { %v730_v61 = vld [vmem:[%s3453_s2 + $0xc40] sm:$0xff]  ;;  %1526 = vmatpush.msrb.mxu1 %v666_v60 }
  0xd9   : > { %v798_v62 = vld [vmem:[%s3453_s2 + $0xe60] sm:$0xff]  ;;  %1546 = vmatpush.msrb.mxu2 %v730_v61 }
  0xda   : > { %v3613_v0 = vld.sshfl [vmem:[#allocation1 + $0x30] sm:$0xff pattern:$0x73625140]  ;;  %v3619_v3 = vld.sshfl [vmem:[#allocation1 + $0x28] sm:$0xff pattern:$0x73625140]  ;;  %1565 = vmatpush.msrb.mxu3 %v798_v62 }
  0xdb   : > { %v598_v4 = vld [vmem:[%s3453_s2 + $0x820] sm:$0xff]  ;;  %1388 = vst [vmem:[#allocation1 + $0x20] ss:$4 sm:$0xff] %v337_v63 }
  0xdc   : > { %v662_v5 = vld [vmem:[%s3453_s2 + $0xa20] sm:$0xff]  ;;  %1507 = vmatpush.msrb.mxu0 %v598_v4 }
  0xdd   : > { %v726_v6 = vld [vmem:[%s3453_s2 + $0xc20] sm:$0xff]  ;;  %1527 = vmatpush.msrb.mxu1 %v662_v5 }
  0xde   : > { %v794_v7 = vld [vmem:[%s3453_s2 + $0xe40] sm:$0xff]  ;;  %1547 = vmatpush.msrb.mxu2 %v726_v6 }
  0xdf   : > { %v594_v8 = vld [vmem:[%s3453_s2 + $0x800] sm:$0xff]  ;;  %1566 = vmatpush.msrb.mxu3 %v794_v7 }
  0xe0   : > { %v658_v9 = vld [vmem:[%s3453_s2 + $0xa00] sm:$0xff]  ;;  %1508 = vmatpush.msrb.mxu0 %v594_v8 }
  0xe1   : > { %v722_v10 = vld [vmem:[%s3453_s2 + $0xc00] sm:$0xff]  ;;  %1528 = vmatpush.msrb.mxu1 %v658_v9  ;;  %1509 = vmatmul.f32.vlgmr.msrb.gmra.mxu0 %v3615_v1 }
  0xe2   : > { %v790_v11 = vld [vmem:[%s3453_s2 + $0xe20] sm:$0xff]  ;;  %1548 = vmatpush.msrb.mxu2 %v722_v10  ;;  %1529 = vmatmul.f32.vlgmr.msrb.gmra.mxu1 %v3619_v3 }
  0xe3   : > { %v910_v12 = vld [vmem:[%s3453_s2 + $0x11e0] sm:$0xff]  ;;  %1567 = vmatpush.msrb.mxu3 %v790_v11  ;;  %1549 = vmatmul.f32.vlgmr.msrb.gmra.mxu2 %v3613_v0 }
  0xe4   : > { %v974_v13 = vld [vmem:[%s3453_s2 + $0x13e0] sm:$0xff]  ;;  %1573 = vmatpush.msra.mxu0 %v910_v12 }
  0xe5   : > { %v1038_v14 = vld [vmem:[%s3453_s2 + $0x15e0] sm:$0xff]  ;;  %1593 = vmatpush.msra.mxu1 %v974_v13 }
  0xe6   : > { %v786_v15 = vld [vmem:[%s3453_s2 + $0xe00] sm:$0xff]  ;;  %1613 = vmatpush.msra.mxu2 %v1038_v14 }
  0xe7   : > { %v906_v16 = vld [vmem:[%s3453_s2 + $0x11c0] sm:$0xff]  ;;  %1568 = vmatpush.msrb.mxu3 %v786_v15 }
  0xe8   : > { %v970_v17 = vld [vmem:[%s3453_s2 + $0x13c0] sm:$0xff]  ;;  %1574 = vmatpush.msra.mxu0 %v906_v16  ;;  %1569 = vmatmul.f32.vlgmr.msrb.gmra.mxu3 %v3617_v2 }
  0xe9   : > { %v1034_v18 = vld [vmem:[%s3453_s2 + $0x15c0] sm:$0xff]  ;;  %1594 = vmatpush.msra.mxu1 %v970_v17 }
  0xea   : > { %v1102_v19 = vld [vmem:[%s3453_s2 + $0x17e0] sm:$0xff]  ;;  %1614 = vmatpush.msra.mxu2 %v1034_v18 }
  0xeb   : > { %v902_v20 = vld [vmem:[%s3453_s2 + $0x11a0] sm:$0xff]  ;;  %1633 = vmatpush.msra.mxu3 %v1102_v19 }
  0xec   : > { %v966_v21 = vld [vmem:[%s3453_s2 + $0x13a0] sm:$0xff]  ;;  %1575 = vmatpush.msra.mxu0 %v902_v20  ;;  %v1389_v20 = vld.sshfl [vmem:[#allocation1] sm:$0xff pattern:$0x73625140] }
  0xed   : > { %v1030_v22 = vld [vmem:[%s3453_s2 + $0x15a0] sm:$0xff]  ;;  %1595 = vmatpush.msra.mxu1 %v966_v21 }
  0xee   : > { %v1098_v23 = vld [vmem:[%s3453_s2 + $0x17c0] sm:$0xff]  ;;  %1615 = vmatpush.msra.mxu2 %v1030_v22 }
  0xef   : > { %v898_v24 = vld [vmem:[%s3453_s2 + $0x1180] sm:$0xff]  ;;  %1634 = vmatpush.msra.mxu3 %v1098_v23 }
  0xf0   : > { %v962_v25 = vld [vmem:[%s3453_s2 + $0x1380] sm:$0xff]  ;;  %1576 = vmatpush.msra.mxu0 %v898_v24 }
  0xf1   : > { %v1026_v26 = vld [vmem:[%s3453_s2 + $0x1580] sm:$0xff]  ;;  %1596 = vmatpush.msra.mxu1 %v962_v25 }
  0xf2   : > { %v1094_v27 = vld [vmem:[%s3453_s2 + $0x17a0] sm:$0xff]  ;;  %1616 = vmatpush.msra.mxu2 %v1026_v26 }
  0xf3   : > { %v894_v28 = vld [vmem:[%s3453_s2 + $0x1160] sm:$0xff]  ;;  %1635 = vmatpush.msra.mxu3 %v1094_v27  ;;  %v1392_v27 = vld.sshfl [vmem:[#allocation1 + $0x18] sm:$0xff pattern:$0x73625140] }
  0xf4   : > { %v958_v29 = vld [vmem:[%s3453_s2 + $0x1360] sm:$0xff]  ;;  %1577 = vmatpush.msra.mxu0 %v894_v28 }
  0xf5   : > { %v1022_v30 = vld [vmem:[%s3453_s2 + $0x1560] sm:$0xff]  ;;  %1597 = vmatpush.msra.mxu1 %v958_v29 }
  0xf6   : > { %v1090_v31 = vld [vmem:[%s3453_s2 + $0x1780] sm:$0xff]  ;;  %1617 = vmatpush.msra.mxu2 %v1022_v30 }
  0xf7   : > { %v890_v32 = vld [vmem:[%s3453_s2 + $0x1140] sm:$0xff]  ;;  %1636 = vmatpush.msra.mxu3 %v1090_v31 }
  0xf8   : > { %v954_v33 = vld [vmem:[%s3453_s2 + $0x1340] sm:$0xff]  ;;  %1578 = vmatpush.msra.mxu0 %v890_v32 }
  0xf9   : > { %v1018_v34 = vld [vmem:[%s3453_s2 + $0x1540] sm:$0xff]  ;;  %1598 = vmatpush.msra.mxu1 %v954_v33 }
  0xfa   : > { %v1086_v35 = vld [vmem:[%s3453_s2 + $0x1760] sm:$0xff]  ;;  %1618 = vmatpush.msra.mxu2 %v1018_v34 }
  0xfb   : > { %v886_v36 = vld [vmem:[%s3453_s2 + $0x1120] sm:$0xff]  ;;  %1637 = vmatpush.msra.mxu3 %v1086_v35 }
  0xfc   : > { %v950_v37 = vld [vmem:[%s3453_s2 + $0x1320] sm:$0xff]  ;;  %1579 = vmatpush.msra.mxu0 %v886_v36 }
  0xfd   : > { %v1014_v38 = vld [vmem:[%s3453_s2 + $0x1520] sm:$0xff]  ;;  %1599 = vmatpush.msra.mxu1 %v950_v37 }
  0xfe   : > { %v1082_v39 = vld [vmem:[%s3453_s2 + $0x1740] sm:$0xff]  ;;  %1619 = vmatpush.msra.mxu2 %v1014_v38 }
  0xff   : > { %v882_v40 = vld [vmem:[%s3453_s2 + $0x1100] sm:$0xff]  ;;  %1638 = vmatpush.msra.mxu3 %v1082_v39 }
 0x100   : > { %v946_v41 = vld [vmem:[%s3453_s2 + $0x1300] sm:$0xff]  ;;  %1580 = vmatpush.msra.mxu0 %v882_v40 }
 0x101   : > { %v1010_v42 = vld [vmem:[%s3453_s2 + $0x1500] sm:$0xff]  ;;  %1600 = vmatpush.msra.mxu1 %v946_v41 }
 0x102   : > { %v1078_v43 = vld [vmem:[%s3453_s2 + $0x1720] sm:$0xff]  ;;  %1620 = vmatpush.msra.mxu2 %v1010_v42 }
 0x103   : > { %v878_v44 = vld [vmem:[%s3453_s2 + $0x10e0] sm:$0xff]  ;;  %1639 = vmatpush.msra.mxu3 %v1078_v43 }
 0x104   : > { %v942_v45 = vld [vmem:[%s3453_s2 + $0x12e0] sm:$0xff]  ;;  %1581 = vmatpush.msra.mxu0 %v878_v44 }
 0x105   : > { %v1006_v46 = vld [vmem:[%s3453_s2 + $0x14e0] sm:$0xff]  ;;  %1601 = vmatpush.msra.mxu1 %v942_v45 }
 0x106   : > { %v1074_v47 = vld [vmem:[%s3453_s2 + $0x1700] sm:$0xff]  ;;  %1621 = vmatpush.msra.mxu2 %v1006_v46 }
 0x107   : > { %v874_v52 = vld [vmem:[%s3453_s2 + $0x10c0] sm:$0xff]  ;;  %1640 = vmatpush.msra.mxu3 %v1074_v47 }
 0x108   : > { %v938_v53 = vld [vmem:[%s3453_s2 + $0x12c0] sm:$0xff]  ;;  %1582 = vmatpush.msra.mxu0 %v874_v52 }
 0x109   : > { %v1002_v54 = vld [vmem:[%s3453_s2 + $0x14c0] sm:$0xff]  ;;  %1602 = vmatpush.msra.mxu1 %v938_v53 }
 0x10a   : > { %v1070_v55 = vld [vmem:[%s3453_s2 + $0x16e0] sm:$0xff]  ;;  %1622 = vmatpush.msra.mxu2 %v1002_v54 }
 0x10b   : > { %v870_v56 = vld [vmem:[%s3453_s2 + $0x10a0] sm:$0xff]  ;;  %1641 = vmatpush.msra.mxu3 %v1070_v55 }
 0x10c   : > { %v934_v57 = vld [vmem:[%s3453_s2 + $0x12a0] sm:$0xff]  ;;  %1583 = vmatpush.msra.mxu0 %v870_v56 }
 0x10d   : > { %v998_v58 = vld [vmem:[%s3453_s2 + $0x14a0] sm:$0xff]  ;;  %1603 = vmatpush.msra.mxu1 %v934_v57 }
 0x10e   : > { %v1066_v59 = vld [vmem:[%s3453_s2 + $0x16c0] sm:$0xff]  ;;  %1623 = vmatpush.msra.mxu2 %v998_v58 }
 0x10f   : > { %v866_v60 = vld [vmem:[%s3453_s2 + $0x1080] sm:$0xff]  ;;  %1642 = vmatpush.msra.mxu3 %v1066_v59 }
 0x110   : > { %v930_v61 = vld [vmem:[%s3453_s2 + $0x1280] sm:$0xff]  ;;  %1584 = vmatpush.msra.mxu0 %v866_v60 }
 0x111   : > { %v994_v62 = vld [vmem:[%s3453_s2 + $0x1480] sm:$0xff]  ;;  %1604 = vmatpush.msra.mxu1 %v930_v61 }
 0x112   : > { %v1062_v63 = vld [vmem:[%s3453_s2 + $0x16a0] sm:$0xff]  ;;  %1624 = vmatpush.msra.mxu2 %v994_v62 }
 0x113   : > { %v862_v4 = vld [vmem:[%s3453_s2 + $0x1060] sm:$0xff]  ;;  %1643 = vmatpush.msra.mxu3 %v1062_v63 }
 0x114   : > { %v926_v5 = vld [vmem:[%s3453_s2 + $0x1260] sm:$0xff]  ;;  %1585 = vmatpush.msra.mxu0 %v862_v4 }
 0x115   : > { %v990_v6 = vld [vmem:[%s3453_s2 + $0x1460] sm:$0xff]  ;;  %1605 = vmatpush.msra.mxu1 %v926_v5 }
 0x116   : > { %v1058_v7 = vld [vmem:[%s3453_s2 + $0x1680] sm:$0xff]  ;;  %1625 = vmatpush.msra.mxu2 %v990_v6 }
 0x117   : > { %v858_v8 = vld [vmem:[%s3453_s2 + $0x1040] sm:$0xff]  ;;  %1644 = vmatpush.msra.mxu3 %v1058_v7 }
 0x118   : > { %v922_v9 = vld [vmem:[%s3453_s2 + $0x1240] sm:$0xff]  ;;  %1586 = vmatpush.msra.mxu0 %v858_v8 }
 0x119   : > { %v986_v10 = vld [vmem:[%s3453_s2 + $0x1440] sm:$0xff]  ;;  %1606 = vmatpush.msra.mxu1 %v922_v9 }
 0x11a   : > { %v1054_v11 = vld [vmem:[%s3453_s2 + $0x1660] sm:$0xff]  ;;  %1626 = vmatpush.msra.mxu2 %v986_v10 }
 0x11b   : > { %v854_v12 = vld [vmem:[%s3453_s2 + $0x1020] sm:$0xff]  ;;  %1645 = vmatpush.msra.mxu3 %v1054_v11 }
 0x11c   : > { %v918_v13 = vld [vmem:[%s3453_s2 + $0x1220] sm:$0xff]  ;;  %1587 = vmatpush.msra.mxu0 %v854_v12 }
 0x11d   : > { %v982_v14 = vld [vmem:[%s3453_s2 + $0x1420] sm:$0xff]  ;;  %1607 = vmatpush.msra.mxu1 %v918_v13 }
 0x11e   : > { %v1050_v15 = vld [vmem:[%s3453_s2 + $0x1640] sm:$0xff]  ;;  %1627 = vmatpush.msra.mxu2 %v982_v14 }
 0x11f   : > { %v850_v16 = vld [vmem:[%s3453_s2 + $0x1000] sm:$0xff]  ;;  %1646 = vmatpush.msra.mxu3 %v1050_v15 }
 0x120   : > { %v914_v17 = vld [vmem:[%s3453_s2 + $0x1200] sm:$0xff]  ;;  %1588 = vmatpush.msra.mxu0 %v850_v16 }
 0x121   : > { %v978_v18 = vld [vmem:[%s3453_s2 + $0x1400] sm:$0xff]  ;;  %1608 = vmatpush.msra.mxu1 %v914_v17  ;;  %1589 = vmatmul.f32.vlgmr.msra.gmra.mxu0 %v1389_v20 }
 0x122   : > { %v1046_v19 = vld [vmem:[%s3453_s2 + $0x1620] sm:$0xff]  ;;  %1628 = vmatpush.msra.mxu2 %v978_v18 }
 0x123   : > { %v1391_v21 = vld.sshfl [vmem:[#allocation1 + $0x10] sm:$0xff pattern:$0x73625140]  ;;  %1647 = vmatpush.msra.mxu3 %v1046_v19  ;;  %v1390_v26 = vld.sshfl [vmem:[#allocation1 + $0x8] sm:$0xff pattern:$0x73625140] }
 0x124   : > { %v1166_v22 = vld [vmem:[%s3453_s2 + $0x19e0] sm:$0xff]  ;;  %1629 = vmatmul.f32.vlgmr.msra.gmra.mxu2 %v1391_v21  ;;  %1609 = vmatmul.f32.vlgmr.msra.gmra.mxu1 %v1390_v26 }
 0x125   : > { %v1230_v23 = vld [vmem:[%s3453_s2 + $0x1be0] sm:$0xff]  ;;  %1653 = vmatpush.msrb.mxu0 %v1166_v22 }
 0x126   : > { %v1294_v24 = vld [vmem:[%s3453_s2 + $0x1de0] sm:$0xff]  ;;  %1673 = vmatpush.msrb.mxu1 %v1230_v23 }
 0x127   : > { %v1042_v25 = vld [vmem:[%s3453_s2 + $0x1600] sm:$0xff]  ;;  %1693 = vmatpush.msrb.mxu2 %v1294_v24 }
 0x128   : > { %v1162_v28 = vld [vmem:[%s3453_s2 + $0x19c0] sm:$0xff]  ;;  %1648 = vmatpush.msra.mxu3 %v1042_v25 }
 0x129   : > { %v1226_v29 = vld [vmem:[%s3453_s2 + $0x1bc0] sm:$0xff]  ;;  %1649 = vmatmul.f32.vlgmr.msra.gmra.mxu3 %v1392_v27  ;;  %1654 = vmatpush.msrb.mxu0 %v1162_v28 }
 0x12a   : > { %v1290_v30 = vld [vmem:[%s3453_s2 + $0x1dc0] sm:$0xff]  ;;  %1674 = vmatpush.msrb.mxu1 %v1226_v29 }
 0x12b   : > { %v1358_v31 = vld [vmem:[%s3453_s2 + $0x1fe0] sm:$0xff]  ;;  %1694 = vmatpush.msrb.mxu2 %v1290_v30 }
 0x12c   : > { %v1158_v32 = vld [vmem:[%s3453_s2 + $0x19a0] sm:$0xff]  ;;  %1713 = vmatpush.msrb.mxu3 %v1358_v31 }
 0x12d   : > { %v1222_v33 = vld [vmem:[%s3453_s2 + $0x1ba0] sm:$0xff]  ;;  %1655 = vmatpush.msrb.mxu0 %v1158_v32  ;;  %v1393_v32 = vld.sshfl [vmem:[#allocation1 + $0x20] sm:$0xff pattern:$0x73625140] }
 0x12e   : > { %v1286_v34 = vld [vmem:[%s3453_s2 + $0x1da0] sm:$0xff]  ;;  %1675 = vmatpush.msrb.mxu1 %v1222_v33 }
 0x12f   : > { %v1354_v35 = vld [vmem:[%s3453_s2 + $0x1fc0] sm:$0xff]  ;;  %1695 = vmatpush.msrb.mxu2 %v1286_v34  ;;  %v399_v34 = vld [vmem:[%s3453_s2 + $0x1e8] sm:$0xff] }
 0x130   : > { %v1154_v36 = vld [vmem:[%s3453_s2 + $0x1980] sm:$0xff]  ;;  %1714 = vmatpush.msrb.mxu3 %v1354_v35  ;;  %v463_v35 = vld [vmem:[%s3453_s2 + $0x3e8] sm:$0xff] }
 0x131   : > { %v1218_v37 = vld [vmem:[%s3453_s2 + $0x1b80] sm:$0xff]  ;;  %1656 = vmatpush.msrb.mxu0 %v1154_v36  ;;  %v527_v36 = vld [vmem:[%s3453_s2 + $0x5e8] sm:$0xff] }
 0x132   : > { %v1282_v38 = vld [vmem:[%s3453_s2 + $0x1d80] sm:$0xff]  ;;  %1676 = vmatpush.msrb.mxu1 %v1218_v37 }
 0x133   : > { %v1350_v39 = vld [vmem:[%s3453_s2 + $0x1fa0] sm:$0xff]  ;;  %1696 = vmatpush.msrb.mxu2 %v1282_v38 }
 0x134   : > { %v1150_v40 = vld [vmem:[%s3453_s2 + $0x1960] sm:$0xff]  ;;  %1715 = vmatpush.msrb.mxu3 %v1350_v39  ;;  %v1396_v39 = vld.sshfl [vmem:[#allocation1 + $0x38] sm:$0xff pattern:$0x73625140] }
 0x135   : > { %v1214_v41 = vld [vmem:[%s3453_s2 + $0x1b60] sm:$0xff]  ;;  %1657 = vmatpush.msrb.mxu0 %v1150_v40  ;;  %v395_v40 = vld [vmem:[%s3453_s2 + $0x1c8] sm:$0xff] }
 0x136   : > { %v1278_v42 = vld [vmem:[%s3453_s2 + $0x1d60] sm:$0xff]  ;;  %1677 = vmatpush.msrb.mxu1 %v1214_v41  ;;  %v459_v41 = vld [vmem:[%s3453_s2 + $0x3c8] sm:$0xff] }
 0x137   : > { %v1346_v43 = vld [vmem:[%s3453_s2 + $0x1f80] sm:$0xff]  ;;  %1697 = vmatpush.msrb.mxu2 %v1278_v42  ;;  %v523_v42 = vld [vmem:[%s3453_s2 + $0x5c8] sm:$0xff] }
 0x138   : > { %v1146_v44 = vld [vmem:[%s3453_s2 + $0x1940] sm:$0xff]  ;;  %1716 = vmatpush.msrb.mxu3 %v1346_v43  ;;  %v591_v43 = vld [vmem:[%s3453_s2 + $0x7e8] sm:$0xff] }
 0x139   : > { %v1210_v45 = vld [vmem:[%s3453_s2 + $0x1b40] sm:$0xff]  ;;  %1658 = vmatpush.msrb.mxu0 %v1146_v44  ;;  %v391_v44 = vld [vmem:[%s3453_s2 + $0x1a8] sm:$0xff] }
 0x13a   : > { %v1274_v46 = vld [vmem:[%s3453_s2 + $0x1d40] sm:$0xff]  ;;  %1678 = vmatpush.msrb.mxu1 %v1210_v45  ;;  %v455_v45 = vld [vmem:[%s3453_s2 + $0x3a8] sm:$0xff] }
 0x13b   : > { %v1342_v47 = vld [vmem:[%s3453_s2 + $0x1f60] sm:$0xff]  ;;  %1698 = vmatpush.msrb.mxu2 %v1274_v46  ;;  %v519_v46 = vld [vmem:[%s3453_s2 + $0x5a8] sm:$0xff] }
 0x13c   : > { %v1142_v52 = vld [vmem:[%s3453_s2 + $0x1920] sm:$0xff]  ;;  %1717 = vmatpush.msrb.mxu3 %v1342_v47  ;;  %v587_v47 = vld [vmem:[%s3453_s2 + $0x7c8] sm:$0xff] }
 0x13d   : > { %v1206_v53 = vld [vmem:[%s3453_s2 + $0x1b20] sm:$0xff]  ;;  %1659 = vmatpush.msrb.mxu0 %v1142_v52  ;;  %v387_v52 = vld [vmem:[%s3453_s2 + $0x188] sm:$0xff] }
 0x13e   : > { %v1270_v54 = vld [vmem:[%s3453_s2 + $0x1d20] sm:$0xff]  ;;  %1679 = vmatpush.msrb.mxu1 %v1206_v53  ;;  %v451_v53 = vld [vmem:[%s3453_s2 + $0x388] sm:$0xff] }
 0x13f   : > { %v1338_v55 = vld [vmem:[%s3453_s2 + $0x1f40] sm:$0xff]  ;;  %1699 = vmatpush.msrb.mxu2 %v1270_v54  ;;  %v515_v54 = vld [vmem:[%s3453_s2 + $0x588] sm:$0xff] }
 0x140   : > { %v1138_v56 = vld [vmem:[%s3453_s2 + $0x1900] sm:$0xff]  ;;  %1718 = vmatpush.msrb.mxu3 %v1338_v55  ;;  %v583_v55 = vld [vmem:[%s3453_s2 + $0x7a8] sm:$0xff] }
 0x141   : > { %v1202_v57 = vld [vmem:[%s3453_s2 + $0x1b00] sm:$0xff]  ;;  %1660 = vmatpush.msrb.mxu0 %v1138_v56  ;;  %v383_v56 = vld [vmem:[%s3453_s2 + $0x168] sm:$0xff] }
 0x142   : > { %v1266_v58 = vld [vmem:[%s3453_s2 + $0x1d00] sm:$0xff]  ;;  %1680 = vmatpush.msrb.mxu1 %v1202_v57  ;;  %v447_v57 = vld [vmem:[%s3453_s2 + $0x368] sm:$0xff] }
 0x143   : > { %v1334_v59 = vld [vmem:[%s3453_s2 + $0x1f20] sm:$0xff]  ;;  %1700 = vmatpush.msrb.mxu2 %v1266_v58  ;;  %v511_v58 = vld [vmem:[%s3453_s2 + $0x568] sm:$0xff] }
 0x144   : > { %v1134_v60 = vld [vmem:[%s3453_s2 + $0x18e0] sm:$0xff]  ;;  %1719 = vmatpush.msrb.mxu3 %v1334_v59  ;;  %v579_v59 = vld [vmem:[%s3453_s2 + $0x788] sm:$0xff] }
 0x145   : > { %v1198_v61 = vld [vmem:[%s3453_s2 + $0x1ae0] sm:$0xff]  ;;  %1661 = vmatpush.msrb.mxu0 %v1134_v60  ;;  %v379_v60 = vld [vmem:[%s3453_s2 + $0x148] sm:$0xff] }
 0x146   : > { %v1262_v62 = vld [vmem:[%s3453_s2 + $0x1ce0] sm:$0xff]  ;;  %1681 = vmatpush.msrb.mxu1 %v1198_v61  ;;  %v443_v61 = vld [vmem:[%s3453_s2 + $0x348] sm:$0xff] }
 0x147   : > { %v1330_v63 = vld [vmem:[%s3453_s2 + $0x1f00] sm:$0xff]  ;;  %1701 = vmatpush.msrb.mxu2 %v1262_v62  ;;  %v507_v62 = vld [vmem:[%s3453_s2 + $0x548] sm:$0xff] }
 0x148   : > { %v1130_v4 = vld [vmem:[%s3453_s2 + $0x18c0] sm:$0xff]  ;;  %1720 = vmatpush.msrb.mxu3 %v1330_v63  ;;  %v575_v63 = vld [vmem:[%s3453_s2 + $0x768] sm:$0xff] }
 0x149   : > { %v1194_v5 = vld [vmem:[%s3453_s2 + $0x1ac0] sm:$0xff]  ;;  %1662 = vmatpush.msrb.mxu0 %v1130_v4  ;;  %v375_v4 = vld [vmem:[%s3453_s2 + $0x128] sm:$0xff] }
 0x14a   : > { %v1258_v6 = vld [vmem:[%s3453_s2 + $0x1cc0] sm:$0xff]  ;;  %1682 = vmatpush.msrb.mxu1 %v1194_v5  ;;  %v439_v5 = vld [vmem:[%s3453_s2 + $0x328] sm:$0xff] }
 0x14b   : > { %v1326_v7 = vld [vmem:[%s3453_s2 + $0x1ee0] sm:$0xff]  ;;  %1702 = vmatpush.msrb.mxu2 %v1258_v6  ;;  %v503_v6 = vld [vmem:[%s3453_s2 + $0x528] sm:$0xff] }
 0x14c   : > { %v1126_v8 = vld [vmem:[%s3453_s2 + $0x18a0] sm:$0xff]  ;;  %1721 = vmatpush.msrb.mxu3 %v1326_v7  ;;  %v571_v7 = vld [vmem:[%s3453_s2 + $0x748] sm:$0xff] }
 0x14d   : > { %v1190_v9 = vld [vmem:[%s3453_s2 + $0x1aa0] sm:$0xff]  ;;  %1663 = vmatpush.msrb.mxu0 %v1126_v8  ;;  %v371_v8 = vld [vmem:[%s3453_s2 + $0x108] sm:$0xff] }
 0x14e   : > { %v1254_v10 = vld [vmem:[%s3453_s2 + $0x1ca0] sm:$0xff]  ;;  %1683 = vmatpush.msrb.mxu1 %v1190_v9  ;;  %v435_v9 = vld [vmem:[%s3453_s2 + $0x308] sm:$0xff] }
 0x14f   : > { %v1322_v11 = vld [vmem:[%s3453_s2 + $0x1ec0] sm:$0xff]  ;;  %1703 = vmatpush.msrb.mxu2 %v1254_v10  ;;  %v499_v10 = vld [vmem:[%s3453_s2 + $0x508] sm:$0xff] }
 0x150   : > { %v1122_v12 = vld [vmem:[%s3453_s2 + $0x1880] sm:$0xff]  ;;  %1722 = vmatpush.msrb.mxu3 %v1322_v11  ;;  %v567_v11 = vld [vmem:[%s3453_s2 + $0x728] sm:$0xff] }
 0x151   : > { %v1186_v13 = vld [vmem:[%s3453_s2 + $0x1a80] sm:$0xff]  ;;  %1664 = vmatpush.msrb.mxu0 %v1122_v12  ;;  %v367_v12 = vld [vmem:[%s3453_s2 + $0xe8] sm:$0xff] }
 0x152   : > { %v1250_v14 = vld [vmem:[%s3453_s2 + $0x1c80] sm:$0xff]  ;;  %1684 = vmatpush.msrb.mxu1 %v1186_v13  ;;  %v431_v13 = vld [vmem:[%s3453_s2 + $0x2e8] sm:$0xff] }
 0x153   : > { %v1318_v15 = vld [vmem:[%s3453_s2 + $0x1ea0] sm:$0xff]  ;;  %1704 = vmatpush.msrb.mxu2 %v1250_v14  ;;  %v495_v14 = vld [vmem:[%s3453_s2 + $0x4e8] sm:$0xff] }
 0x154   : > { %v1118_v16 = vld [vmem:[%s3453_s2 + $0x1860] sm:$0xff]  ;;  %1723 = vmatpush.msrb.mxu3 %v1318_v15  ;;  %v563_v15 = vld [vmem:[%s3453_s2 + $0x708] sm:$0xff] }
 0x155   : > { %v1182_v17 = vld [vmem:[%s3453_s2 + $0x1a60] sm:$0xff]  ;;  %1665 = vmatpush.msrb.mxu0 %v1118_v16  ;;  %v363_v16 = vld [vmem:[%s3453_s2 + $0xc8] sm:$0xff] }
 0x156   : > { %v1246_v18 = vld [vmem:[%s3453_s2 + $0x1c60] sm:$0xff]  ;;  %1685 = vmatpush.msrb.mxu1 %v1182_v17  ;;  %v427_v17 = vld [vmem:[%s3453_s2 + $0x2c8] sm:$0xff] }
 0x157   : > { %v1314_v19 = vld [vmem:[%s3453_s2 + $0x1e80] sm:$0xff]  ;;  %1705 = vmatpush.msrb.mxu2 %v1246_v18  ;;  %v491_v18 = vld [vmem:[%s3453_s2 + $0x4c8] sm:$0xff] }
 0x158   : > { %v1114_v20 = vld [vmem:[%s3453_s2 + $0x1840] sm:$0xff]  ;;  %1724 = vmatpush.msrb.mxu3 %v1314_v19  ;;  %v559_v19 = vld [vmem:[%s3453_s2 + $0x6e8] sm:$0xff] }
 0x159   : > { %v1178_v21 = vld [vmem:[%s3453_s2 + $0x1a40] sm:$0xff]  ;;  %1666 = vmatpush.msrb.mxu0 %v1114_v20  ;;  %v359_v20 = vld [vmem:[%s3453_s2 + $0xa8] sm:$0xff] }
 0x15a   : > { %v1242_v22 = vld [vmem:[%s3453_s2 + $0x1c40] sm:$0xff]  ;;  %1686 = vmatpush.msrb.mxu1 %v1178_v21  ;;  %v423_v21 = vld [vmem:[%s3453_s2 + $0x2a8] sm:$0xff] }
 0x15b   : > { %v1310_v23 = vld [vmem:[%s3453_s2 + $0x1e60] sm:$0xff]  ;;  %1706 = vmatpush.msrb.mxu2 %v1242_v22  ;;  %v487_v22 = vld [vmem:[%s3453_s2 + $0x4a8] sm:$0xff] }
 0x15c   : > { %v1110_v24 = vld [vmem:[%s3453_s2 + $0x1820] sm:$0xff]  ;;  %1725 = vmatpush.msrb.mxu3 %v1310_v23  ;;  %v555_v23 = vld [vmem:[%s3453_s2 + $0x6c8] sm:$0xff] }
 0x15d   : > { %v1174_v25 = vld [vmem:[%s3453_s2 + $0x1a20] sm:$0xff]  ;;  %1667 = vmatpush.msrb.mxu0 %v1110_v24  ;;  %v355_v24 = vld [vmem:[%s3453_s2 + $0x88] sm:$0xff] }
 0x15e   : > { %v1238_v26 = vld [vmem:[%s3453_s2 + $0x1c20] sm:$0xff]  ;;  %1687 = vmatpush.msrb.mxu1 %v1174_v25  ;;  %v419_v25 = vld [vmem:[%s3453_s2 + $0x288] sm:$0xff] }
 0x15f   : > { %v1306_v27 = vld [vmem:[%s3453_s2 + $0x1e40] sm:$0xff]  ;;  %1707 = vmatpush.msrb.mxu2 %v1238_v26  ;;  %v483_v26 = vld [vmem:[%s3453_s2 + $0x488] sm:$0xff] }
 0x160   : > { %v1106_v28 = vld [vmem:[%s3453_s2 + $0x1800] sm:$0xff]  ;;  %1726 = vmatpush.msrb.mxu3 %v1306_v27  ;;  %v551_v27 = vld [vmem:[%s3453_s2 + $0x6a8] sm:$0xff] }
 0x161   : > { %v1170_v29 = vld [vmem:[%s3453_s2 + $0x1a00] sm:$0xff]  ;;  %1668 = vmatpush.msrb.mxu0 %v1106_v28  ;;  %v351_v28 = vld [vmem:[%s3453_s2 + $0x68] sm:$0xff] }
 0x162   : > { %v1234_v30 = vld [vmem:[%s3453_s2 + $0x1c00] sm:$0xff]  ;;  %1688 = vmatpush.msrb.mxu1 %v1170_v29  ;;  %1669 = vmatmul.f32.vlgmr.msrb.gmra.mxu0 %v1393_v32  ;;  %v415_v29 = vld [vmem:[%s3453_s2 + $0x268] sm:$0xff] }
 0x163   : > { %v1302_v31 = vld [vmem:[%s3453_s2 + $0x1e20] sm:$0xff]  ;;  %1708 = vmatpush.msrb.mxu2 %v1234_v30  ;;  %1733 = vmatpush.msra.mxu0 %v399_v34  ;;  %v479_v30 = vld [vmem:[%s3453_s2 + $0x468] sm:$0xff] }
 0x164   : > { %v1395_v33 = vld.sshfl [vmem:[#allocation1 + $0x30] sm:$0xff pattern:$0x73625140]  ;;  %1727 = vmatpush.msrb.mxu3 %v1302_v31  ;;  %v1394_v38 = vld.sshfl [vmem:[#allocation1 + $0x28] sm:$0xff pattern:$0x73625140]  ;;  %1753 = vmatpush.msra.mxu1 %v463_v35 }
 0x165   : > { %v1298_v37 = vld [vmem:[%s3453_s2 + $0x1e00] sm:$0xff]  ;;  %1709 = vmatmul.f32.vlgmr.msrb.gmra.mxu2 %v1395_v33  ;;  %1689 = vmatmul.f32.vlgmr.msrb.gmra.mxu1 %v1394_v38  ;;  %v547_v31 = vld [vmem:[%s3453_s2 + $0x688] sm:$0xff] }
 0x166   : > { %1773 = vmatpush.msra.mxu2 %v527_v36  ;;  %1728 = vmatpush.msrb.mxu3 %v1298_v37  ;;  %v347_v32 = vld [vmem:[%s3453_s2 + $0x48] sm:$0xff] }
 0x167   : > { %1729 = vmatmul.f32.vlgmr.msrb.gmra.mxu3 %v1396_v39  ;;  %1734 = vmatpush.msra.mxu0 %v395_v40  ;;  %v411_v33 = vld [vmem:[%s3453_s2 + $0x248] sm:$0xff] }
 0x168   : > { %1754 = vmatpush.msra.mxu1 %v459_v41  ;;  %1774 = vmatpush.msra.mxu2 %v523_v42  ;;  %v475_v34 = vld [vmem:[%s3453_s2 + $0x448] sm:$0xff] }
 0x169   : > { %1793 = vmatpush.msra.mxu3 %v591_v43  ;;  %1735 = vmatpush.msra.mxu0 %v391_v44  ;;  %v543_v35 = vld [vmem:[%s3453_s2 + $0x668] sm:$0xff] }
 0x16a   : > { %1755 = vmatpush.msra.mxu1 %v455_v45  ;;  %1775 = vmatpush.msra.mxu2 %v519_v46  ;;  %v343_v36 = vld [vmem:[%s3453_s2 + $0x28] sm:$0xff] }
 0x16b   : > { %1794 = vmatpush.msra.mxu3 %v587_v47  ;;  %1736 = vmatpush.msra.mxu0 %v387_v52  ;;  %v407_v37 = vld [vmem:[%s3453_s2 + $0x228] sm:$0xff] }
 0x16c   : > { %1756 = vmatpush.msra.mxu1 %v451_v53  ;;  %1776 = vmatpush.msra.mxu2 %v515_v54  ;;  %v471_v38 = vld [vmem:[%s3453_s2 + $0x428] sm:$0xff] }
 0x16d   : > { %1795 = vmatpush.msra.mxu3 %v583_v55  ;;  %1737 = vmatpush.msra.mxu0 %v383_v56  ;;  %v539_v39 = vld [vmem:[%s3453_s2 + $0x648] sm:$0xff] }
 0x16e   : > { %1757 = vmatpush.msra.mxu1 %v447_v57  ;;  %1777 = vmatpush.msra.mxu2 %v511_v58  ;;  %v339_v40 = vld [vmem:[%s3453_s2 + $0x8] sm:$0xff] }
 0x16f   : > { %1796 = vmatpush.msra.mxu3 %v579_v59  ;;  %1738 = vmatpush.msra.mxu0 %v379_v60  ;;  %v403_v41 = vld [vmem:[%s3453_s2 + $0x208] sm:$0xff] }
 0x170   : > { %1758 = vmatpush.msra.mxu1 %v443_v61  ;;  %1778 = vmatpush.msra.mxu2 %v507_v62  ;;  %v467_v42 = vld [vmem:[%s3453_s2 + $0x408] sm:$0xff] }
 0x171   : > { %1797 = vmatpush.msra.mxu3 %v575_v63  ;;  %1739 = vmatpush.msra.mxu0 %v375_v4  ;;  %v535_v43 = vld [vmem:[%s3453_s2 + $0x628] sm:$0xff] }
 0x172   : > { %1759 = vmatpush.msra.mxu1 %v439_v5  ;;  %1779 = vmatpush.msra.mxu2 %v503_v6  ;;  %v655_v44 = vld [vmem:[%s3453_s2 + $0x9e8] sm:$0xff] }
 0x173   : > { %1798 = vmatpush.msra.mxu3 %v571_v7  ;;  %1740 = vmatpush.msra.mxu0 %v371_v8  ;;  %v719_v45 = vld [vmem:[%s3453_s2 + $0xbe8] sm:$0xff] }
 0x174   : > { %1760 = vmatpush.msra.mxu1 %v435_v9  ;;  %1780 = vmatpush.msra.mxu2 %v499_v10  ;;  %v783_v46 = vld [vmem:[%s3453_s2 + $0xde8] sm:$0xff] }
 0x175   : > { %1799 = vmatpush.msra.mxu3 %v567_v11  ;;  %1741 = vmatpush.msra.mxu0 %v367_v12  ;;  %v531_v47 = vld [vmem:[%s3453_s2 + $0x608] sm:$0xff] }
 0x176   : > { %1761 = vmatpush.msra.mxu1 %v431_v13  ;;  %1781 = vmatpush.msra.mxu2 %v495_v14  ;;  %v651_v52 = vld [vmem:[%s3453_s2 + $0x9c8] sm:$0xff] }
 0x177   : > { %1800 = vmatpush.msra.mxu3 %v563_v15  ;;  %1742 = vmatpush.msra.mxu0 %v363_v16  ;;  %v715_v53 = vld [vmem:[%s3453_s2 + $0xbc8] sm:$0xff] }
 0x178   : > { %1762 = vmatpush.msra.mxu1 %v427_v17  ;;  %1782 = vmatpush.msra.mxu2 %v491_v18  ;;  %v779_v54 = vld [vmem:[%s3453_s2 + $0xdc8] sm:$0xff] }
 0x179   : > { %1801 = vmatpush.msra.mxu3 %v559_v19  ;;  %1743 = vmatpush.msra.mxu0 %v359_v20  ;;  %v847_v55 = vld [vmem:[%s3453_s2 + $0xfe8] sm:$0xff] }
 0x17a   : > { %1763 = vmatpush.msra.mxu1 %v423_v21  ;;  %1783 = vmatpush.msra.mxu2 %v487_v22  ;;  %v647_v56 = vld [vmem:[%s3453_s2 + $0x9a8] sm:$0xff] }
 0x17b   : > { %1802 = vmatpush.msra.mxu3 %v555_v23  ;;  %1744 = vmatpush.msra.mxu0 %v355_v24  ;;  %v711_v57 = vld [vmem:[%s3453_s2 + $0xba8] sm:$0xff] }
 0x17c   : > { %1764 = vmatpush.msra.mxu1 %v419_v25  ;;  %1784 = vmatpush.msra.mxu2 %v483_v26  ;;  %v775_v58 = vld [vmem:[%s3453_s2 + $0xda8] sm:$0xff] }
 0x17d   : > { %1803 = vmatpush.msra.mxu3 %v551_v27  ;;  %1745 = vmatpush.msra.mxu0 %v351_v28  ;;  %v843_v59 = vld [vmem:[%s3453_s2 + $0xfc8] sm:$0xff] }
 0x17e   : > { %1765 = vmatpush.msra.mxu1 %v415_v29  ;;  %1785 = vmatpush.msra.mxu2 %v479_v30  ;;  %v643_v60 = vld [vmem:[%s3453_s2 + $0x988] sm:$0xff] }
 0x17f   : > { %1804 = vmatpush.msra.mxu3 %v547_v31  ;;  %1746 = vmatpush.msra.mxu0 %v347_v32  ;;  %v707_v61 = vld [vmem:[%s3453_s2 + $0xb88] sm:$0xff] }
 0x180   : > { %1766 = vmatpush.msra.mxu1 %v411_v33  ;;  %1786 = vmatpush.msra.mxu2 %v475_v34  ;;  %v771_v62 = vld [vmem:[%s3453_s2 + $0xd88] sm:$0xff] }
 0x181   : > { %1805 = vmatpush.msra.mxu3 %v543_v35  ;;  %1747 = vmatpush.msra.mxu0 %v343_v36  ;;  %v839_v63 = vld [vmem:[%s3453_s2 + $0xfa8] sm:$0xff] }
 0x182   : > { %1767 = vmatpush.msra.mxu1 %v407_v37  ;;  %1787 = vmatpush.msra.mxu2 %v471_v38  ;;  %v639_v4 = vld [vmem:[%s3453_s2 + $0x968] sm:$0xff] }
 0x183   : > { %1806 = vmatpush.msra.mxu3 %v539_v39  ;;  %1748 = vmatpush.msra.mxu0 %v339_v40  ;;  %v703_v5 = vld [vmem:[%s3453_s2 + $0xb68] sm:$0xff] }
 0x184   : > { %1768 = vmatpush.msra.mxu1 %v403_v41  ;;  %1788 = vmatpush.msra.mxu2 %v467_v42  ;;  %v767_v6 = vld [vmem:[%s3453_s2 + $0xd68] sm:$0xff] }
 0x185   : > { %1807 = vmatpush.msra.mxu3 %v535_v43  ;;  %1813 = vmatpush.msrb.mxu0 %v655_v44  ;;  %v835_v7 = vld [vmem:[%s3453_s2 + $0xf88] sm:$0xff] }
 0x186   : > { %1833 = vmatpush.msrb.mxu1 %v719_v45  ;;  %1853 = vmatpush.msrb.mxu2 %v783_v46  ;;  %v635_v8 = vld [vmem:[%s3453_s2 + $0x948] sm:$0xff] }
 0x187   : > { %1808 = vmatpush.msra.mxu3 %v531_v47  ;;  %1814 = vmatpush.msrb.mxu0 %v651_v52  ;;  %v699_v9 = vld [vmem:[%s3453_s2 + $0xb48] sm:$0xff] }
 0x188   : > { %1834 = vmatpush.msrb.mxu1 %v715_v53  ;;  %1854 = vmatpush.msrb.mxu2 %v779_v54  ;;  %v763_v10 = vld [vmem:[%s3453_s2 + $0xd48] sm:$0xff] }
 0x189   : > { %1873 = vmatpush.msrb.mxu3 %v847_v55  ;;  %1815 = vmatpush.msrb.mxu0 %v647_v56  ;;  %v831_v11 = vld [vmem:[%s3453_s2 + $0xf68] sm:$0xff] }
 0x18a   : > { %1835 = vmatpush.msrb.mxu1 %v711_v57  ;;  %1855 = vmatpush.msrb.mxu2 %v775_v58  ;;  %v631_v12 = vld [vmem:[%s3453_s2 + $0x928] sm:$0xff] }
 0x18b   : > { %1874 = vmatpush.msrb.mxu3 %v843_v59  ;;  %1816 = vmatpush.msrb.mxu0 %v643_v60  ;;  %v695_v13 = vld [vmem:[%s3453_s2 + $0xb28] sm:$0xff] }
 0x18c   : > { %1836 = vmatpush.msrb.mxu1 %v707_v61  ;;  %1856 = vmatpush.msrb.mxu2 %v771_v62  ;;  %v759_v14 = vld [vmem:[%s3453_s2 + $0xd28] sm:$0xff] }
 0x18d   : > { %1875 = vmatpush.msrb.mxu3 %v839_v63  ;;  %1817 = vmatpush.msrb.mxu0 %v639_v4  ;;  %v827_v15 = vld [vmem:[%s3453_s2 + $0xf48] sm:$0xff] }
 0x18e   : > { %1837 = vmatpush.msrb.mxu1 %v703_v5  ;;  %1857 = vmatpush.msrb.mxu2 %v767_v6  ;;  %v627_v16 = vld [vmem:[%s3453_s2 + $0x908] sm:$0xff] }
 0x18f   : > { %1876 = vmatpush.msrb.mxu3 %v835_v7  ;;  %1818 = vmatpush.msrb.mxu0 %v635_v8  ;;  %v691_v17 = vld [vmem:[%s3453_s2 + $0xb08] sm:$0xff] }
 0x190   : > { %1838 = vmatpush.msrb.mxu1 %v699_v9  ;;  %1858 = vmatpush.msrb.mxu2 %v763_v10  ;;  %v755_v18 = vld [vmem:[%s3453_s2 + $0xd08] sm:$0xff] }
 0x191   : > { %1877 = vmatpush.msrb.mxu3 %v831_v11  ;;  %1819 = vmatpush.msrb.mxu0 %v631_v12  ;;  %v823_v19 = vld [vmem:[%s3453_s2 + $0xf28] sm:$0xff] }
 0x192   : > { %1839 = vmatpush.msrb.mxu1 %v695_v13  ;;  %1859 = vmatpush.msrb.mxu2 %v759_v14  ;;  %v623_v20 = vld [vmem:[%s3453_s2 + $0x8e8] sm:$0xff] }
 0x193   : > { %1878 = vmatpush.msrb.mxu3 %v827_v15  ;;  %v687_v21 = vld [vmem:[%s3453_s2 + $0xae8] sm:$0xff]  ;;  %1820 = vmatpush.msrb.mxu0 %v627_v16 }
 0x194   : > { %1840 = vmatpush.msrb.mxu1 %v691_v17  ;;  %v751_v22 = vld [vmem:[%s3453_s2 + $0xce8] sm:$0xff]  ;;  %1860 = vmatpush.msrb.mxu2 %v755_v18 }
 0x195   : > { %v819_v23 = vld [vmem:[%s3453_s2 + $0xf08] sm:$0xff]  ;;  %1879 = vmatpush.msrb.mxu3 %v823_v19  ;;  %1821 = vmatpush.msrb.mxu0 %v623_v20 }
 0x196   : > { %v619_v24 = vld [vmem:[%s3453_s2 + $0x8c8] sm:$0xff]  ;;  %1841 = vmatpush.msrb.mxu1 %v687_v21  ;;  %1861 = vmatpush.msrb.mxu2 %v751_v22 }
 0x197   : > { %v683_v25 = vld [vmem:[%s3453_s2 + $0xac8] sm:$0xff]  ;;  %1880 = vmatpush.msrb.mxu3 %v819_v23  ;;  %1822 = vmatpush.msrb.mxu0 %v619_v24 }
 0x198   : > { %v747_v26 = vld [vmem:[%s3453_s2 + $0xcc8] sm:$0xff]  ;;  %1842 = vmatpush.msrb.mxu1 %v683_v25  ;;  %1749 = vmatmul.f32.vlgmr.msra.gmra.mxu0 %v3591_v48 }
 0x199   : > { %v815_v27 = vld [vmem:[%s3453_s2 + $0xee8] sm:$0xff]  ;;  %1862 = vmatpush.msrb.mxu2 %v747_v26  ;;  %1769 = vmatmul.f32.vlgmr.msra.gmra.mxu1 %v3593_v49 }
 0x19a   : > { %v615_v28 = vld [vmem:[%s3453_s2 + $0x8a8] sm:$0xff]  ;;  %1881 = vmatpush.msrb.mxu3 %v815_v27  ;;  %1789 = vmatmul.f32.vlgmr.msra.gmra.mxu2 %v3595_v50 }
 0x19b   : > { %v679_v29 = vld [vmem:[%s3453_s2 + $0xaa8] sm:$0xff]  ;;  %1823 = vmatpush.msrb.mxu0 %v615_v28  ;;  %1809 = vmatmul.f32.vlgmr.msra.gmra.mxu3 %v3597_v51 }
 0x19c   : > { %v743_v30 = vld [vmem:[%s3453_s2 + $0xca8] sm:$0xff]  ;;  %1843 = vmatpush.msrb.mxu1 %v679_v29 }
 0x19d   : > { %v811_v31 = vld [vmem:[%s3453_s2 + $0xec8] sm:$0xff]  ;;  %1863 = vmatpush.msrb.mxu2 %v743_v30 }
 0x19e   : > { %v611_v32 = vld [vmem:[%s3453_s2 + $0x888] sm:$0xff]  ;;  %1882 = vmatpush.msrb.mxu3 %v811_v31 }
 0x19f   : > { %v675_v33 = vld [vmem:[%s3453_s2 + $0xa88] sm:$0xff]  ;;  %1824 = vmatpush.msrb.mxu0 %v611_v32 }
 0x1a0   : > { %v739_v34 = vld [vmem:[%s3453_s2 + $0xc88] sm:$0xff]  ;;  %1844 = vmatpush.msrb.mxu1 %v675_v33 }
 0x1a1   : > { %v807_v35 = vld [vmem:[%s3453_s2 + $0xea8] sm:$0xff]  ;;  %1864 = vmatpush.msrb.mxu2 %v739_v34 }
 0x1a2   : > { %v607_v36 = vld [vmem:[%s3453_s2 + $0x868] sm:$0xff]  ;;  %1883 = vmatpush.msrb.mxu3 %v807_v35 }
 0x1a3   : > { %v671_v37 = vld [vmem:[%s3453_s2 + $0xa68] sm:$0xff]  ;;  %1825 = vmatpush.msrb.mxu0 %v607_v36 }
 0x1a4   : > { %v735_v38 = vld [vmem:[%s3453_s2 + $0xc68] sm:$0xff]  ;;  %1845 = vmatpush.msrb.mxu1 %v671_v37 }
 0x1a5   : > { %v803_v39 = vld [vmem:[%s3453_s2 + $0xe88] sm:$0xff]  ;;  %1865 = vmatpush.msrb.mxu2 %v735_v38 }
 0x1a6   : > { %v603_v40 = vld [vmem:[%s3453_s2 + $0x848] sm:$0xff]  ;;  %1884 = vmatpush.msrb.mxu3 %v803_v39 }
 0x1a7   : > { %v667_v41 = vld [vmem:[%s3453_s2 + $0xa48] sm:$0xff]  ;;  %1826 = vmatpush.msrb.mxu0 %v603_v40 }
 0x1a8   : > { %v731_v42 = vld [vmem:[%s3453_s2 + $0xc48] sm:$0xff]  ;;  %1846 = vmatpush.msrb.mxu1 %v667_v41 }
 0x1a9   : > { %v799_v43 = vld [vmem:[%s3453_s2 + $0xe68] sm:$0xff]  ;;  %1866 = vmatpush.msrb.mxu2 %v731_v42 }
 0x1aa   : > { %v599_v44 = vld [vmem:[%s3453_s2 + $0x828] sm:$0xff]  ;;  %1885 = vmatpush.msrb.mxu3 %v799_v43 }
 0x1ab   : > { %v663_v45 = vld [vmem:[%s3453_s2 + $0xa28] sm:$0xff]  ;;  %1827 = vmatpush.msrb.mxu0 %v599_v44 }
 0x1ac   : > { %v727_v46 = vld [vmem:[%s3453_s2 + $0xc28] sm:$0xff]  ;;  %1847 = vmatpush.msrb.mxu1 %v663_v45 }
 0x1ad   : > { %v795_v47 = vld [vmem:[%s3453_s2 + $0xe48] sm:$0xff]  ;;  %1867 = vmatpush.msrb.mxu2 %v727_v46 }
 0x1ae   : > { %v595_v52 = vld [vmem:[%s3453_s2 + $0x808] sm:$0xff]  ;;  %1886 = vmatpush.msrb.mxu3 %v795_v47 }
 0x1af   : > { %v659_v53 = vld [vmem:[%s3453_s2 + $0xa08] sm:$0xff]  ;;  %1828 = vmatpush.msrb.mxu0 %v595_v52 }
 0x1b0   : > { %v723_v54 = vld [vmem:[%s3453_s2 + $0xc08] sm:$0xff]  ;;  %1848 = vmatpush.msrb.mxu1 %v659_v53  ;;  %1829 = vmatmul.f32.vlgmr.msrb.gmra.mxu0 %v3615_v1 }
 0x1b1   : > { %v791_v55 = vld [vmem:[%s3453_s2 + $0xe28] sm:$0xff]  ;;  %1868 = vmatpush.msrb.mxu2 %v723_v54  ;;  %1849 = vmatmul.f32.vlgmr.msrb.gmra.mxu1 %v3619_v3 }
 0x1b2   : > { %v911_v56 = vld [vmem:[%s3453_s2 + $0x11e8] sm:$0xff]  ;;  %1887 = vmatpush.msrb.mxu3 %v791_v55  ;;  %1869 = vmatmul.f32.vlgmr.msrb.gmra.mxu2 %v3613_v0 }
 0x1b3   : > { %v975_v57 = vld [vmem:[%s3453_s2 + $0x13e8] sm:$0xff]  ;;  %1893 = vmatpush.msra.mxu0 %v911_v56 }
 0x1b4   : > { %v1039_v58 = vld [vmem:[%s3453_s2 + $0x15e8] sm:$0xff]  ;;  %1913 = vmatpush.msra.mxu1 %v975_v57 }
 0x1b5   : > { %v787_v59 = vld [vmem:[%s3453_s2 + $0xe08] sm:$0xff]  ;;  %1933 = vmatpush.msra.mxu2 %v1039_v58 }
 0x1b6   : > { %v907_v60 = vld [vmem:[%s3453_s2 + $0x11c8] sm:$0xff]  ;;  %1888 = vmatpush.msrb.mxu3 %v787_v59 }
 0x1b7   : > { %v971_v61 = vld [vmem:[%s3453_s2 + $0x13c8] sm:$0xff]  ;;  %1894 = vmatpush.msra.mxu0 %v907_v60  ;;  %1889 = vmatmul.f32.vlgmr.msrb.gmra.mxu3 %v3617_v2 }
 0x1b8   : > { %v1035_v62 = vld [vmem:[%s3453_s2 + $0x15c8] sm:$0xff]  ;;  %1914 = vmatpush.msra.mxu1 %v971_v61 }
 0x1b9   : > { %v1103_v63 = vld [vmem:[%s3453_s2 + $0x17e8] sm:$0xff]  ;;  %1934 = vmatpush.msra.mxu2 %v1035_v62 }
 0x1ba   : > { %v903_v4 = vld [vmem:[%s3453_s2 + $0x11a8] sm:$0xff]  ;;  %1953 = vmatpush.msra.mxu3 %v1103_v63 }
 0x1bb   : > { %v967_v5 = vld [vmem:[%s3453_s2 + $0x13a8] sm:$0xff]  ;;  %1895 = vmatpush.msra.mxu0 %v903_v4 }
 0x1bc   : > { %v1031_v6 = vld [vmem:[%s3453_s2 + $0x15a8] sm:$0xff]  ;;  %1915 = vmatpush.msra.mxu1 %v967_v5 }
 0x1bd   : > { %v1099_v7 = vld [vmem:[%s3453_s2 + $0x17c8] sm:$0xff]  ;;  %1935 = vmatpush.msra.mxu2 %v1031_v6 }
 0x1be   : > { %v899_v8 = vld [vmem:[%s3453_s2 + $0x1188] sm:$0xff]  ;;  %1954 = vmatpush.msra.mxu3 %v1099_v7 }
 0x1bf   : > { %v963_v9 = vld [vmem:[%s3453_s2 + $0x1388] sm:$0xff]  ;;  %1896 = vmatpush.msra.mxu0 %v899_v8  ;;  %v3065_v8 = vld.sshfl [vmem:[#allocation1] sm:$0xff pattern:$0x73625140] }
 0x1c0   : > { %v1027_v10 = vld [vmem:[%s3453_s2 + $0x1588] sm:$0xff]  ;;  %1916 = vmatpush.msra.mxu1 %v963_v9 }
 0x1c1   : > { %v1095_v11 = vld [vmem:[%s3453_s2 + $0x17a8] sm:$0xff]  ;;  %1936 = vmatpush.msra.mxu2 %v1027_v10 }
 0x1c2   : > { %v895_v12 = vld [vmem:[%s3453_s2 + $0x1168] sm:$0xff]  ;;  %1955 = vmatpush.msra.mxu3 %v1095_v11 }
 0x1c3   : > { %v959_v13 = vld [vmem:[%s3453_s2 + $0x1368] sm:$0xff]  ;;  %1897 = vmatpush.msra.mxu0 %v895_v12 }
 0x1c4   : > { %v1023_v14 = vld [vmem:[%s3453_s2 + $0x1568] sm:$0xff]  ;;  %1917 = vmatpush.msra.mxu1 %v959_v13 }
 0x1c5   : > { %v1091_v15 = vld [vmem:[%s3453_s2 + $0x1788] sm:$0xff]  ;;  %1937 = vmatpush.msra.mxu2 %v1023_v14  ;;  %v3067_v14 = vld.sshfl [vmem:[#allocation1 + $0x8] sm:$0xff pattern:$0x73625140] }
 0x1c6   : > { %v891_v16 = vld [vmem:[%s3453_s2 + $0x1148] sm:$0xff]  ;;  %1956 = vmatpush.msra.mxu3 %v1091_v15 }
 0x1c7   : > { %v955_v17 = vld [vmem:[%s3453_s2 + $0x1348] sm:$0xff]  ;;  %1898 = vmatpush.msra.mxu0 %v891_v16 }
 0x1c8   : > { %v1019_v18 = vld [vmem:[%s3453_s2 + $0x1548] sm:$0xff]  ;;  %1918 = vmatpush.msra.mxu1 %v955_v17 }
 0x1c9   : > { %v1087_v19 = vld [vmem:[%s3453_s2 + $0x1768] sm:$0xff]  ;;  %1938 = vmatpush.msra.mxu2 %v1019_v18 }
 0x1ca   : > { %v887_v20 = vld [vmem:[%s3453_s2 + $0x1128] sm:$0xff]  ;;  %1957 = vmatpush.msra.mxu3 %v1087_v19 }
 0x1cb   : > { %v951_v21 = vld [vmem:[%s3453_s2 + $0x1328] sm:$0xff]  ;;  %1899 = vmatpush.msra.mxu0 %v887_v20 }
 0x1cc   : > { %v1015_v22 = vld [vmem:[%s3453_s2 + $0x1528] sm:$0xff]  ;;  %1919 = vmatpush.msra.mxu1 %v951_v21 }
 0x1cd   : > { %v1083_v23 = vld [vmem:[%s3453_s2 + $0x1748] sm:$0xff]  ;;  %1939 = vmatpush.msra.mxu2 %v1015_v22 }
 0x1ce   : > { %v883_v24 = vld [vmem:[%s3453_s2 + $0x1108] sm:$0xff]  ;;  %1958 = vmatpush.msra.mxu3 %v1083_v23 }
 0x1cf   : > { %v947_v25 = vld [vmem:[%s3453_s2 + $0x1308] sm:$0xff]  ;;  %1900 = vmatpush.msra.mxu0 %v883_v24 }
 0x1d0   : > { %v1011_v26 = vld [vmem:[%s3453_s2 + $0x1508] sm:$0xff]  ;;  %1920 = vmatpush.msra.mxu1 %v947_v25 }
 0x1d1   : > { %v1079_v27 = vld [vmem:[%s3453_s2 + $0x1728] sm:$0xff]  ;;  %1940 = vmatpush.msra.mxu2 %v1011_v26 }
 0x1d2   : > { %v879_v28 = vld [vmem:[%s3453_s2 + $0x10e8] sm:$0xff]  ;;  %1959 = vmatpush.msra.mxu3 %v1079_v27 }
 0x1d3   : > { %v943_v29 = vld [vmem:[%s3453_s2 + $0x12e8] sm:$0xff]  ;;  %1901 = vmatpush.msra.mxu0 %v879_v28 }
 0x1d4   : > { %v1007_v30 = vld [vmem:[%s3453_s2 + $0x14e8] sm:$0xff]  ;;  %1921 = vmatpush.msra.mxu1 %v943_v29 }
 0x1d5   : > { %v1075_v31 = vld [vmem:[%s3453_s2 + $0x1708] sm:$0xff]  ;;  %1941 = vmatpush.msra.mxu2 %v1007_v30 }
 0x1d6   : > { %v875_v32 = vld [vmem:[%s3453_s2 + $0x10c8] sm:$0xff]  ;;  %1960 = vmatpush.msra.mxu3 %v1075_v31 }
 0x1d7   : > { %v939_v33 = vld [vmem:[%s3453_s2 + $0x12c8] sm:$0xff]  ;;  %1902 = vmatpush.msra.mxu0 %v875_v32 }
 0x1d8   : > { %v1003_v34 = vld [vmem:[%s3453_s2 + $0x14c8] sm:$0xff]  ;;  %1922 = vmatpush.msra.mxu1 %v939_v33 }
 0x1d9   : > { %v1071_v35 = vld [vmem:[%s3453_s2 + $0x16e8] sm:$0xff]  ;;  %1942 = vmatpush.msra.mxu2 %v1003_v34 }
 0x1da   : > { %v871_v36 = vld [vmem:[%s3453_s2 + $0x10a8] sm:$0xff]  ;;  %1961 = vmatpush.msra.mxu3 %v1071_v35 }
 0x1db   : > { %v935_v37 = vld [vmem:[%s3453_s2 + $0x12a8] sm:$0xff]  ;;  %1903 = vmatpush.msra.mxu0 %v871_v36 }
 0x1dc   : > { %v999_v38 = vld [vmem:[%s3453_s2 + $0x14a8] sm:$0xff]  ;;  %1923 = vmatpush.msra.mxu1 %v935_v37 }
 0x1dd   : > { %v1067_v39 = vld [vmem:[%s3453_s2 + $0x16c8] sm:$0xff]  ;;  %1943 = vmatpush.msra.mxu2 %v999_v38 }
 0x1de   : > { %v867_v40 = vld [vmem:[%s3453_s2 + $0x1088] sm:$0xff]  ;;  %1962 = vmatpush.msra.mxu3 %v1067_v39 }
 0x1df   : > { %v931_v41 = vld [vmem:[%s3453_s2 + $0x1288] sm:$0xff]  ;;  %1904 = vmatpush.msra.mxu0 %v867_v40 }
 0x1e0   : > { %v995_v42 = vld [vmem:[%s3453_s2 + $0x1488] sm:$0xff]  ;;  %1924 = vmatpush.msra.mxu1 %v931_v41 }
 0x1e1   : > { %v1063_v43 = vld [vmem:[%s3453_s2 + $0x16a8] sm:$0xff]  ;;  %1944 = vmatpush.msra.mxu2 %v995_v42 }
 0x1e2   : > { %v863_v44 = vld [vmem:[%s3453_s2 + $0x1068] sm:$0xff]  ;;  %1963 = vmatpush.msra.mxu3 %v1063_v43 }
 0x1e3   : > { %v927_v45 = vld [vmem:[%s3453_s2 + $0x1268] sm:$0xff]  ;;  %1905 = vmatpush.msra.mxu0 %v863_v44 }
 0x1e4   : > { %v991_v46 = vld [vmem:[%s3453_s2 + $0x1468] sm:$0xff]  ;;  %1925 = vmatpush.msra.mxu1 %v927_v45 }
 0x1e5   : > { %v1059_v47 = vld [vmem:[%s3453_s2 + $0x1688] sm:$0xff]  ;;  %1945 = vmatpush.msra.mxu2 %v991_v46 }
 0x1e6   : > { %v859_v52 = vld [vmem:[%s3453_s2 + $0x1048] sm:$0xff]  ;;  %1964 = vmatpush.msra.mxu3 %v1059_v47 }
 0x1e7   : > { %v923_v53 = vld [vmem:[%s3453_s2 + $0x1248] sm:$0xff]  ;;  %1906 = vmatpush.msra.mxu0 %v859_v52 }
 0x1e8   : > { %v987_v54 = vld [vmem:[%s3453_s2 + $0x1448] sm:$0xff]  ;;  %1926 = vmatpush.msra.mxu1 %v923_v53 }
 0x1e9   : > { %v1055_v55 = vld [vmem:[%s3453_s2 + $0x1668] sm:$0xff]  ;;  %1946 = vmatpush.msra.mxu2 %v987_v54 }
 0x1ea   : > { %v855_v56 = vld [vmem:[%s3453_s2 + $0x1028] sm:$0xff]  ;;  %1965 = vmatpush.msra.mxu3 %v1055_v55 }
 0x1eb   : > { %v919_v57 = vld [vmem:[%s3453_s2 + $0x1228] sm:$0xff]  ;;  %1907 = vmatpush.msra.mxu0 %v855_v56 }
 0x1ec   : > { %v983_v58 = vld [vmem:[%s3453_s2 + $0x1428] sm:$0xff]  ;;  %1927 = vmatpush.msra.mxu1 %v919_v57 }
 0x1ed   : > { %v1051_v59 = vld [vmem:[%s3453_s2 + $0x1648] sm:$0xff]  ;;  %1947 = vmatpush.msra.mxu2 %v983_v58 }
 0x1ee   : > { %v851_v60 = vld [vmem:[%s3453_s2 + $0x1008] sm:$0xff]  ;;  %1966 = vmatpush.msra.mxu3 %v1051_v59 }
 0x1ef   : > { %v915_v61 = vld [vmem:[%s3453_s2 + $0x1208] sm:$0xff]  ;;  %1908 = vmatpush.msra.mxu0 %v851_v60 }
 0x1f0   : > { %v979_v62 = vld [vmem:[%s3453_s2 + $0x1408] sm:$0xff]  ;;  %1928 = vmatpush.msra.mxu1 %v915_v61  ;;  %1909 = vmatmul.f32.vlgmr.msra.gmra.mxu0 %v3065_v8 }
 0x1f1   : > { %v1047_v63 = vld [vmem:[%s3453_s2 + $0x1628] sm:$0xff]  ;;  %1948 = vmatpush.msra.mxu2 %v979_v62  ;;  %1929 = vmatmul.f32.vlgmr.msra.gmra.mxu1 %v3067_v14 }
 0x1f2   : > { %v1167_v4 = vld [vmem:[%s3453_s2 + $0x19e8] sm:$0xff]  ;;  %1967 = vmatpush.msra.mxu3 %v1047_v63 }
 0x1f3   : > { %v1231_v5 = vld [vmem:[%s3453_s2 + $0x1be8] sm:$0xff]  ;;  %1973 = vmatpush.msrb.mxu0 %v1167_v4 }
 0x1f4   : > { %v1295_v6 = vld [vmem:[%s3453_s2 + $0x1de8] sm:$0xff]  ;;  %1993 = vmatpush.msrb.mxu1 %v1231_v5 }
 0x1f5   : > { %v1043_v7 = vld [vmem:[%s3453_s2 + $0x1608] sm:$0xff]  ;;  %2013 = vmatpush.msrb.mxu2 %v1295_v6 }
 0x1f6   : > { %v3066_v9 = vld.sshfl [vmem:[#allocation1 + $0x10] sm:$0xff pattern:$0x73625140]  ;;  %1968 = vmatpush.msra.mxu3 %v1043_v7  ;;  %v3068_v15 = vld.sshfl [vmem:[#allocation1 + $0x18] sm:$0xff pattern:$0x73625140] }
 0x1f7   : > { %1949 = vmatmul.f32.vlgmr.msra.gmra.mxu2 %v3066_v9  ;;  %v1163_v10 = vld [vmem:[%s3453_s2 + $0x19c8] sm:$0xff]  ;;  %1969 = vmatmul.f32.vlgmr.msra.gmra.mxu3 %v3068_v15 }
 0x1f8   : > { %v1227_v11 = vld [vmem:[%s3453_s2 + $0x1bc8] sm:$0xff]  ;;  %1974 = vmatpush.msrb.mxu0 %v1163_v10 }
 0x1f9   : > { %v1291_v12 = vld [vmem:[%s3453_s2 + $0x1dc8] sm:$0xff]  ;;  %1994 = vmatpush.msrb.mxu1 %v1227_v11 }
 0x1fa   : > { %v1359_v13 = vld [vmem:[%s3453_s2 + $0x1fe8] sm:$0xff]  ;;  %2014 = vmatpush.msrb.mxu2 %v1291_v12 }
 0x1fb   : > { %v1159_v16 = vld [vmem:[%s3453_s2 + $0x19a8] sm:$0xff]  ;;  %2033 = vmatpush.msrb.mxu3 %v1359_v13 }
 0x1fc   : > { %v1223_v17 = vld [vmem:[%s3453_s2 + $0x1ba8] sm:$0xff]  ;;  %1975 = vmatpush.msrb.mxu0 %v1159_v16  ;;  %v400_v16 = vld [vmem:[%s3453_s2 + $0x1f0] sm:$0xff] }
 0x1fd   : > { %v1287_v18 = vld [vmem:[%s3453_s2 + $0x1da8] sm:$0xff]  ;;  %1995 = vmatpush.msrb.mxu1 %v1223_v17  ;;  %v464_v17 = vld [vmem:[%s3453_s2 + $0x3f0] sm:$0xff] }
 0x1fe   : > { %v1355_v19 = vld [vmem:[%s3453_s2 + $0x1fc8] sm:$0xff]  ;;  %2015 = vmatpush.msrb.mxu2 %v1287_v18  ;;  %v528_v18 = vld [vmem:[%s3453_s2 + $0x5f0] sm:$0xff] }
 0x1ff   : > { %v1155_v20 = vld [vmem:[%s3453_s2 + $0x1988] sm:$0xff]  ;;  %2034 = vmatpush.msrb.mxu3 %v1355_v19 }
 0x200   : > { %v1219_v21 = vld [vmem:[%s3453_s2 + $0x1b88] sm:$0xff]  ;;  %1976 = vmatpush.msrb.mxu0 %v1155_v20  ;;  %v3069_v20 = vld.sshfl [vmem:[#allocation1 + $0x20] sm:$0xff pattern:$0x73625140] }
 0x201   : > { %v1283_v22 = vld [vmem:[%s3453_s2 + $0x1d88] sm:$0xff]  ;;  %1996 = vmatpush.msrb.mxu1 %v1219_v21 }
 0x202   : > { %v1351_v23 = vld [vmem:[%s3453_s2 + $0x1fa8] sm:$0xff]  ;;  %2016 = vmatpush.msrb.mxu2 %v1283_v22  ;;  %v396_v22 = vld [vmem:[%s3453_s2 + $0x1d0] sm:$0xff] }
 0x203   : > { %v1151_v24 = vld [vmem:[%s3453_s2 + $0x1968] sm:$0xff]  ;;  %2035 = vmatpush.msrb.mxu3 %v1351_v23  ;;  %v460_v23 = vld [vmem:[%s3453_s2 + $0x3d0] sm:$0xff] }
 0x204   : > { %v1215_v25 = vld [vmem:[%s3453_s2 + $0x1b68] sm:$0xff]  ;;  %1977 = vmatpush.msrb.mxu0 %v1151_v24  ;;  %v524_v24 = vld [vmem:[%s3453_s2 + $0x5d0] sm:$0xff] }
 0x205   : > { %v1279_v26 = vld [vmem:[%s3453_s2 + $0x1d68] sm:$0xff]  ;;  %1997 = vmatpush.msrb.mxu1 %v1215_v25  ;;  %v592_v25 = vld [vmem:[%s3453_s2 + $0x7f0] sm:$0xff] }
 0x206   : > { %v1347_v27 = vld [vmem:[%s3453_s2 + $0x1f88] sm:$0xff]  ;;  %2017 = vmatpush.msrb.mxu2 %v1279_v26  ;;  %v3071_v26 = vld.sshfl [vmem:[#allocation1 + $0x28] sm:$0xff pattern:$0x73625140] }
 0x207   : > { %v1147_v28 = vld [vmem:[%s3453_s2 + $0x1948] sm:$0xff]  ;;  %2036 = vmatpush.msrb.mxu3 %v1347_v27 }
 0x208   : > { %v1211_v29 = vld [vmem:[%s3453_s2 + $0x1b48] sm:$0xff]  ;;  %1978 = vmatpush.msrb.mxu0 %v1147_v28  ;;  %v392_v28 = vld [vmem:[%s3453_s2 + $0x1b0] sm:$0xff] }
 0x209   : > { %v1275_v30 = vld [vmem:[%s3453_s2 + $0x1d48] sm:$0xff]  ;;  %1998 = vmatpush.msrb.mxu1 %v1211_v29  ;;  %v456_v29 = vld [vmem:[%s3453_s2 + $0x3b0] sm:$0xff] }
 0x20a   : > { %v1343_v31 = vld [vmem:[%s3453_s2 + $0x1f68] sm:$0xff]  ;;  %2018 = vmatpush.msrb.mxu2 %v1275_v30  ;;  %v520_v30 = vld [vmem:[%s3453_s2 + $0x5b0] sm:$0xff] }
 0x20b   : > { %v1143_v32 = vld [vmem:[%s3453_s2 + $0x1928] sm:$0xff]  ;;  %2037 = vmatpush.msrb.mxu3 %v1343_v31  ;;  %v588_v31 = vld [vmem:[%s3453_s2 + $0x7d0] sm:$0xff] }
 0x20c   : > { %v1207_v33 = vld [vmem:[%s3453_s2 + $0x1b28] sm:$0xff]  ;;  %1979 = vmatpush.msrb.mxu0 %v1143_v32  ;;  %v388_v32 = vld [vmem:[%s3453_s2 + $0x190] sm:$0xff] }
 0x20d   : > { %v1271_v34 = vld [vmem:[%s3453_s2 + $0x1d28] sm:$0xff]  ;;  %1999 = vmatpush.msrb.mxu1 %v1207_v33  ;;  %v452_v33 = vld [vmem:[%s3453_s2 + $0x390] sm:$0xff] }
 0x20e   : > { %v1339_v35 = vld [vmem:[%s3453_s2 + $0x1f48] sm:$0xff]  ;;  %2019 = vmatpush.msrb.mxu2 %v1271_v34  ;;  %v516_v34 = vld [vmem:[%s3453_s2 + $0x590] sm:$0xff] }
 0x20f   : > { %v1139_v36 = vld [vmem:[%s3453_s2 + $0x1908] sm:$0xff]  ;;  %2038 = vmatpush.msrb.mxu3 %v1339_v35  ;;  %v584_v35 = vld [vmem:[%s3453_s2 + $0x7b0] sm:$0xff] }
 0x210   : > { %v1203_v37 = vld [vmem:[%s3453_s2 + $0x1b08] sm:$0xff]  ;;  %1980 = vmatpush.msrb.mxu0 %v1139_v36  ;;  %v384_v36 = vld [vmem:[%s3453_s2 + $0x170] sm:$0xff] }
 0x211   : > { %v1267_v38 = vld [vmem:[%s3453_s2 + $0x1d08] sm:$0xff]  ;;  %2000 = vmatpush.msrb.mxu1 %v1203_v37  ;;  %v448_v37 = vld [vmem:[%s3453_s2 + $0x370] sm:$0xff] }
 0x212   : > { %v1335_v39 = vld [vmem:[%s3453_s2 + $0x1f28] sm:$0xff]  ;;  %2020 = vmatpush.msrb.mxu2 %v1267_v38  ;;  %v512_v38 = vld [vmem:[%s3453_s2 + $0x570] sm:$0xff] }
 0x213   : > { %v1135_v40 = vld [vmem:[%s3453_s2 + $0x18e8] sm:$0xff]  ;;  %2039 = vmatpush.msrb.mxu3 %v1335_v39  ;;  %v580_v39 = vld [vmem:[%s3453_s2 + $0x790] sm:$0xff] }
 0x214   : > { %v1199_v41 = vld [vmem:[%s3453_s2 + $0x1ae8] sm:$0xff]  ;;  %1981 = vmatpush.msrb.mxu0 %v1135_v40  ;;  %v380_v40 = vld [vmem:[%s3453_s2 + $0x150] sm:$0xff] }
 0x215   : > { %v1263_v42 = vld [vmem:[%s3453_s2 + $0x1ce8] sm:$0xff]  ;;  %2001 = vmatpush.msrb.mxu1 %v1199_v41  ;;  %v444_v41 = vld [vmem:[%s3453_s2 + $0x350] sm:$0xff] }
 0x216   : > { %v1331_v43 = vld [vmem:[%s3453_s2 + $0x1f08] sm:$0xff]  ;;  %2021 = vmatpush.msrb.mxu2 %v1263_v42  ;;  %v508_v42 = vld [vmem:[%s3453_s2 + $0x550] sm:$0xff] }
 0x217   : > { %v1131_v44 = vld [vmem:[%s3453_s2 + $0x18c8] sm:$0xff]  ;;  %2040 = vmatpush.msrb.mxu3 %v1331_v43  ;;  %v576_v43 = vld [vmem:[%s3453_s2 + $0x770] sm:$0xff] }
 0x218   : > { %v1195_v45 = vld [vmem:[%s3453_s2 + $0x1ac8] sm:$0xff]  ;;  %1982 = vmatpush.msrb.mxu0 %v1131_v44  ;;  %v376_v44 = vld [vmem:[%s3453_s2 + $0x130] sm:$0xff] }
 0x219   : > { %v1259_v46 = vld [vmem:[%s3453_s2 + $0x1cc8] sm:$0xff]  ;;  %2002 = vmatpush.msrb.mxu1 %v1195_v45  ;;  %v440_v45 = vld [vmem:[%s3453_s2 + $0x330] sm:$0xff] }
 0x21a   : > { %v1327_v47 = vld [vmem:[%s3453_s2 + $0x1ee8] sm:$0xff]  ;;  %2022 = vmatpush.msrb.mxu2 %v1259_v46  ;;  %v504_v46 = vld [vmem:[%s3453_s2 + $0x530] sm:$0xff] }
 0x21b   : > { %v1127_v52 = vld [vmem:[%s3453_s2 + $0x18a8] sm:$0xff]  ;;  %2041 = vmatpush.msrb.mxu3 %v1327_v47  ;;  %v572_v47 = vld [vmem:[%s3453_s2 + $0x750] sm:$0xff] }
 0x21c   : > { %v1191_v53 = vld [vmem:[%s3453_s2 + $0x1aa8] sm:$0xff]  ;;  %1983 = vmatpush.msrb.mxu0 %v1127_v52  ;;  %v372_v52 = vld [vmem:[%s3453_s2 + $0x110] sm:$0xff] }
 0x21d   : > { %v1255_v54 = vld [vmem:[%s3453_s2 + $0x1ca8] sm:$0xff]  ;;  %2003 = vmatpush.msrb.mxu1 %v1191_v53  ;;  %v436_v53 = vld [vmem:[%s3453_s2 + $0x310] sm:$0xff] }
 0x21e   : > { %v1323_v55 = vld [vmem:[%s3453_s2 + $0x1ec8] sm:$0xff]  ;;  %2023 = vmatpush.msrb.mxu2 %v1255_v54  ;;  %v500_v54 = vld [vmem:[%s3453_s2 + $0x510] sm:$0xff] }
 0x21f   : > { %v1123_v56 = vld [vmem:[%s3453_s2 + $0x1888] sm:$0xff]  ;;  %2042 = vmatpush.msrb.mxu3 %v1323_v55  ;;  %v568_v55 = vld [vmem:[%s3453_s2 + $0x730] sm:$0xff] }
 0x220   : > { %v1187_v57 = vld [vmem:[%s3453_s2 + $0x1a88] sm:$0xff]  ;;  %1984 = vmatpush.msrb.mxu0 %v1123_v56  ;;  %v368_v56 = vld [vmem:[%s3453_s2 + $0xf0] sm:$0xff] }
 0x221   : > { %v1251_v58 = vld [vmem:[%s3453_s2 + $0x1c88] sm:$0xff]  ;;  %2004 = vmatpush.msrb.mxu1 %v1187_v57  ;;  %v432_v57 = vld [vmem:[%s3453_s2 + $0x2f0] sm:$0xff] }
 0x222   : > { %v1319_v59 = vld [vmem:[%s3453_s2 + $0x1ea8] sm:$0xff]  ;;  %2024 = vmatpush.msrb.mxu2 %v1251_v58  ;;  %v496_v58 = vld [vmem:[%s3453_s2 + $0x4f0] sm:$0xff] }
 0x223   : > { %v1119_v60 = vld [vmem:[%s3453_s2 + $0x1868] sm:$0xff]  ;;  %2043 = vmatpush.msrb.mxu3 %v1319_v59  ;;  %v564_v59 = vld [vmem:[%s3453_s2 + $0x710] sm:$0xff] }
 0x224   : > { %v1183_v61 = vld [vmem:[%s3453_s2 + $0x1a68] sm:$0xff]  ;;  %1985 = vmatpush.msrb.mxu0 %v1119_v60  ;;  %v364_v60 = vld [vmem:[%s3453_s2 + $0xd0] sm:$0xff] }
 0x225   : > { %v1247_v62 = vld [vmem:[%s3453_s2 + $0x1c68] sm:$0xff]  ;;  %2005 = vmatpush.msrb.mxu1 %v1183_v61  ;;  %v428_v61 = vld [vmem:[%s3453_s2 + $0x2d0] sm:$0xff] }
 0x226   : > { %v1315_v63 = vld [vmem:[%s3453_s2 + $0x1e88] sm:$0xff]  ;;  %2025 = vmatpush.msrb.mxu2 %v1247_v62  ;;  %v492_v62 = vld [vmem:[%s3453_s2 + $0x4d0] sm:$0xff] }
 0x227   : > { %v1115_v4 = vld [vmem:[%s3453_s2 + $0x1848] sm:$0xff]  ;;  %2044 = vmatpush.msrb.mxu3 %v1315_v63  ;;  %v560_v63 = vld [vmem:[%s3453_s2 + $0x6f0] sm:$0xff] }
 0x228   : > { %v1179_v5 = vld [vmem:[%s3453_s2 + $0x1a48] sm:$0xff]  ;;  %1986 = vmatpush.msrb.mxu0 %v1115_v4  ;;  %v360_v4 = vld [vmem:[%s3453_s2 + $0xb0] sm:$0xff] }
 0x229   : > { %v1243_v6 = vld [vmem:[%s3453_s2 + $0x1c48] sm:$0xff]  ;;  %2006 = vmatpush.msrb.mxu1 %v1179_v5  ;;  %v424_v5 = vld [vmem:[%s3453_s2 + $0x2b0] sm:$0xff] }
 0x22a   : > { %v1311_v7 = vld [vmem:[%s3453_s2 + $0x1e68] sm:$0xff]  ;;  %2026 = vmatpush.msrb.mxu2 %v1243_v6  ;;  %v488_v6 = vld [vmem:[%s3453_s2 + $0x4b0] sm:$0xff] }
 0x22b   : > { %v1111_v8 = vld [vmem:[%s3453_s2 + $0x1828] sm:$0xff]  ;;  %2045 = vmatpush.msrb.mxu3 %v1311_v7  ;;  %v556_v7 = vld [vmem:[%s3453_s2 + $0x6d0] sm:$0xff] }
 0x22c   : > { %v1175_v9 = vld [vmem:[%s3453_s2 + $0x1a28] sm:$0xff]  ;;  %1987 = vmatpush.msrb.mxu0 %v1111_v8  ;;  %v356_v8 = vld [vmem:[%s3453_s2 + $0x90] sm:$0xff] }
 0x22d   : > { %v1239_v10 = vld [vmem:[%s3453_s2 + $0x1c28] sm:$0xff]  ;;  %2007 = vmatpush.msrb.mxu1 %v1175_v9  ;;  %v420_v9 = vld [vmem:[%s3453_s2 + $0x290] sm:$0xff] }
 0x22e   : > { %v1307_v11 = vld [vmem:[%s3453_s2 + $0x1e48] sm:$0xff]  ;;  %2027 = vmatpush.msrb.mxu2 %v1239_v10  ;;  %v484_v10 = vld [vmem:[%s3453_s2 + $0x490] sm:$0xff] }
 0x22f   : > { %v1107_v12 = vld [vmem:[%s3453_s2 + $0x1808] sm:$0xff]  ;;  %2046 = vmatpush.msrb.mxu3 %v1307_v11  ;;  %v552_v11 = vld [vmem:[%s3453_s2 + $0x6b0] sm:$0xff] }
 0x230   : > { %v1171_v13 = vld [vmem:[%s3453_s2 + $0x1a08] sm:$0xff]  ;;  %1988 = vmatpush.msrb.mxu0 %v1107_v12  ;;  %v352_v12 = vld [vmem:[%s3453_s2 + $0x70] sm:$0xff] }
 0x231   : > { %v1235_v14 = vld [vmem:[%s3453_s2 + $0x1c08] sm:$0xff]  ;;  %2008 = vmatpush.msrb.mxu1 %v1171_v13  ;;  %1989 = vmatmul.f32.vlgmr.msrb.gmra.mxu0 %v3069_v20  ;;  %v416_v13 = vld [vmem:[%s3453_s2 + $0x270] sm:$0xff] }
 0x232   : > { %v1303_v15 = vld [vmem:[%s3453_s2 + $0x1e28] sm:$0xff]  ;;  %2028 = vmatpush.msrb.mxu2 %v1235_v14  ;;  %2053 = vmatpush.msra.mxu0 %v400_v16  ;;  %v480_v14 = vld [vmem:[%s3453_s2 + $0x470] sm:$0xff] }
 0x233   : > { %2047 = vmatpush.msrb.mxu3 %v1303_v15  ;;  %v1299_v19 = vld [vmem:[%s3453_s2 + $0x1e08] sm:$0xff]  ;;  %2073 = vmatpush.msra.mxu1 %v464_v17  ;;  %v548_v15 = vld [vmem:[%s3453_s2 + $0x690] sm:$0xff] }
 0x234   : > { %v3070_v21 = vld.sshfl [vmem:[#allocation1 + $0x30] sm:$0xff pattern:$0x73625140]  ;;  %2093 = vmatpush.msra.mxu2 %v528_v18  ;;  %2009 = vmatmul.f32.vlgmr.msrb.gmra.mxu1 %v3071_v26  ;;  %v3072_v27 = vld.sshfl [vmem:[#allocation1 + $0x38] sm:$0xff pattern:$0x73625140] }
 0x235   : > { %2029 = vmatmul.f32.vlgmr.msrb.gmra.mxu2 %v3070_v21  ;;  %2048 = vmatpush.msrb.mxu3 %v1299_v19  ;;  %v348_v16 = vld [vmem:[%s3453_s2 + $0x50] sm:$0xff] }
 0x236   : > { %2049 = vmatmul.f32.vlgmr.msrb.gmra.mxu3 %v3072_v27  ;;  %2054 = vmatpush.msra.mxu0 %v396_v22  ;;  %v412_v17 = vld [vmem:[%s3453_s2 + $0x250] sm:$0xff] }
 0x237   : > { %2074 = vmatpush.msra.mxu1 %v460_v23  ;;  %2094 = vmatpush.msra.mxu2 %v524_v24  ;;  %v476_v18 = vld [vmem:[%s3453_s2 + $0x450] sm:$0xff] }
 0x238   : > { %2113 = vmatpush.msra.mxu3 %v592_v25  ;;  %2055 = vmatpush.msra.mxu0 %v392_v28  ;;  %v544_v19 = vld [vmem:[%s3453_s2 + $0x670] sm:$0xff] }
 0x239   : > { %2075 = vmatpush.msra.mxu1 %v456_v29  ;;  %2095 = vmatpush.msra.mxu2 %v520_v30  ;;  %v344_v20 = vld [vmem:[%s3453_s2 + $0x30] sm:$0xff] }
 0x23a   : > { %2114 = vmatpush.msra.mxu3 %v588_v31  ;;  %2056 = vmatpush.msra.mxu0 %v388_v32  ;;  %v408_v21 = vld [vmem:[%s3453_s2 + $0x230] sm:$0xff] }
 0x23b   : > { %2076 = vmatpush.msra.mxu1 %v452_v33  ;;  %2096 = vmatpush.msra.mxu2 %v516_v34  ;;  %v472_v22 = vld [vmem:[%s3453_s2 + $0x430] sm:$0xff] }
 0x23c   : > { %2115 = vmatpush.msra.mxu3 %v584_v35  ;;  %2057 = vmatpush.msra.mxu0 %v384_v36  ;;  %v540_v23 = vld [vmem:[%s3453_s2 + $0x650] sm:$0xff] }
 0x23d   : > { %2077 = vmatpush.msra.mxu1 %v448_v37  ;;  %2097 = vmatpush.msra.mxu2 %v512_v38  ;;  %v340_v24 = vld [vmem:[%s3453_s2 + $0x10] sm:$0xff] }
 0x23e   : > { %2116 = vmatpush.msra.mxu3 %v580_v39  ;;  %2058 = vmatpush.msra.mxu0 %v380_v40  ;;  %v404_v25 = vld [vmem:[%s3453_s2 + $0x210] sm:$0xff] }
 0x23f   : > { %2078 = vmatpush.msra.mxu1 %v444_v41  ;;  %2098 = vmatpush.msra.mxu2 %v508_v42  ;;  %v468_v26 = vld [vmem:[%s3453_s2 + $0x410] sm:$0xff] }
 0x240   : > { %2117 = vmatpush.msra.mxu3 %v576_v43  ;;  %2059 = vmatpush.msra.mxu0 %v376_v44  ;;  %v536_v27 = vld [vmem:[%s3453_s2 + $0x630] sm:$0xff] }
 0x241   : > { %2079 = vmatpush.msra.mxu1 %v440_v45  ;;  %2099 = vmatpush.msra.mxu2 %v504_v46  ;;  %v656_v28 = vld [vmem:[%s3453_s2 + $0x9f0] sm:$0xff] }
 0x242   : > { %2118 = vmatpush.msra.mxu3 %v572_v47  ;;  %2060 = vmatpush.msra.mxu0 %v372_v52  ;;  %v720_v29 = vld [vmem:[%s3453_s2 + $0xbf0] sm:$0xff] }
 0x243   : > { %2080 = vmatpush.msra.mxu1 %v436_v53  ;;  %2100 = vmatpush.msra.mxu2 %v500_v54  ;;  %v784_v30 = vld [vmem:[%s3453_s2 + $0xdf0] sm:$0xff] }
 0x244   : > { %2119 = vmatpush.msra.mxu3 %v568_v55  ;;  %2061 = vmatpush.msra.mxu0 %v368_v56  ;;  %v532_v31 = vld [vmem:[%s3453_s2 + $0x610] sm:$0xff] }
 0x245   : > { %2081 = vmatpush.msra.mxu1 %v432_v57  ;;  %2101 = vmatpush.msra.mxu2 %v496_v58  ;;  %v652_v32 = vld [vmem:[%s3453_s2 + $0x9d0] sm:$0xff] }
 0x246   : > { %2120 = vmatpush.msra.mxu3 %v564_v59  ;;  %2062 = vmatpush.msra.mxu0 %v364_v60  ;;  %v716_v33 = vld [vmem:[%s3453_s2 + $0xbd0] sm:$0xff] }
 0x247   : > { %2082 = vmatpush.msra.mxu1 %v428_v61  ;;  %2102 = vmatpush.msra.mxu2 %v492_v62  ;;  %v780_v34 = vld [vmem:[%s3453_s2 + $0xdd0] sm:$0xff] }
 0x248   : > { %2121 = vmatpush.msra.mxu3 %v560_v63  ;;  %2063 = vmatpush.msra.mxu0 %v360_v4  ;;  %v848_v35 = vld [vmem:[%s3453_s2 + $0xff0] sm:$0xff] }
 0x249   : > { %2083 = vmatpush.msra.mxu1 %v424_v5  ;;  %2103 = vmatpush.msra.mxu2 %v488_v6  ;;  %v648_v36 = vld [vmem:[%s3453_s2 + $0x9b0] sm:$0xff] }
 0x24a   : > { %2122 = vmatpush.msra.mxu3 %v556_v7  ;;  %2064 = vmatpush.msra.mxu0 %v356_v8  ;;  %v712_v37 = vld [vmem:[%s3453_s2 + $0xbb0] sm:$0xff] }
 0x24b   : > { %2084 = vmatpush.msra.mxu1 %v420_v9  ;;  %2104 = vmatpush.msra.mxu2 %v484_v10  ;;  %v776_v38 = vld [vmem:[%s3453_s2 + $0xdb0] sm:$0xff] }
 0x24c   : > { %2123 = vmatpush.msra.mxu3 %v552_v11  ;;  %2065 = vmatpush.msra.mxu0 %v352_v12  ;;  %v844_v39 = vld [vmem:[%s3453_s2 + $0xfd0] sm:$0xff] }
 0x24d   : > { %2085 = vmatpush.msra.mxu1 %v416_v13  ;;  %2105 = vmatpush.msra.mxu2 %v480_v14  ;;  %v644_v40 = vld [vmem:[%s3453_s2 + $0x990] sm:$0xff] }
 0x24e   : > { %2124 = vmatpush.msra.mxu3 %v548_v15  ;;  %2066 = vmatpush.msra.mxu0 %v348_v16  ;;  %v708_v41 = vld [vmem:[%s3453_s2 + $0xb90] sm:$0xff] }
 0x24f   : > { %2086 = vmatpush.msra.mxu1 %v412_v17  ;;  %2106 = vmatpush.msra.mxu2 %v476_v18  ;;  %v772_v42 = vld [vmem:[%s3453_s2 + $0xd90] sm:$0xff] }
 0x250   : > { %2125 = vmatpush.msra.mxu3 %v544_v19  ;;  %2067 = vmatpush.msra.mxu0 %v344_v20  ;;  %v840_v43 = vld [vmem:[%s3453_s2 + $0xfb0] sm:$0xff] }
 0x251   : > { %2087 = vmatpush.msra.mxu1 %v408_v21  ;;  %2107 = vmatpush.msra.mxu2 %v472_v22  ;;  %v640_v44 = vld [vmem:[%s3453_s2 + $0x970] sm:$0xff] }
 0x252   : > { %2126 = vmatpush.msra.mxu3 %v540_v23  ;;  %2068 = vmatpush.msra.mxu0 %v340_v24  ;;  %v704_v45 = vld [vmem:[%s3453_s2 + $0xb70] sm:$0xff] }
 0x253   : > { %2088 = vmatpush.msra.mxu1 %v404_v25  ;;  %2108 = vmatpush.msra.mxu2 %v468_v26  ;;  %v768_v46 = vld [vmem:[%s3453_s2 + $0xd70] sm:$0xff] }
 0x254   : > { %2127 = vmatpush.msra.mxu3 %v536_v27  ;;  %2133 = vmatpush.msrb.mxu0 %v656_v28  ;;  %v836_v47 = vld [vmem:[%s3453_s2 + $0xf90] sm:$0xff] }
 0x255   : > { %2153 = vmatpush.msrb.mxu1 %v720_v29  ;;  %2173 = vmatpush.msrb.mxu2 %v784_v30  ;;  %v636_v52 = vld [vmem:[%s3453_s2 + $0x950] sm:$0xff] }
 0x256   : > { %2128 = vmatpush.msra.mxu3 %v532_v31  ;;  %2134 = vmatpush.msrb.mxu0 %v652_v32  ;;  %v700_v53 = vld [vmem:[%s3453_s2 + $0xb50] sm:$0xff] }
 0x257   : > { %2154 = vmatpush.msrb.mxu1 %v716_v33  ;;  %2174 = vmatpush.msrb.mxu2 %v780_v34  ;;  %v764_v54 = vld [vmem:[%s3453_s2 + $0xd50] sm:$0xff] }
 0x258   : > { %2193 = vmatpush.msrb.mxu3 %v848_v35  ;;  %2135 = vmatpush.msrb.mxu0 %v648_v36  ;;  %v832_v55 = vld [vmem:[%s3453_s2 + $0xf70] sm:$0xff] }
 0x259   : > { %2155 = vmatpush.msrb.mxu1 %v712_v37  ;;  %2175 = vmatpush.msrb.mxu2 %v776_v38  ;;  %v632_v56 = vld [vmem:[%s3453_s2 + $0x930] sm:$0xff] }
 0x25a   : > { %2194 = vmatpush.msrb.mxu3 %v844_v39  ;;  %2136 = vmatpush.msrb.mxu0 %v644_v40  ;;  %v696_v57 = vld [vmem:[%s3453_s2 + $0xb30] sm:$0xff] }
 0x25b   : > { %2156 = vmatpush.msrb.mxu1 %v708_v41  ;;  %2176 = vmatpush.msrb.mxu2 %v772_v42  ;;  %v760_v58 = vld [vmem:[%s3453_s2 + $0xd30] sm:$0xff] }
 0x25c   : > { %2195 = vmatpush.msrb.mxu3 %v840_v43  ;;  %2137 = vmatpush.msrb.mxu0 %v640_v44  ;;  %v828_v59 = vld [vmem:[%s3453_s2 + $0xf50] sm:$0xff] }
 0x25d   : > { %2157 = vmatpush.msrb.mxu1 %v704_v45  ;;  %2177 = vmatpush.msrb.mxu2 %v768_v46  ;;  %v628_v60 = vld [vmem:[%s3453_s2 + $0x910] sm:$0xff] }
 0x25e   : > { %2196 = vmatpush.msrb.mxu3 %v836_v47  ;;  %2138 = vmatpush.msrb.mxu0 %v636_v52  ;;  %v692_v61 = vld [vmem:[%s3453_s2 + $0xb10] sm:$0xff] }
 0x25f   : > { %2158 = vmatpush.msrb.mxu1 %v700_v53  ;;  %2178 = vmatpush.msrb.mxu2 %v764_v54  ;;  %v756_v62 = vld [vmem:[%s3453_s2 + $0xd10] sm:$0xff] }
 0x260   : > { %2197 = vmatpush.msrb.mxu3 %v832_v55  ;;  %2139 = vmatpush.msrb.mxu0 %v632_v56  ;;  %v824_v63 = vld [vmem:[%s3453_s2 + $0xf30] sm:$0xff] }
 0x261   : > { %2159 = vmatpush.msrb.mxu1 %v696_v57  ;;  %2179 = vmatpush.msrb.mxu2 %v760_v58  ;;  %v624_v4 = vld [vmem:[%s3453_s2 + $0x8f0] sm:$0xff] }
 0x262   : > { %2198 = vmatpush.msrb.mxu3 %v828_v59  ;;  %v688_v5 = vld [vmem:[%s3453_s2 + $0xaf0] sm:$0xff]  ;;  %2140 = vmatpush.msrb.mxu0 %v628_v60 }
 0x263   : > { %2160 = vmatpush.msrb.mxu1 %v692_v61  ;;  %v752_v6 = vld [vmem:[%s3453_s2 + $0xcf0] sm:$0xff]  ;;  %2180 = vmatpush.msrb.mxu2 %v756_v62 }
 0x264   : > { %v820_v7 = vld [vmem:[%s3453_s2 + $0xf10] sm:$0xff]  ;;  %2199 = vmatpush.msrb.mxu3 %v824_v63  ;;  %2141 = vmatpush.msrb.mxu0 %v624_v4 }
 0x265   : > { %v620_v8 = vld [vmem:[%s3453_s2 + $0x8d0] sm:$0xff]  ;;  %2161 = vmatpush.msrb.mxu1 %v688_v5  ;;  %2181 = vmatpush.msrb.mxu2 %v752_v6 }
 0x266   : > { %v684_v9 = vld [vmem:[%s3453_s2 + $0xad0] sm:$0xff]  ;;  %2200 = vmatpush.msrb.mxu3 %v820_v7  ;;  %2142 = vmatpush.msrb.mxu0 %v620_v8 }
 0x267   : > { %v748_v10 = vld [vmem:[%s3453_s2 + $0xcd0] sm:$0xff]  ;;  %2162 = vmatpush.msrb.mxu1 %v684_v9  ;;  %2069 = vmatmul.f32.vlgmr.msra.gmra.mxu0 %v3591_v48 }
 0x268   : > { %v816_v11 = vld [vmem:[%s3453_s2 + $0xef0] sm:$0xff]  ;;  %2182 = vmatpush.msrb.mxu2 %v748_v10  ;;  %2089 = vmatmul.f32.vlgmr.msra.gmra.mxu1 %v3593_v49 }
 0x269   : > { %v616_v12 = vld [vmem:[%s3453_s2 + $0x8b0] sm:$0xff]  ;;  %2201 = vmatpush.msrb.mxu3 %v816_v11  ;;  %2109 = vmatmul.f32.vlgmr.msra.gmra.mxu2 %v3595_v50 }
 0x26a   : > { %v680_v13 = vld [vmem:[%s3453_s2 + $0xab0] sm:$0xff]  ;;  %2143 = vmatpush.msrb.mxu0 %v616_v12  ;;  %2129 = vmatmul.f32.vlgmr.msra.gmra.mxu3 %v3597_v51 }
 0x26b   : > { %v744_v14 = vld [vmem:[%s3453_s2 + $0xcb0] sm:$0xff]  ;;  %2163 = vmatpush.msrb.mxu1 %v680_v13 }
 0x26c   : > { %v812_v15 = vld [vmem:[%s3453_s2 + $0xed0] sm:$0xff]  ;;  %2183 = vmatpush.msrb.mxu2 %v744_v14 }
 0x26d   : > { %v612_v16 = vld [vmem:[%s3453_s2 + $0x890] sm:$0xff]  ;;  %2202 = vmatpush.msrb.mxu3 %v812_v15 }
 0x26e   : > { %v676_v17 = vld [vmem:[%s3453_s2 + $0xa90] sm:$0xff]  ;;  %2144 = vmatpush.msrb.mxu0 %v612_v16 }
 0x26f   : > { %v740_v18 = vld [vmem:[%s3453_s2 + $0xc90] sm:$0xff]  ;;  %2164 = vmatpush.msrb.mxu1 %v676_v17 }
 0x270   : > { %v808_v19 = vld [vmem:[%s3453_s2 + $0xeb0] sm:$0xff]  ;;  %2184 = vmatpush.msrb.mxu2 %v740_v18 }
 0x271   : > { %v608_v20 = vld [vmem:[%s3453_s2 + $0x870] sm:$0xff]  ;;  %2203 = vmatpush.msrb.mxu3 %v808_v19 }
 0x272   : > { %v672_v21 = vld [vmem:[%s3453_s2 + $0xa70] sm:$0xff]  ;;  %2145 = vmatpush.msrb.mxu0 %v608_v20 }
 0x273   : > { %v736_v22 = vld [vmem:[%s3453_s2 + $0xc70] sm:$0xff]  ;;  %2165 = vmatpush.msrb.mxu1 %v672_v21 }
 0x274   : > { %v804_v23 = vld [vmem:[%s3453_s2 + $0xe90] sm:$0xff]  ;;  %2185 = vmatpush.msrb.mxu2 %v736_v22 }
 0x275   : > { %v604_v24 = vld [vmem:[%s3453_s2 + $0x850] sm:$0xff]  ;;  %2204 = vmatpush.msrb.mxu3 %v804_v23 }
 0x276   : > { %v668_v25 = vld [vmem:[%s3453_s2 + $0xa50] sm:$0xff]  ;;  %2146 = vmatpush.msrb.mxu0 %v604_v24 }
 0x277   : > { %v732_v26 = vld [vmem:[%s3453_s2 + $0xc50] sm:$0xff]  ;;  %2166 = vmatpush.msrb.mxu1 %v668_v25 }
 0x278   : > { %v800_v27 = vld [vmem:[%s3453_s2 + $0xe70] sm:$0xff]  ;;  %2186 = vmatpush.msrb.mxu2 %v732_v26 }
 0x279   : > { %v600_v28 = vld [vmem:[%s3453_s2 + $0x830] sm:$0xff]  ;;  %2205 = vmatpush.msrb.mxu3 %v800_v27 }
 0x27a   : > { %v664_v29 = vld [vmem:[%s3453_s2 + $0xa30] sm:$0xff]  ;;  %2147 = vmatpush.msrb.mxu0 %v600_v28 }
 0x27b   : > { %v728_v30 = vld [vmem:[%s3453_s2 + $0xc30] sm:$0xff]  ;;  %2167 = vmatpush.msrb.mxu1 %v664_v29 }
 0x27c   : > { %v796_v31 = vld [vmem:[%s3453_s2 + $0xe50] sm:$0xff]  ;;  %2187 = vmatpush.msrb.mxu2 %v728_v30 }
 0x27d   : > { %v596_v32 = vld [vmem:[%s3453_s2 + $0x810] sm:$0xff]  ;;  %2206 = vmatpush.msrb.mxu3 %v796_v31 }
 0x27e   : > { %v660_v33 = vld [vmem:[%s3453_s2 + $0xa10] sm:$0xff]  ;;  %2148 = vmatpush.msrb.mxu0 %v596_v32 }
 0x27f   : > { %v724_v34 = vld [vmem:[%s3453_s2 + $0xc10] sm:$0xff]  ;;  %2168 = vmatpush.msrb.mxu1 %v660_v33  ;;  %2149 = vmatmul.f32.vlgmr.msrb.gmra.mxu0 %v3615_v1 }
 0x280   : > { %v792_v35 = vld [vmem:[%s3453_s2 + $0xe30] sm:$0xff]  ;;  %2188 = vmatpush.msrb.mxu2 %v724_v34  ;;  %2169 = vmatmul.f32.vlgmr.msrb.gmra.mxu1 %v3619_v3 }
 0x281   : > { %v912_v36 = vld [vmem:[%s3453_s2 + $0x11f0] sm:$0xff]  ;;  %2207 = vmatpush.msrb.mxu3 %v792_v35  ;;  %2189 = vmatmul.f32.vlgmr.msrb.gmra.mxu2 %v3613_v0 }
 0x282   : > { %v976_v37 = vld [vmem:[%s3453_s2 + $0x13f0] sm:$0xff]  ;;  %2213 = vmatpush.msra.mxu0 %v912_v36 }
 0x283   : > { %v1040_v38 = vld [vmem:[%s3453_s2 + $0x15f0] sm:$0xff]  ;;  %2233 = vmatpush.msra.mxu1 %v976_v37 }
 0x284   : > { %v788_v39 = vld [vmem:[%s3453_s2 + $0xe10] sm:$0xff]  ;;  %2253 = vmatpush.msra.mxu2 %v1040_v38 }
 0x285   : > { %v908_v40 = vld [vmem:[%s3453_s2 + $0x11d0] sm:$0xff]  ;;  %2208 = vmatpush.msrb.mxu3 %v788_v39 }
 0x286   : > { %v972_v41 = vld [vmem:[%s3453_s2 + $0x13d0] sm:$0xff]  ;;  %2214 = vmatpush.msra.mxu0 %v908_v40  ;;  %2209 = vmatmul.f32.vlgmr.msrb.gmra.mxu3 %v3617_v2 }
 0x287   : > { %v1036_v42 = vld [vmem:[%s3453_s2 + $0x15d0] sm:$0xff]  ;;  %2234 = vmatpush.msra.mxu1 %v972_v41 }
 0x288   : > { %v1104_v43 = vld [vmem:[%s3453_s2 + $0x17f0] sm:$0xff]  ;;  %2254 = vmatpush.msra.mxu2 %v1036_v42 }
 0x289   : > { %v904_v44 = vld [vmem:[%s3453_s2 + $0x11b0] sm:$0xff]  ;;  %2273 = vmatpush.msra.mxu3 %v1104_v43 }
 0x28a   : > { %v968_v45 = vld [vmem:[%s3453_s2 + $0x13b0] sm:$0xff]  ;;  %2215 = vmatpush.msra.mxu0 %v904_v44 }
 0x28b   : > { %v1032_v46 = vld [vmem:[%s3453_s2 + $0x15b0] sm:$0xff]  ;;  %2235 = vmatpush.msra.mxu1 %v968_v45 }
 0x28c   : > { %v1100_v47 = vld [vmem:[%s3453_s2 + $0x17d0] sm:$0xff]  ;;  %2255 = vmatpush.msra.mxu2 %v1032_v46 }
 0x28d   : > { %v900_v52 = vld [vmem:[%s3453_s2 + $0x1190] sm:$0xff]  ;;  %2274 = vmatpush.msra.mxu3 %v1100_v47 }
 0x28e   : > { %v964_v53 = vld [vmem:[%s3453_s2 + $0x1390] sm:$0xff]  ;;  %2216 = vmatpush.msra.mxu0 %v900_v52 }
 0x28f   : > { %v1028_v54 = vld [vmem:[%s3453_s2 + $0x1590] sm:$0xff]  ;;  %2236 = vmatpush.msra.mxu1 %v964_v53  ;;  %v3074_v53 = vld.sshfl [vmem:[#allocation1 + $0x10] sm:$0xff pattern:$0x73625140] }
 0x290   : > { %v1096_v55 = vld [vmem:[%s3453_s2 + $0x17b0] sm:$0xff]  ;;  %2256 = vmatpush.msra.mxu2 %v1028_v54 }
 0x291   : > { %v896_v56 = vld [vmem:[%s3453_s2 + $0x1170] sm:$0xff]  ;;  %2275 = vmatpush.msra.mxu3 %v1096_v55 }
 0x292   : > { %v960_v57 = vld [vmem:[%s3453_s2 + $0x1370] sm:$0xff]  ;;  %2217 = vmatpush.msra.mxu0 %v896_v56 }
 0x293   : > { %v1024_v58 = vld [vmem:[%s3453_s2 + $0x1570] sm:$0xff]  ;;  %2237 = vmatpush.msra.mxu1 %v960_v57 }
 0x294   : > { %v1092_v59 = vld [vmem:[%s3453_s2 + $0x1790] sm:$0xff]  ;;  %2257 = vmatpush.msra.mxu2 %v1024_v58  ;;  %v3075_v58 = vld.sshfl [vmem:[#allocation1 + $0x8] sm:$0xff pattern:$0x73625140] }
 0x295   : > { %v892_v60 = vld [vmem:[%s3453_s2 + $0x1150] sm:$0xff]  ;;  %2276 = vmatpush.msra.mxu3 %v1092_v59 }
 0x296   : > { %v956_v61 = vld [vmem:[%s3453_s2 + $0x1350] sm:$0xff]  ;;  %2218 = vmatpush.msra.mxu0 %v892_v60 }
 0x297   : > { %v1020_v62 = vld [vmem:[%s3453_s2 + $0x1550] sm:$0xff]  ;;  %2238 = vmatpush.msra.mxu1 %v956_v61 }
 0x298   : > { %v1088_v63 = vld [vmem:[%s3453_s2 + $0x1770] sm:$0xff]  ;;  %2258 = vmatpush.msra.mxu2 %v1020_v62 }
 0x299   : > { %v888_v4 = vld [vmem:[%s3453_s2 + $0x1130] sm:$0xff]  ;;  %2277 = vmatpush.msra.mxu3 %v1088_v63 }
 0x29a   : > { %v952_v5 = vld [vmem:[%s3453_s2 + $0x1330] sm:$0xff]  ;;  %2219 = vmatpush.msra.mxu0 %v888_v4 }
 0x29b   : > { %v1016_v6 = vld [vmem:[%s3453_s2 + $0x1530] sm:$0xff]  ;;  %2239 = vmatpush.msra.mxu1 %v952_v5 }
 0x29c   : > { %v1084_v7 = vld [vmem:[%s3453_s2 + $0x1750] sm:$0xff]  ;;  %2259 = vmatpush.msra.mxu2 %v1016_v6 }
 0x29d   : > { %v884_v8 = vld [vmem:[%s3453_s2 + $0x1110] sm:$0xff]  ;;  %2278 = vmatpush.msra.mxu3 %v1084_v7 }
 0x29e   : > { %v948_v9 = vld [vmem:[%s3453_s2 + $0x1310] sm:$0xff]  ;;  %2220 = vmatpush.msra.mxu0 %v884_v8 }
 0x29f   : > { %v1012_v10 = vld [vmem:[%s3453_s2 + $0x1510] sm:$0xff]  ;;  %2240 = vmatpush.msra.mxu1 %v948_v9 }
 0x2a0   : > { %v1080_v11 = vld [vmem:[%s3453_s2 + $0x1730] sm:$0xff]  ;;  %2260 = vmatpush.msra.mxu2 %v1012_v10 }
 0x2a1   : > { %v880_v12 = vld [vmem:[%s3453_s2 + $0x10f0] sm:$0xff]  ;;  %2279 = vmatpush.msra.mxu3 %v1080_v11 }
 0x2a2   : > { %v944_v13 = vld [vmem:[%s3453_s2 + $0x12f0] sm:$0xff]  ;;  %2221 = vmatpush.msra.mxu0 %v880_v12 }
 0x2a3   : > { %v1008_v14 = vld [vmem:[%s3453_s2 + $0x14f0] sm:$0xff]  ;;  %2241 = vmatpush.msra.mxu1 %v944_v13 }
 0x2a4   : > { %v1076_v15 = vld [vmem:[%s3453_s2 + $0x1710] sm:$0xff]  ;;  %2261 = vmatpush.msra.mxu2 %v1008_v14 }
 0x2a5   : > { %v876_v16 = vld [vmem:[%s3453_s2 + $0x10d0] sm:$0xff]  ;;  %2280 = vmatpush.msra.mxu3 %v1076_v15 }
 0x2a6   : > { %v940_v17 = vld [vmem:[%s3453_s2 + $0x12d0] sm:$0xff]  ;;  %2222 = vmatpush.msra.mxu0 %v876_v16 }
 0x2a7   : > { %v1004_v18 = vld [vmem:[%s3453_s2 + $0x14d0] sm:$0xff]  ;;  %2242 = vmatpush.msra.mxu1 %v940_v17 }
 0x2a8   : > { %v1072_v19 = vld [vmem:[%s3453_s2 + $0x16f0] sm:$0xff]  ;;  %2262 = vmatpush.msra.mxu2 %v1004_v18 }
 0x2a9   : > { %v872_v20 = vld [vmem:[%s3453_s2 + $0x10b0] sm:$0xff]  ;;  %2281 = vmatpush.msra.mxu3 %v1072_v19 }
 0x2aa   : > { %v936_v21 = vld [vmem:[%s3453_s2 + $0x12b0] sm:$0xff]  ;;  %2223 = vmatpush.msra.mxu0 %v872_v20 }
 0x2ab   : > { %v1000_v22 = vld [vmem:[%s3453_s2 + $0x14b0] sm:$0xff]  ;;  %2243 = vmatpush.msra.mxu1 %v936_v21 }
 0x2ac   : > { %v1068_v23 = vld [vmem:[%s3453_s2 + $0x16d0] sm:$0xff]  ;;  %2263 = vmatpush.msra.mxu2 %v1000_v22 }
 0x2ad   : > { %v868_v24 = vld [vmem:[%s3453_s2 + $0x1090] sm:$0xff]  ;;  %2282 = vmatpush.msra.mxu3 %v1068_v23 }
 0x2ae   : > { %v932_v25 = vld [vmem:[%s3453_s2 + $0x1290] sm:$0xff]  ;;  %2224 = vmatpush.msra.mxu0 %v868_v24 }
 0x2af   : > { %v996_v26 = vld [vmem:[%s3453_s2 + $0x1490] sm:$0xff]  ;;  %2244 = vmatpush.msra.mxu1 %v932_v25 }
 0x2b0   : > { %v1064_v27 = vld [vmem:[%s3453_s2 + $0x16b0] sm:$0xff]  ;;  %2264 = vmatpush.msra.mxu2 %v996_v26 }
 0x2b1   : > { %v864_v28 = vld [vmem:[%s3453_s2 + $0x1070] sm:$0xff]  ;;  %2283 = vmatpush.msra.mxu3 %v1064_v27 }
 0x2b2   : > { %v928_v29 = vld [vmem:[%s3453_s2 + $0x1270] sm:$0xff]  ;;  %2225 = vmatpush.msra.mxu0 %v864_v28 }
 0x2b3   : > { %v992_v30 = vld [vmem:[%s3453_s2 + $0x1470] sm:$0xff]  ;;  %2245 = vmatpush.msra.mxu1 %v928_v29 }
 0x2b4   : > { %v1060_v31 = vld [vmem:[%s3453_s2 + $0x1690] sm:$0xff]  ;;  %2265 = vmatpush.msra.mxu2 %v992_v30 }
 0x2b5   : > { %v860_v32 = vld [vmem:[%s3453_s2 + $0x1050] sm:$0xff]  ;;  %2284 = vmatpush.msra.mxu3 %v1060_v31 }
 0x2b6   : > { %v924_v33 = vld [vmem:[%s3453_s2 + $0x1250] sm:$0xff]  ;;  %2226 = vmatpush.msra.mxu0 %v860_v32 }
 0x2b7   : > { %v988_v34 = vld [vmem:[%s3453_s2 + $0x1450] sm:$0xff]  ;;  %2246 = vmatpush.msra.mxu1 %v924_v33 }
 0x2b8   : > { %v1056_v35 = vld [vmem:[%s3453_s2 + $0x1670] sm:$0xff]  ;;  %2266 = vmatpush.msra.mxu2 %v988_v34 }
 0x2b9   : > { %v856_v36 = vld [vmem:[%s3453_s2 + $0x1030] sm:$0xff]  ;;  %2285 = vmatpush.msra.mxu3 %v1056_v35 }
 0x2ba   : > { %v920_v37 = vld [vmem:[%s3453_s2 + $0x1230] sm:$0xff]  ;;  %2227 = vmatpush.msra.mxu0 %v856_v36 }
 0x2bb   : > { %v984_v38 = vld [vmem:[%s3453_s2 + $0x1430] sm:$0xff]  ;;  %2247 = vmatpush.msra.mxu1 %v920_v37 }
 0x2bc   : > { %v1052_v39 = vld [vmem:[%s3453_s2 + $0x1650] sm:$0xff]  ;;  %2267 = vmatpush.msra.mxu2 %v984_v38 }
 0x2bd   : > { %v852_v40 = vld [vmem:[%s3453_s2 + $0x1010] sm:$0xff]  ;;  %2286 = vmatpush.msra.mxu3 %v1052_v39 }
 0x2be   : > { %v916_v41 = vld [vmem:[%s3453_s2 + $0x1210] sm:$0xff]  ;;  %2228 = vmatpush.msra.mxu0 %v852_v40 }
 0x2bf   : > { %v980_v42 = vld [vmem:[%s3453_s2 + $0x1410] sm:$0xff]  ;;  %2248 = vmatpush.msra.mxu1 %v916_v41 }
 0x2c0   : > { %v1048_v43 = vld [vmem:[%s3453_s2 + $0x1630] sm:$0xff]  ;;  %2268 = vmatpush.msra.mxu2 %v980_v42  ;;  %2249 = vmatmul.f32.vlgmr.msra.gmra.mxu1 %v3075_v58 }
 0x2c1   : > { %v1168_v44 = vld [vmem:[%s3453_s2 + $0x19f0] sm:$0xff]  ;;  %2287 = vmatpush.msra.mxu3 %v1048_v43  ;;  %2269 = vmatmul.f32.vlgmr.msra.gmra.mxu2 %v3074_v53 }
 0x2c2   : > { %v1232_v45 = vld [vmem:[%s3453_s2 + $0x1bf0] sm:$0xff]  ;;  %2293 = vmatpush.msrb.mxu0 %v1168_v44 }
 0x2c3   : > { %v1296_v46 = vld [vmem:[%s3453_s2 + $0x1df0] sm:$0xff]  ;;  %2313 = vmatpush.msrb.mxu1 %v1232_v45 }
 0x2c4   : > { %v1044_v47 = vld [vmem:[%s3453_s2 + $0x1610] sm:$0xff]  ;;  %2333 = vmatpush.msrb.mxu2 %v1296_v46 }
 0x2c5   : > { %v3073_v52 = vld.sshfl [vmem:[#allocation1] sm:$0xff pattern:$0x73625140]  ;;  %2288 = vmatpush.msra.mxu3 %v1044_v47  ;;  %v3076_v59 = vld.sshfl [vmem:[#allocation1 + $0x18] sm:$0xff pattern:$0x73625140] }
 0x2c6   : > { %2229 = vmatmul.f32.vlgmr.msra.gmra.mxu0 %v3073_v52  ;;  %v1164_v54 = vld [vmem:[%s3453_s2 + $0x19d0] sm:$0xff]  ;;  %2289 = vmatmul.f32.vlgmr.msra.gmra.mxu3 %v3076_v59 }
 0x2c7   : > { %v1228_v55 = vld [vmem:[%s3453_s2 + $0x1bd0] sm:$0xff]  ;;  %2294 = vmatpush.msrb.mxu0 %v1164_v54 }
 0x2c8   : > { %v1292_v56 = vld [vmem:[%s3453_s2 + $0x1dd0] sm:$0xff]  ;;  %2314 = vmatpush.msrb.mxu1 %v1228_v55 }
 0x2c9   : > { %v1360_v57 = vld [vmem:[%s3453_s2 + $0x1ff0] sm:$0xff]  ;;  %2334 = vmatpush.msrb.mxu2 %v1292_v56 }
 0x2ca   : > { %v1160_v60 = vld [vmem:[%s3453_s2 + $0x19b0] sm:$0xff]  ;;  %2353 = vmatpush.msrb.mxu3 %v1360_v57 }
 0x2cb   : > { %v1224_v61 = vld [vmem:[%s3453_s2 + $0x1bb0] sm:$0xff]  ;;  %2295 = vmatpush.msrb.mxu0 %v1160_v60  ;;  %v401_v60 = vld [vmem:[%s3453_s2 + $0x1f8] sm:$0xff] }
 0x2cc   : > { %v1288_v62 = vld [vmem:[%s3453_s2 + $0x1db0] sm:$0xff]  ;;  %2315 = vmatpush.msrb.mxu1 %v1224_v61  ;;  %v465_v61 = vld [vmem:[%s3453_s2 + $0x3f8] sm:$0xff] }
 0x2cd   : > { %v1356_v63 = vld [vmem:[%s3453_s2 + $0x1fd0] sm:$0xff]  ;;  %2335 = vmatpush.msrb.mxu2 %v1288_v62  ;;  %v529_v62 = vld [vmem:[%s3453_s2 + $0x5f8] sm:$0xff] }
 0x2ce   : > { %v1156_v4 = vld [vmem:[%s3453_s2 + $0x1990] sm:$0xff]  ;;  %2354 = vmatpush.msrb.mxu3 %v1356_v63 }
 0x2cf   : > { %v1220_v5 = vld [vmem:[%s3453_s2 + $0x1b90] sm:$0xff]  ;;  %2296 = vmatpush.msrb.mxu0 %v1156_v4 }
 0x2d0   : > { %v1284_v6 = vld [vmem:[%s3453_s2 + $0x1d90] sm:$0xff]  ;;  %2316 = vmatpush.msrb.mxu1 %v1220_v5  ;;  %v3078_v5 = vld.sshfl [vmem:[#allocation1 + $0x30] sm:$0xff pattern:$0x73625140] }
 0x2d1   : > { %v1352_v7 = vld [vmem:[%s3453_s2 + $0x1fb0] sm:$0xff]  ;;  %2336 = vmatpush.msrb.mxu2 %v1284_v6  ;;  %v397_v6 = vld [vmem:[%s3453_s2 + $0x1d8] sm:$0xff] }
 0x2d2   : > { %v1152_v8 = vld [vmem:[%s3453_s2 + $0x1970] sm:$0xff]  ;;  %2355 = vmatpush.msrb.mxu3 %v1352_v7  ;;  %v461_v7 = vld [vmem:[%s3453_s2 + $0x3d8] sm:$0xff] }
 0x2d3   : > { %v1216_v9 = vld [vmem:[%s3453_s2 + $0x1b70] sm:$0xff]  ;;  %2297 = vmatpush.msrb.mxu0 %v1152_v8  ;;  %v525_v8 = vld [vmem:[%s3453_s2 + $0x5d8] sm:$0xff] }
 0x2d4   : > { %v1280_v10 = vld [vmem:[%s3453_s2 + $0x1d70] sm:$0xff]  ;;  %2317 = vmatpush.msrb.mxu1 %v1216_v9  ;;  %v593_v9 = vld [vmem:[%s3453_s2 + $0x7f8] sm:$0xff] }
 0x2d5   : > { %v1348_v11 = vld [vmem:[%s3453_s2 + $0x1f90] sm:$0xff]  ;;  %2337 = vmatpush.msrb.mxu2 %v1280_v10  ;;  %v3079_v10 = vld.sshfl [vmem:[#allocation1 + $0x28] sm:$0xff pattern:$0x73625140] }
 0x2d6   : > { %v1148_v12 = vld [vmem:[%s3453_s2 + $0x1950] sm:$0xff]  ;;  %2356 = vmatpush.msrb.mxu3 %v1348_v11 }
 0x2d7   : > { %v1212_v13 = vld [vmem:[%s3453_s2 + $0x1b50] sm:$0xff]  ;;  %2298 = vmatpush.msrb.mxu0 %v1148_v12  ;;  %v393_v12 = vld [vmem:[%s3453_s2 + $0x1b8] sm:$0xff] }
 0x2d8   : > { %v1276_v14 = vld [vmem:[%s3453_s2 + $0x1d50] sm:$0xff]  ;;  %2318 = vmatpush.msrb.mxu1 %v1212_v13  ;;  %v457_v13 = vld [vmem:[%s3453_s2 + $0x3b8] sm:$0xff] }
 0x2d9   : > { %v1344_v15 = vld [vmem:[%s3453_s2 + $0x1f70] sm:$0xff]  ;;  %2338 = vmatpush.msrb.mxu2 %v1276_v14  ;;  %v521_v14 = vld [vmem:[%s3453_s2 + $0x5b8] sm:$0xff] }
 0x2da   : > { %v1144_v16 = vld [vmem:[%s3453_s2 + $0x1930] sm:$0xff]  ;;  %2357 = vmatpush.msrb.mxu3 %v1344_v15  ;;  %v589_v15 = vld [vmem:[%s3453_s2 + $0x7d8] sm:$0xff] }
 0x2db   : > { %v1208_v17 = vld [vmem:[%s3453_s2 + $0x1b30] sm:$0xff]  ;;  %2299 = vmatpush.msrb.mxu0 %v1144_v16  ;;  %v389_v16 = vld [vmem:[%s3453_s2 + $0x198] sm:$0xff] }
 0x2dc   : > { %v1272_v18 = vld [vmem:[%s3453_s2 + $0x1d30] sm:$0xff]  ;;  %2319 = vmatpush.msrb.mxu1 %v1208_v17  ;;  %v453_v17 = vld [vmem:[%s3453_s2 + $0x398] sm:$0xff] }
 0x2dd   : > { %v1340_v19 = vld [vmem:[%s3453_s2 + $0x1f50] sm:$0xff]  ;;  %2339 = vmatpush.msrb.mxu2 %v1272_v18  ;;  %v517_v18 = vld [vmem:[%s3453_s2 + $0x598] sm:$0xff] }
 0x2de   : > { %v1140_v20 = vld [vmem:[%s3453_s2 + $0x1910] sm:$0xff]  ;;  %2358 = vmatpush.msrb.mxu3 %v1340_v19  ;;  %v585_v19 = vld [vmem:[%s3453_s2 + $0x7b8] sm:$0xff] }
 0x2df   : > { %v1204_v21 = vld [vmem:[%s3453_s2 + $0x1b10] sm:$0xff]  ;;  %2300 = vmatpush.msrb.mxu0 %v1140_v20  ;;  %v385_v20 = vld [vmem:[%s3453_s2 + $0x178] sm:$0xff] }
 0x2e0   : > { %v1268_v22 = vld [vmem:[%s3453_s2 + $0x1d10] sm:$0xff]  ;;  %2320 = vmatpush.msrb.mxu1 %v1204_v21  ;;  %v449_v21 = vld [vmem:[%s3453_s2 + $0x378] sm:$0xff] }
 0x2e1   : > { %v1336_v23 = vld [vmem:[%s3453_s2 + $0x1f30] sm:$0xff]  ;;  %2340 = vmatpush.msrb.mxu2 %v1268_v22  ;;  %v513_v22 = vld [vmem:[%s3453_s2 + $0x578] sm:$0xff] }
 0x2e2   : > { %v1136_v24 = vld [vmem:[%s3453_s2 + $0x18f0] sm:$0xff]  ;;  %2359 = vmatpush.msrb.mxu3 %v1336_v23  ;;  %v581_v23 = vld [vmem:[%s3453_s2 + $0x798] sm:$0xff] }
 0x2e3   : > { %v1200_v25 = vld [vmem:[%s3453_s2 + $0x1af0] sm:$0xff]  ;;  %2301 = vmatpush.msrb.mxu0 %v1136_v24  ;;  %v381_v24 = vld [vmem:[%s3453_s2 + $0x158] sm:$0xff] }
 0x2e4   : > { %v1264_v26 = vld [vmem:[%s3453_s2 + $0x1cf0] sm:$0xff]  ;;  %2321 = vmatpush.msrb.mxu1 %v1200_v25  ;;  %v445_v25 = vld [vmem:[%s3453_s2 + $0x358] sm:$0xff] }
 0x2e5   : > { %v1332_v27 = vld [vmem:[%s3453_s2 + $0x1f10] sm:$0xff]  ;;  %2341 = vmatpush.msrb.mxu2 %v1264_v26  ;;  %v509_v26 = vld [vmem:[%s3453_s2 + $0x558] sm:$0xff] }
 0x2e6   : > { %v1132_v28 = vld [vmem:[%s3453_s2 + $0x18d0] sm:$0xff]  ;;  %2360 = vmatpush.msrb.mxu3 %v1332_v27  ;;  %v577_v27 = vld [vmem:[%s3453_s2 + $0x778] sm:$0xff] }
 0x2e7   : > { %v1196_v29 = vld [vmem:[%s3453_s2 + $0x1ad0] sm:$0xff]  ;;  %2302 = vmatpush.msrb.mxu0 %v1132_v28  ;;  %v377_v28 = vld [vmem:[%s3453_s2 + $0x138] sm:$0xff] }
 0x2e8   : > { %v1260_v30 = vld [vmem:[%s3453_s2 + $0x1cd0] sm:$0xff]  ;;  %2322 = vmatpush.msrb.mxu1 %v1196_v29  ;;  %v441_v29 = vld [vmem:[%s3453_s2 + $0x338] sm:$0xff] }
 0x2e9   : > { %v1328_v31 = vld [vmem:[%s3453_s2 + $0x1ef0] sm:$0xff]  ;;  %2342 = vmatpush.msrb.mxu2 %v1260_v30  ;;  %v505_v30 = vld [vmem:[%s3453_s2 + $0x538] sm:$0xff] }
 0x2ea   : > { %v1128_v32 = vld [vmem:[%s3453_s2 + $0x18b0] sm:$0xff]  ;;  %2361 = vmatpush.msrb.mxu3 %v1328_v31  ;;  %v573_v31 = vld [vmem:[%s3453_s2 + $0x758] sm:$0xff] }
 0x2eb   : > { %v1192_v33 = vld [vmem:[%s3453_s2 + $0x1ab0] sm:$0xff]  ;;  %2303 = vmatpush.msrb.mxu0 %v1128_v32  ;;  %v373_v32 = vld [vmem:[%s3453_s2 + $0x118] sm:$0xff] }
 0x2ec   : > { %v1256_v34 = vld [vmem:[%s3453_s2 + $0x1cb0] sm:$0xff]  ;;  %2323 = vmatpush.msrb.mxu1 %v1192_v33  ;;  %v437_v33 = vld [vmem:[%s3453_s2 + $0x318] sm:$0xff] }
 0x2ed   : > { %v1324_v35 = vld [vmem:[%s3453_s2 + $0x1ed0] sm:$0xff]  ;;  %2343 = vmatpush.msrb.mxu2 %v1256_v34  ;;  %v501_v34 = vld [vmem:[%s3453_s2 + $0x518] sm:$0xff] }
 0x2ee   : > { %v1124_v36 = vld [vmem:[%s3453_s2 + $0x1890] sm:$0xff]  ;;  %2362 = vmatpush.msrb.mxu3 %v1324_v35  ;;  %v569_v35 = vld [vmem:[%s3453_s2 + $0x738] sm:$0xff] }
 0x2ef   : > { %v1188_v37 = vld [vmem:[%s3453_s2 + $0x1a90] sm:$0xff]  ;;  %2304 = vmatpush.msrb.mxu0 %v1124_v36  ;;  %v369_v36 = vld [vmem:[%s3453_s2 + $0xf8] sm:$0xff] }
 0x2f0   : > { %v1252_v38 = vld [vmem:[%s3453_s2 + $0x1c90] sm:$0xff]  ;;  %2324 = vmatpush.msrb.mxu1 %v1188_v37  ;;  %v433_v37 = vld [vmem:[%s3453_s2 + $0x2f8] sm:$0xff] }
 0x2f1   : > { %v1320_v39 = vld [vmem:[%s3453_s2 + $0x1eb0] sm:$0xff]  ;;  %2344 = vmatpush.msrb.mxu2 %v1252_v38  ;;  %v497_v38 = vld [vmem:[%s3453_s2 + $0x4f8] sm:$0xff] }
 0x2f2   : > { %v1120_v40 = vld [vmem:[%s3453_s2 + $0x1870] sm:$0xff]  ;;  %2363 = vmatpush.msrb.mxu3 %v1320_v39  ;;  %v565_v39 = vld [vmem:[%s3453_s2 + $0x718] sm:$0xff] }
 0x2f3   : > { %v1184_v41 = vld [vmem:[%s3453_s2 + $0x1a70] sm:$0xff]  ;;  %2305 = vmatpush.msrb.mxu0 %v1120_v40  ;;  %v365_v40 = vld [vmem:[%s3453_s2 + $0xd8] sm:$0xff] }
 0x2f4   : > { %v1248_v42 = vld [vmem:[%s3453_s2 + $0x1c70] sm:$0xff]  ;;  %2325 = vmatpush.msrb.mxu1 %v1184_v41  ;;  %v429_v41 = vld [vmem:[%s3453_s2 + $0x2d8] sm:$0xff] }
 0x2f5   : > { %v1316_v43 = vld [vmem:[%s3453_s2 + $0x1e90] sm:$0xff]  ;;  %2345 = vmatpush.msrb.mxu2 %v1248_v42  ;;  %v493_v42 = vld [vmem:[%s3453_s2 + $0x4d8] sm:$0xff] }
 0x2f6   : > { %v1116_v44 = vld [vmem:[%s3453_s2 + $0x1850] sm:$0xff]  ;;  %2364 = vmatpush.msrb.mxu3 %v1316_v43  ;;  %v561_v43 = vld [vmem:[%s3453_s2 + $0x6f8] sm:$0xff] }
 0x2f7   : > { %v1180_v45 = vld [vmem:[%s3453_s2 + $0x1a50] sm:$0xff]  ;;  %2306 = vmatpush.msrb.mxu0 %v1116_v44  ;;  %v361_v44 = vld [vmem:[%s3453_s2 + $0xb8] sm:$0xff] }
 0x2f8   : > { %v1244_v46 = vld [vmem:[%s3453_s2 + $0x1c50] sm:$0xff]  ;;  %2326 = vmatpush.msrb.mxu1 %v1180_v45  ;;  %v425_v45 = vld [vmem:[%s3453_s2 + $0x2b8] sm:$0xff] }
 0x2f9   : > { %v1312_v47 = vld [vmem:[%s3453_s2 + $0x1e70] sm:$0xff]  ;;  %2346 = vmatpush.msrb.mxu2 %v1244_v46  ;;  %v489_v46 = vld [vmem:[%s3453_s2 + $0x4b8] sm:$0xff] }
 0x2fa   : > { %v1112_v52 = vld [vmem:[%s3453_s2 + $0x1830] sm:$0xff]  ;;  %2365 = vmatpush.msrb.mxu3 %v1312_v47  ;;  %v557_v47 = vld [vmem:[%s3453_s2 + $0x6d8] sm:$0xff] }
 0x2fb   : > { %v1176_v53 = vld [vmem:[%s3453_s2 + $0x1a30] sm:$0xff]  ;;  %2307 = vmatpush.msrb.mxu0 %v1112_v52  ;;  %v357_v52 = vld [vmem:[%s3453_s2 + $0x98] sm:$0xff] }
 0x2fc   : > { %v1240_v54 = vld [vmem:[%s3453_s2 + $0x1c30] sm:$0xff]  ;;  %2327 = vmatpush.msrb.mxu1 %v1176_v53  ;;  %v421_v53 = vld [vmem:[%s3453_s2 + $0x298] sm:$0xff] }
 0x2fd   : > { %v1308_v55 = vld [vmem:[%s3453_s2 + $0x1e50] sm:$0xff]  ;;  %2347 = vmatpush.msrb.mxu2 %v1240_v54  ;;  %v485_v54 = vld [vmem:[%s3453_s2 + $0x498] sm:$0xff] }
 0x2fe   : > { %v1108_v56 = vld [vmem:[%s3453_s2 + $0x1810] sm:$0xff]  ;;  %2366 = vmatpush.msrb.mxu3 %v1308_v55  ;;  %v553_v55 = vld [vmem:[%s3453_s2 + $0x6b8] sm:$0xff] }
 0x2ff   : > { %v1172_v57 = vld [vmem:[%s3453_s2 + $0x1a10] sm:$0xff]  ;;  %2308 = vmatpush.msrb.mxu0 %v1108_v56  ;;  %v353_v56 = vld [vmem:[%s3453_s2 + $0x78] sm:$0xff] }
 0x300   : > { %v1236_v58 = vld [vmem:[%s3453_s2 + $0x1c10] sm:$0xff]  ;;  %2328 = vmatpush.msrb.mxu1 %v1172_v57  ;;  %v417_v57 = vld [vmem:[%s3453_s2 + $0x278] sm:$0xff] }
 0x301   : > { %v1304_v59 = vld [vmem:[%s3453_s2 + $0x1e30] sm:$0xff]  ;;  %2348 = vmatpush.msrb.mxu2 %v1236_v58  ;;  %2373 = vmatpush.msra.mxu0 %v401_v60  ;;  %v481_v58 = vld [vmem:[%s3453_s2 + $0x478] sm:$0xff] }
 0x302   : > { %2367 = vmatpush.msrb.mxu3 %v1304_v59  ;;  %v1300_v63 = vld [vmem:[%s3453_s2 + $0x1e10] sm:$0xff]  ;;  %2349 = vmatmul.f32.vlgmr.msrb.gmra.mxu2 %v3078_v5  ;;  %v549_v59 = vld [vmem:[%s3453_s2 + $0x698] sm:$0xff] }
 0x303   : > { %v3077_v4 = vld.sshfl [vmem:[#allocation1 + $0x20] sm:$0xff pattern:$0x73625140]  ;;  %2393 = vmatpush.msra.mxu1 %v465_v61  ;;  %2413 = vmatpush.msra.mxu2 %v529_v62  ;;  %v3080_v11 = vld.sshfl [vmem:[#allocation1 + $0x38] sm:$0xff pattern:$0x73625140] }
 0x304   : > { %2309 = vmatmul.f32.vlgmr.msrb.gmra.mxu0 %v3077_v4  ;;  %2368 = vmatpush.msrb.mxu3 %v1300_v63  ;;  %v349_v60 = vld [vmem:[%s3453_s2 + $0x58] sm:$0xff] }
 0x305   : > { %2329 = vmatmul.f32.vlgmr.msrb.gmra.mxu1 %v3079_v10  ;;  %2369 = vmatmul.f32.vlgmr.msrb.gmra.mxu3 %v3080_v11  ;;  %v413_v61 = vld [vmem:[%s3453_s2 + $0x258] sm:$0xff] }
 0x306   : > { %2374 = vmatpush.msra.mxu0 %v397_v6  ;;  %2394 = vmatpush.msra.mxu1 %v461_v7  ;;  %v477_v62 = vld [vmem:[%s3453_s2 + $0x458] sm:$0xff] }
 0x307   : > { %2414 = vmatpush.msra.mxu2 %v525_v8  ;;  %2433 = vmatpush.msra.mxu3 %v593_v9  ;;  %v545_v63 = vld [vmem:[%s3453_s2 + $0x678] sm:$0xff] }
 0x308   : > { %2375 = vmatpush.msra.mxu0 %v393_v12  ;;  %2395 = vmatpush.msra.mxu1 %v457_v13  ;;  %v345_v4 = vld [vmem:[%s3453_s2 + $0x38] sm:$0xff] }
 0x309   : > { %2415 = vmatpush.msra.mxu2 %v521_v14  ;;  %2434 = vmatpush.msra.mxu3 %v589_v15  ;;  %v409_v5 = vld [vmem:[%s3453_s2 + $0x238] sm:$0xff] }
 0x30a   : > { %2376 = vmatpush.msra.mxu0 %v389_v16  ;;  %2396 = vmatpush.msra.mxu1 %v453_v17  ;;  %v473_v6 = vld [vmem:[%s3453_s2 + $0x438] sm:$0xff] }
 0x30b   : > { %2416 = vmatpush.msra.mxu2 %v517_v18  ;;  %2435 = vmatpush.msra.mxu3 %v585_v19  ;;  %v541_v7 = vld [vmem:[%s3453_s2 + $0x658] sm:$0xff] }
 0x30c   : > { %2377 = vmatpush.msra.mxu0 %v385_v20  ;;  %2397 = vmatpush.msra.mxu1 %v449_v21  ;;  %v341_v8 = vld [vmem:[%s3453_s2 + $0x18] sm:$0xff] }
 0x30d   : > { %2417 = vmatpush.msra.mxu2 %v513_v22  ;;  %2436 = vmatpush.msra.mxu3 %v581_v23  ;;  %v405_v9 = vld [vmem:[%s3453_s2 + $0x218] sm:$0xff] }
 0x30e   : > { %2378 = vmatpush.msra.mxu0 %v381_v24  ;;  %2398 = vmatpush.msra.mxu1 %v445_v25  ;;  %v469_v10 = vld [vmem:[%s3453_s2 + $0x418] sm:$0xff] }
 0x30f   : > { %2418 = vmatpush.msra.mxu2 %v509_v26  ;;  %2437 = vmatpush.msra.mxu3 %v577_v27  ;;  %v537_v11 = vld [vmem:[%s3453_s2 + $0x638] sm:$0xff] }
 0x310   : > { %2379 = vmatpush.msra.mxu0 %v377_v28  ;;  %2399 = vmatpush.msra.mxu1 %v441_v29  ;;  %v657_v12 = vld [vmem:[%s3453_s2 + $0x9f8] sm:$0xff] }
 0x311   : > { %2419 = vmatpush.msra.mxu2 %v505_v30  ;;  %2438 = vmatpush.msra.mxu3 %v573_v31  ;;  %v721_v13 = vld [vmem:[%s3453_s2 + $0xbf8] sm:$0xff] }
 0x312   : > { %2380 = vmatpush.msra.mxu0 %v373_v32  ;;  %2400 = vmatpush.msra.mxu1 %v437_v33  ;;  %v785_v14 = vld [vmem:[%s3453_s2 + $0xdf8] sm:$0xff]  ;;  %v4377_v32 = vpop.f32.mrf.mxu0 }
 0x313   : > { %2420 = vmatpush.msra.mxu2 %v501_v34  ;;  %2439 = vmatpush.msra.mxu3 %v569_v35  ;;  %v533_v15 = vld [vmem:[%s3453_s2 + $0x618] sm:$0xff] }
 0x314   : > { %2381 = vmatpush.msra.mxu0 %v369_v36  ;;  %2401 = vmatpush.msra.mxu1 %v433_v37  ;;  %v653_v16 = vld [vmem:[%s3453_s2 + $0x9d8] sm:$0xff] }
 0x315   : > { %2421 = vmatpush.msra.mxu2 %v497_v38  ;;  %2440 = vmatpush.msra.mxu3 %v565_v39  ;;  %v717_v17 = vld [vmem:[%s3453_s2 + $0xbd8] sm:$0xff] }
 0x316   : > { %2382 = vmatpush.msra.mxu0 %v365_v40  ;;  %2402 = vmatpush.msra.mxu1 %v429_v41  ;;  %v781_v18 = vld [vmem:[%s3453_s2 + $0xdd8] sm:$0xff]  ;;  %v4387_v41 = vpop.f32.mrf.mxu1 }
 0x317   : > { %2422 = vmatpush.msra.mxu2 %v493_v42  ;;  %2441 = vmatpush.msra.mxu3 %v561_v43  ;;  %v849_v19 = vld [vmem:[%s3453_s2 + $0xff8] sm:$0xff] }
 0x318   : > { %2383 = vmatpush.msra.mxu0 %v361_v44  ;;  %2403 = vmatpush.msra.mxu1 %v425_v45  ;;  %v649_v20 = vld [vmem:[%s3453_s2 + $0x9b8] sm:$0xff] }
 0x319   : > { %2423 = vmatpush.msra.mxu2 %v489_v46  ;;  %2442 = vmatpush.msra.mxu3 %v557_v47  ;;  %v713_v21 = vld [vmem:[%s3453_s2 + $0xbb8] sm:$0xff] }
 0x31a   : > { %2384 = vmatpush.msra.mxu0 %v357_v52  ;;  %2404 = vmatpush.msra.mxu1 %v421_v53  ;;  %v777_v22 = vld [vmem:[%s3453_s2 + $0xdb8] sm:$0xff] }
 0x31b   : > { %2424 = vmatpush.msra.mxu2 %v485_v54  ;;  %2443 = vmatpush.msra.mxu3 %v553_v55  ;;  %v845_v23 = vld [vmem:[%s3453_s2 + $0xfd8] sm:$0xff]  ;;  %v4397_v54 = vpop.f32.mrf.mxu2 }
 0x31c   : > { %2385 = vmatpush.msra.mxu0 %v353_v56  ;;  %2405 = vmatpush.msra.mxu1 %v417_v57  ;;  %v645_v24 = vld [vmem:[%s3453_s2 + $0x998] sm:$0xff] }
 0x31d   : > { %2425 = vmatpush.msra.mxu2 %v481_v58  ;;  %2444 = vmatpush.msra.mxu3 %v549_v59  ;;  %v709_v25 = vld [vmem:[%s3453_s2 + $0xb98] sm:$0xff]  ;;  %v4403_v59 = vpop.f32.mrf.mxu0 }
 0x31e   : > { %2386 = vmatpush.msra.mxu0 %v349_v60  ;;  %2406 = vmatpush.msra.mxu1 %v413_v61  ;;  %v773_v26 = vld [vmem:[%s3453_s2 + $0xd98] sm:$0xff] }
 0x31f   : > { %2426 = vmatpush.msra.mxu2 %v477_v62  ;;  %2445 = vmatpush.msra.mxu3 %v545_v63  ;;  %v841_v27 = vld [vmem:[%s3453_s2 + $0xfb8] sm:$0xff] }
 0x320   : > { %2387 = vmatpush.msra.mxu0 %v345_v4  ;;  %2407 = vmatpush.msra.mxu1 %v409_v5  ;;  %v641_v28 = vld [vmem:[%s3453_s2 + $0x978] sm:$0xff]  ;;  %v4409_v4 = vpop.f32.mrf.mxu3 }
 0x321   : > { %2427 = vmatpush.msra.mxu2 %v473_v6  ;;  %2446 = vmatpush.msra.mxu3 %v541_v7  ;;  %v705_v29 = vld [vmem:[%s3453_s2 + $0xb78] sm:$0xff] }
 0x322   : > { %2388 = vmatpush.msra.mxu0 %v341_v8  ;;  %2408 = vmatpush.msra.mxu1 %v405_v9  ;;  %v769_v30 = vld [vmem:[%s3453_s2 + $0xd78] sm:$0xff]  ;;  %v4415_v9 = vpop.f32.mrf.mxu1 }
 0x323   : > { %2428 = vmatpush.msra.mxu2 %v469_v10  ;;  %2447 = vmatpush.msra.mxu3 %v537_v11  ;;  %v837_v31 = vld [vmem:[%s3453_s2 + $0xf98] sm:$0xff] }
 0x324   : > { %2453 = vmatpush.msrb.mxu0 %v657_v12  ;;  %2473 = vmatpush.msrb.mxu1 %v721_v13  ;;  %v637_v33 = vld [vmem:[%s3453_s2 + $0x958] sm:$0xff] }
 0x325   : > { %2493 = vmatpush.msrb.mxu2 %v785_v14  ;;  %2448 = vmatpush.msra.mxu3 %v533_v15  ;;  %v701_v34 = vld [vmem:[%s3453_s2 + $0xb58] sm:$0xff] }
 0x326   : > { %2454 = vmatpush.msrb.mxu0 %v653_v16  ;;  %2474 = vmatpush.msrb.mxu1 %v717_v17  ;;  %v765_v35 = vld [vmem:[%s3453_s2 + $0xd58] sm:$0xff] }
 0x327   : > { %2494 = vmatpush.msrb.mxu2 %v781_v18  ;;  %2513 = vmatpush.msrb.mxu3 %v849_v19  ;;  %v833_v36 = vld [vmem:[%s3453_s2 + $0xf78] sm:$0xff]  ;;  %v4425_v18 = vpop.f32.mrf.mxu2  ;;  %v4427_v19 = vpop.f32.mrf.mxu0 }
 0x328   : > { %2455 = vmatpush.msrb.mxu0 %v649_v20  ;;  %2475 = vmatpush.msrb.mxu1 %v713_v21  ;;  %v633_v37 = vld [vmem:[%s3453_s2 + $0x938] sm:$0xff] }
 0x329   : > { %2495 = vmatpush.msrb.mxu2 %v777_v22  ;;  %2514 = vmatpush.msrb.mxu3 %v845_v23  ;;  %v697_v38 = vld [vmem:[%s3453_s2 + $0xb38] sm:$0xff] }
 0x32a   : > { %2456 = vmatpush.msrb.mxu0 %v645_v24  ;;  %2476 = vmatpush.msrb.mxu1 %v709_v25  ;;  %v761_v39 = vld [vmem:[%s3453_s2 + $0xd38] sm:$0xff] }
 0x32b   : > { %2496 = vmatpush.msrb.mxu2 %v773_v26  ;;  %2515 = vmatpush.msrb.mxu3 %v841_v27  ;;  %v829_v40 = vld [vmem:[%s3453_s2 + $0xf58] sm:$0xff] }
 0x32c   : > { %2457 = vmatpush.msrb.mxu0 %v641_v28  ;;  %2477 = vmatpush.msrb.mxu1 %v705_v29  ;;  %v629_v42 = vld [vmem:[%s3453_s2 + $0x918] sm:$0xff]  ;;  %v4437_v28 = vpop.f32.mrf.mxu3  ;;  %v4439_v29 = vpop.f32.mrf.mxu1 }
 0x32d   : > { %2497 = vmatpush.msrb.mxu2 %v769_v30  ;;  %2516 = vmatpush.msrb.mxu3 %v837_v31  ;;  %v693_v43 = vld [vmem:[%s3453_s2 + $0xb18] sm:$0xff] }
 0x32e   : > { %2458 = vmatpush.msrb.mxu0 %v637_v33  ;;  %2478 = vmatpush.msrb.mxu1 %v701_v34  ;;  %v757_v44 = vld [vmem:[%s3453_s2 + $0xd18] sm:$0xff] }
 0x32f   : > { %2498 = vmatpush.msrb.mxu2 %v765_v35  ;;  %2517 = vmatpush.msrb.mxu3 %v833_v36  ;;  %v825_v45 = vld [vmem:[%s3453_s2 + $0xf38] sm:$0xff]  ;;  %v4448_v36 = vpop.f32.mrf.mxu2 }
 0x330   : > { %2459 = vmatpush.msrb.mxu0 %v633_v37  ;;  %2479 = vmatpush.msrb.mxu1 %v697_v38  ;;  %v625_v46 = vld [vmem:[%s3453_s2 + $0x8f8] sm:$0xff]  ;;  %v4450_v37 = vpop.f32.mrf.mxu0 }
 0x331   : > { %2499 = vmatpush.msrb.mxu2 %v761_v39  ;;  %2518 = vmatpush.msrb.mxu3 %v829_v40  ;;  %v689_v47 = vld [vmem:[%s3453_s2 + $0xaf8] sm:$0xff] }
 0x332   : > { %2460 = vmatpush.msrb.mxu0 %v629_v42  ;;  %2480 = vmatpush.msrb.mxu1 %v693_v43  ;;  %v753_v52 = vld [vmem:[%s3453_s2 + $0xcf8] sm:$0xff] }
 0x333   : > { %v821_v53 = vld [vmem:[%s3453_s2 + $0xf18] sm:$0xff]  ;;  %2500 = vmatpush.msrb.mxu2 %v757_v44  ;;  %2519 = vmatpush.msrb.mxu3 %v825_v45 }
 0x334   : > { %v621_v55 = vld [vmem:[%s3453_s2 + $0x8d8] sm:$0xff]  ;;  %2461 = vmatpush.msrb.mxu0 %v625_v46  ;;  %2481 = vmatpush.msrb.mxu1 %v689_v47  ;;  %v4461_v43 = vpop.f32.mrf.mxu3  ;;  %v4463_v44 = vpop.f32.mrf.mxu1 }
 0x335   : > { %v685_v56 = vld [vmem:[%s3453_s2 + $0xad8] sm:$0xff]  ;;  %2501 = vmatpush.msrb.mxu2 %v753_v52  ;;  %2520 = vmatpush.msrb.mxu3 %v821_v53 }
 0x336   : > { %v749_v57 = vld [vmem:[%s3453_s2 + $0xcd8] sm:$0xff]  ;;  %2462 = vmatpush.msrb.mxu0 %v621_v55  ;;  %2482 = vmatpush.msrb.mxu1 %v685_v56 }
 0x337   : > { %v817_v58 = vld [vmem:[%s3453_s2 + $0xef8] sm:$0xff]  ;;  %2502 = vmatpush.msrb.mxu2 %v749_v57  ;;  %2389 = vmatmul.f32.vlgmr.msra.gmra.mxu0 %v3591_v48  ;;  %v4472_v56 = vpop.f32.mrf.mxu2 }
 0x338   : > { %v617_v60 = vld [vmem:[%s3453_s2 + $0x8b8] sm:$0xff]  ;;  %2521 = vmatpush.msrb.mxu3 %v817_v58  ;;  %2409 = vmatmul.f32.vlgmr.msra.gmra.mxu1 %v3593_v49  ;;  %v4474_v57 = vpop.f32.mrf.mxu0 }
 0x339   : > { %v681_v61 = vld [vmem:[%s3453_s2 + $0xab8] sm:$0xff]  ;;  %2463 = vmatpush.msrb.mxu0 %v617_v60  ;;  %2429 = vmatmul.f32.vlgmr.msra.gmra.mxu2 %v3595_v50 }
 0x33a   : > { %v745_v62 = vld [vmem:[%s3453_s2 + $0xcb8] sm:$0xff]  ;;  %2483 = vmatpush.msrb.mxu1 %v681_v61  ;;  %2449 = vmatmul.f32.vlgmr.msra.gmra.mxu3 %v3597_v51 }
 0x33b   : > { %v813_v63 = vld [vmem:[%s3453_s2 + $0xed8] sm:$0xff]  ;;  %2503 = vmatpush.msrb.mxu2 %v745_v62 }
 0x33c   : > { %v613_v5 = vld [vmem:[%s3453_s2 + $0x898] sm:$0xff]  ;;  %2522 = vmatpush.msrb.mxu3 %v813_v63 }
 0x33d   : > { %v677_v6 = vld [vmem:[%s3453_s2 + $0xa98] sm:$0xff]  ;;  %2464 = vmatpush.msrb.mxu0 %v613_v5  ;;  %v4483_v5 = vpop.f32.mrf.mxu3 }
 0x33e   : > { %v741_v7 = vld [vmem:[%s3453_s2 + $0xc98] sm:$0xff]  ;;  %2484 = vmatpush.msrb.mxu1 %v677_v6  ;;  %v4485_v6 = vpop.f32.mrf.mxu1 }
 0x33f   : > { %v809_v8 = vld [vmem:[%s3453_s2 + $0xeb8] sm:$0xff]  ;;  %2504 = vmatpush.msrb.mxu2 %v741_v7 }
 0x340   : > { %v609_v10 = vld [vmem:[%s3453_s2 + $0x878] sm:$0xff]  ;;  %2523 = vmatpush.msrb.mxu3 %v809_v8 }
 0x341   : > { %v673_v11 = vld [vmem:[%s3453_s2 + $0xa78] sm:$0xff]  ;;  %2465 = vmatpush.msrb.mxu0 %v609_v10 }
 0x342   : > { %v737_v12 = vld [vmem:[%s3453_s2 + $0xc78] sm:$0xff]  ;;  %2485 = vmatpush.msrb.mxu1 %v673_v11 }
 0x343   : > { %v805_v13 = vld [vmem:[%s3453_s2 + $0xe98] sm:$0xff]  ;;  %2505 = vmatpush.msrb.mxu2 %v737_v12 }
 0x344   : > { %v605_v14 = vld [vmem:[%s3453_s2 + $0x858] sm:$0xff]  ;;  %2524 = vmatpush.msrb.mxu3 %v805_v13  ;;  %v4497_v13 = vpop.f32.mrf.mxu2 }
 0x345   : > { %v669_v15 = vld [vmem:[%s3453_s2 + $0xa58] sm:$0xff]  ;;  %2466 = vmatpush.msrb.mxu0 %v605_v14 }
 0x346   : > { %v733_v16 = vld [vmem:[%s3453_s2 + $0xc58] sm:$0xff]  ;;  %2486 = vmatpush.msrb.mxu1 %v669_v15 }
 0x347   : > { %v801_v17 = vld [vmem:[%s3453_s2 + $0xe78] sm:$0xff]  ;;  %2506 = vmatpush.msrb.mxu2 %v733_v16 }
 0x348   : > { %v601_v20 = vld [vmem:[%s3453_s2 + $0x838] sm:$0xff]  ;;  %2525 = vmatpush.msrb.mxu3 %v801_v17  ;;  %v4503_v17 = vpop.f32.mrf.mxu0 }
 0x349   : > { %v665_v21 = vld [vmem:[%s3453_s2 + $0xa38] sm:$0xff]  ;;  %2467 = vmatpush.msrb.mxu0 %v601_v20 }
 0x34a   : > { %v729_v22 = vld [vmem:[%s3453_s2 + $0xc38] sm:$0xff]  ;;  %2487 = vmatpush.msrb.mxu1 %v665_v21 }
 0x34b   : > { %v797_v23 = vld [vmem:[%s3453_s2 + $0xe58] sm:$0xff]  ;;  %2507 = vmatpush.msrb.mxu2 %v729_v22 }
 0x34c   : > { %v597_v24 = vld [vmem:[%s3453_s2 + $0x818] sm:$0xff]  ;;  %2526 = vmatpush.msrb.mxu3 %v797_v23 }
 0x34d   : > { %v661_v25 = vld [vmem:[%s3453_s2 + $0xa18] sm:$0xff]  ;;  %2468 = vmatpush.msrb.mxu0 %v597_v24  ;;  %v4509_v24 = vpop.f32.mrf.mxu3 }
 0x34e   : > { %v725_v26 = vld [vmem:[%s3453_s2 + $0xc18] sm:$0xff]  ;;  %2488 = vmatpush.msrb.mxu1 %v661_v25  ;;  %2469 = vmatmul.f32.vlgmr.msrb.gmra.mxu0 %v3615_v1 }
 0x34f   : > { %v793_v27 = vld [vmem:[%s3453_s2 + $0xe38] sm:$0xff]  ;;  %2508 = vmatpush.msrb.mxu2 %v725_v26  ;;  %2489 = vmatmul.f32.vlgmr.msrb.gmra.mxu1 %v3619_v3 }
 0x350   : > { %v913_v30 = vld [vmem:[%s3453_s2 + $0x11f8] sm:$0xff]  ;;  %2527 = vmatpush.msrb.mxu3 %v793_v27  ;;  %2509 = vmatmul.f32.vlgmr.msrb.gmra.mxu2 %v3613_v0 }
 0x351   : > { %v977_v31 = vld [vmem:[%s3453_s2 + $0x13f8] sm:$0xff]  ;;  %2533 = vmatpush.msra.mxu0 %v913_v30 }
 0x352   : > { %v1041_v33 = vld [vmem:[%s3453_s2 + $0x15f8] sm:$0xff]  ;;  %2553 = vmatpush.msra.mxu1 %v977_v31  ;;  %v4515_v31 = vpop.f32.mrf.mxu1 }
 0x353   : > { %v789_v34 = vld [vmem:[%s3453_s2 + $0xe18] sm:$0xff]  ;;  %2573 = vmatpush.msra.mxu2 %v1041_v33 }
 0x354   : > { %v909_v35 = vld [vmem:[%s3453_s2 + $0x11d8] sm:$0xff]  ;;  %2528 = vmatpush.msrb.mxu3 %v789_v34 }
 0x355   : > { %v973_v38 = vld [vmem:[%s3453_s2 + $0x13d8] sm:$0xff]  ;;  %2534 = vmatpush.msra.mxu0 %v909_v35  ;;  %2529 = vmatmul.f32.vlgmr.msrb.gmra.mxu3 %v3617_v2 }
 0x356   : > { %v1037_v48 = vld [vmem:[%s3453_s2 + $0x15d8] sm:$0xff]  ;;  %2554 = vmatpush.msra.mxu1 %v973_v38 }
 0x357   : > { %v1105_v39 = vld [vmem:[%s3453_s2 + $0x17f8] sm:$0xff]  ;;  %2574 = vmatpush.msra.mxu2 %v1037_v48 }
 0x358   : > { %v905_v49 = vld [vmem:[%s3453_s2 + $0x11b8] sm:$0xff]  ;;  %2593 = vmatpush.msra.mxu3 %v1105_v39 }
 0x359   : > { %v969_v40 = vld [vmem:[%s3453_s2 + $0x13b8] sm:$0xff]  ;;  %2535 = vmatpush.msra.mxu0 %v905_v49 }
 0x35a   : > { %v1033_v42 = vld [vmem:[%s3453_s2 + $0x15b8] sm:$0xff]  ;;  %2555 = vmatpush.msra.mxu1 %v969_v40 }
 0x35b   : > { %v1101_v50 = vld [vmem:[%s3453_s2 + $0x17d8] sm:$0xff]  ;;  %2575 = vmatpush.msra.mxu2 %v1033_v42  ;;  %v4525_v42 = vpop.f32.mrf.mxu2 }
 0x35c   : > { %v901_v45 = vld [vmem:[%s3453_s2 + $0x1198] sm:$0xff]  ;;  %2594 = vmatpush.msra.mxu3 %v1101_v50  ;;  %v4527_v50 = vpop.f32.mrf.mxu0 }
 0x35d   : > { %v965_v46 = vld [vmem:[%s3453_s2 + $0x1398] sm:$0xff]  ;;  %2536 = vmatpush.msra.mxu0 %v901_v45 }
 0x35e   : > { %v1029_v47 = vld [vmem:[%s3453_s2 + $0x1598] sm:$0xff]  ;;  %2556 = vmatpush.msra.mxu1 %v965_v46 }
 0x35f   : > { %v1097_v51 = vld [vmem:[%s3453_s2 + $0x17b8] sm:$0xff]  ;;  %2576 = vmatpush.msra.mxu2 %v1029_v47 }
 0x360   : > { %v897_v52 = vld [vmem:[%s3453_s2 + $0x1178] sm:$0xff]  ;;  %2595 = vmatpush.msra.mxu3 %v1097_v51 }
 0x361   : > { %v961_v53 = vld [vmem:[%s3453_s2 + $0x1378] sm:$0xff]  ;;  %2537 = vmatpush.msra.mxu0 %v897_v52 }
 0x362   : > { %v1025_v55 = vld [vmem:[%s3453_s2 + $0x1578] sm:$0xff]  ;;  %2557 = vmatpush.msra.mxu1 %v961_v53 }
 0x363   : > { %v1093_v58 = vld [vmem:[%s3453_s2 + $0x1798] sm:$0xff]  ;;  %2577 = vmatpush.msra.mxu2 %v1025_v55 }
 0x364   : > { %v893_v60 = vld [vmem:[%s3453_s2 + $0x1158] sm:$0xff]  ;;  %2596 = vmatpush.msra.mxu3 %v1093_v58 }
 0x365   : > { %v957_v61 = vld [vmem:[%s3453_s2 + $0x1358] sm:$0xff]  ;;  %2538 = vmatpush.msra.mxu0 %v893_v60  ;;  %v4537_v60 = vpop.f32.mrf.mxu3 }
 0x366   : > { %v1021_v62 = vld [vmem:[%s3453_s2 + $0x1558] sm:$0xff]  ;;  %2558 = vmatpush.msra.mxu1 %v957_v61  ;;  %v4539_v61 = vpop.f32.mrf.mxu1 }
 0x367   : > { %v1089_v63 = vld [vmem:[%s3453_s2 + $0x1778] sm:$0xff]  ;;  %2578 = vmatpush.msra.mxu2 %v1021_v62 }
 0x368   : > { %v889_v0 = vld [vmem:[%s3453_s2 + $0x1138] sm:$0xff]  ;;  %2597 = vmatpush.msra.mxu3 %v1089_v63 }
 0x369   : > { %v953_v7 = vld [vmem:[%s3453_s2 + $0x1338] sm:$0xff]  ;;  %2539 = vmatpush.msra.mxu0 %v889_v0 }
 0x36a   : > { %v1017_v8 = vld [vmem:[%s3453_s2 + $0x1538] sm:$0xff]  ;;  %2559 = vmatpush.msra.mxu1 %v953_v7 }
 0x36b   : > { %v1085_v10 = vld [vmem:[%s3453_s2 + $0x1758] sm:$0xff]  ;;  %2579 = vmatpush.msra.mxu2 %v1017_v8 }
 0x36c   : > { %v885_v1 = vld [vmem:[%s3453_s2 + $0x1118] sm:$0xff]  ;;  %2598 = vmatpush.msra.mxu3 %v1085_v10 }
 0x36d   : > { %v949_v11 = vld [vmem:[%s3453_s2 + $0x1318] sm:$0xff]  ;;  %2540 = vmatpush.msra.mxu0 %v885_v1  ;;  %v4547_v1 = vpop.f32.mrf.mxu2 }
 0x36e   : > { %v1013_v2 = vld [vmem:[%s3453_s2 + $0x1518] sm:$0xff]  ;;  %2560 = vmatpush.msra.mxu1 %v949_v11  ;;  %v4549_v11 = vpop.f32.mrf.mxu0 }
 0x36f   : > { %v1081_v12 = vld [vmem:[%s3453_s2 + $0x1738] sm:$0xff]  ;;  %2580 = vmatpush.msra.mxu2 %v1013_v2 }
 0x370   : > { %v881_v14 = vld [vmem:[%s3453_s2 + $0x10f8] sm:$0xff]  ;;  %2599 = vmatpush.msra.mxu3 %v1081_v12 }
 0x371   : > { %v945_v15 = vld [vmem:[%s3453_s2 + $0x12f8] sm:$0xff]  ;;  %2541 = vmatpush.msra.mxu0 %v881_v14 }
 0x372   : > { %v1009_v3 = vld [vmem:[%s3453_s2 + $0x14f8] sm:$0xff]  ;;  %2561 = vmatpush.msra.mxu1 %v945_v15  ;;  %v3082_v15 = vld.sshfl [vmem:[#allocation1 + $0x10] sm:$0xff pattern:$0x73625140] }
 0x373   : > { %v1077_v16 = vld [vmem:[%s3453_s2 + $0x1718] sm:$0xff]  ;;  %2581 = vmatpush.msra.mxu2 %v1009_v3 }
 0x374   : > { %v877_v20 = vld [vmem:[%s3453_s2 + $0x10d8] sm:$0xff]  ;;  %2600 = vmatpush.msra.mxu3 %v1077_v16 }
 0x375   : > { %v941_v21 = vld [vmem:[%s3453_s2 + $0x12d8] sm:$0xff]  ;;  %2542 = vmatpush.msra.mxu0 %v877_v20  ;;  %v4556_v20 = vld [vmem:[%s3460_s24] sm:$0xf] }
 0x376   : > { %v1005_v22 = vld [vmem:[%s3453_s2 + $0x14d8] sm:$0xff]  ;;  %2562 = vmatpush.msra.mxu1 %v941_v21 }
 0x377   : > { %v1073_v23 = vld [vmem:[%s3453_s2 + $0x16f8] sm:$0xff]  ;;  %2582 = vmatpush.msra.mxu2 %v1005_v22 }
 0x378   : > { %v873_v25 = vld [vmem:[%s3453_s2 + $0x10b8] sm:$0xff]  ;;  %2601 = vmatpush.msra.mxu3 %v1073_v23  ;;  %v4560_v23 = vpop.f32.mrf.mxu3 }
 0x379   : > { %v937_v26 = vld [vmem:[%s3453_s2 + $0x12b8] sm:$0xff]  ;;  %2543 = vmatpush.msra.mxu0 %v873_v25  ;;  %v4562_v25 = vpop.f32.mrf.mxu1 }
 0x37a   : > { %v1001_v27 = vld [vmem:[%s3453_s2 + $0x14b8] sm:$0xff]  ;;  %2563 = vmatpush.msra.mxu1 %v937_v26 }
 0x37b   : > { %v1069_v30 = vld [vmem:[%s3453_s2 + $0x16d8] sm:$0xff]  ;;  %2583 = vmatpush.msra.mxu2 %v1001_v27  ;;  %v3084_v27 = vld.sshfl [vmem:[#allocation1 + $0x18] sm:$0xff pattern:$0x73625140] }
 0x37c   : > { %v869_v33 = vld [vmem:[%s3453_s2 + $0x1098] sm:$0xff]  ;;  %2602 = vmatpush.msra.mxu3 %v1069_v30 }
 0x37d   : > { %v933_v34 = vld [vmem:[%s3453_s2 + $0x1298] sm:$0xff]  ;;  %2544 = vmatpush.msra.mxu0 %v869_v33 }
 0x37e   : > { %v997_v35 = vld [vmem:[%s3453_s2 + $0x1498] sm:$0xff]  ;;  %2564 = vmatpush.msra.mxu1 %v933_v34 }
 0x37f   : > { %v1065_v38 = vld [vmem:[%s3453_s2 + $0x16b8] sm:$0xff]  ;;  %2584 = vmatpush.msra.mxu2 %v997_v35 }
 0x380   : > { %v865_v48 = vld [vmem:[%s3453_s2 + $0x1078] sm:$0xff]  ;;  %2603 = vmatpush.msra.mxu3 %v1065_v38  ;;  %v1364_v38 = vperm.slane %v4556_v20, 0 }
 0x381   : > { %v929_v39 = vld [vmem:[%s3453_s2 + $0x1278] sm:$0xff]  ;;  %2545 = vmatpush.msra.mxu0 %v865_v48 }
 0x382   : > { %v993_v49 = vld [vmem:[%s3453_s2 + $0x1478] sm:$0xff]  ;;  %2565 = vmatpush.msra.mxu1 %v929_v39 }
 0x383   : > { %v1061_v40 = vld [vmem:[%s3453_s2 + $0x1698] sm:$0xff]  ;;  %2585 = vmatpush.msra.mxu2 %v993_v49  ;;  %v1365_v49 = vperm.slane %v4556_v20, 1 }
 0x384   : > { %v861_v45 = vld [vmem:[%s3453_s2 + $0x1058] sm:$0xff]  ;;  %2604 = vmatpush.msra.mxu3 %v1061_v40  ;;  %v1366_v40 = vperm.slane %v4556_v20, 2 }
 0x385   : > { %v925_v46 = vld [vmem:[%s3453_s2 + $0x1258] sm:$0xff]  ;;  %2546 = vmatpush.msra.mxu0 %v861_v45 }
 0x386   : > { %v989_v47 = vld [vmem:[%s3453_s2 + $0x1458] sm:$0xff]  ;;  %2566 = vmatpush.msra.mxu1 %v925_v46 }
 0x387   : > { %v1057_v51 = vld [vmem:[%s3453_s2 + $0x1678] sm:$0xff]  ;;  %2586 = vmatpush.msra.mxu2 %v989_v47  ;;  %v4575_v47 = vpop.f32.mrf.mxu2 }
 0x388   : > { %v857_v52 = vld [vmem:[%s3453_s2 + $0x1038] sm:$0xff]  ;;  %2605 = vmatpush.msra.mxu3 %v1057_v51  ;;  %v2070_v51 = vpop.f32.mrf.mxu0 }
 0x389   : > { %v921_v53 = vld [vmem:[%s3453_s2 + $0x1238] sm:$0xff]  ;;  %2547 = vmatpush.msra.mxu0 %v857_v52 }
 0x38a   : > { %v985_v55 = vld [vmem:[%s3453_s2 + $0x1438] sm:$0xff]  ;;  %2567 = vmatpush.msra.mxu1 %v921_v53 }
 0x38b   : > { %v1053_v58 = vld [vmem:[%s3453_s2 + $0x1658] sm:$0xff]  ;;  %2587 = vmatpush.msra.mxu2 %v985_v55 }
 0x38c   : > { %v853_v62 = vld [vmem:[%s3453_s2 + $0x1018] sm:$0xff]  ;;  %2606 = vmatpush.msra.mxu3 %v1053_v58 }
 0x38d   : > { %v917_v63 = vld [vmem:[%s3453_s2 + $0x1218] sm:$0xff]  ;;  %2548 = vmatpush.msra.mxu0 %v853_v62  ;;  %v1431_v62 = vadd.f32 %v4377_v32, %v1364_v38 }
 0x38e   : > { %v981_v0 = vld [vmem:[%s3453_s2 + $0x1418] sm:$0xff]  ;;  %2568 = vmatpush.msra.mxu1 %v917_v63 }
 0x38f   : > { %v1049_v7 = vld [vmem:[%s3453_s2 + $0x1638] sm:$0xff]  ;;  %2588 = vmatpush.msra.mxu2 %v981_v0 }
 0x390   : > { %v1169_v8 = vld [vmem:[%s3453_s2 + $0x19f8] sm:$0xff]  ;;  %2607 = vmatpush.msra.mxu3 %v1049_v7  ;;  %2589 = vmatmul.f32.vlgmr.msra.gmra.mxu2 %v3082_v15  ;;  %v1751_v7 = vadd.f32 %v4474_v57, %v1365_v49 }
 0x391   : > { %v1233_v10 = vld [vmem:[%s3453_s2 + $0x1bf8] sm:$0xff]  ;;  %2613 = vmatpush.msrb.mxu0 %v1169_v8  ;;  %v2071_v8 = vadd.f32 %v2070_v51, %v1366_v40 }
 0x392   : > { %v1297_v2 = vld [vmem:[%s3453_s2 + $0x1df8] sm:$0xff]  ;;  %2633 = vmatpush.msrb.mxu1 %v1233_v10 }
 0x393   : > { %v1045_v12 = vld [vmem:[%s3453_s2 + $0x1618] sm:$0xff]  ;;  %2653 = vmatpush.msrb.mxu2 %v1297_v2 }
 0x394   : > { %v3081_v14 = vld.sshfl [vmem:[#allocation1] sm:$0xff pattern:$0x73625140]  ;;  %2608 = vmatpush.msra.mxu3 %v1045_v12  ;;  %v3083_v26 = vld.sshfl [vmem:[#allocation1 + $0x8] sm:$0xff pattern:$0x73625140]  ;;  %v4587_v12 = vpop.f32.mrf.mxu3 }
 0x395   : > { %2549 = vmatmul.f32.vlgmr.msra.gmra.mxu0 %v3081_v14  ;;  %v1165_v3 = vld [vmem:[%s3453_s2 + $0x19d8] sm:$0xff]  ;;  %2569 = vmatmul.f32.vlgmr.msra.gmra.mxu1 %v3083_v26  ;;  %v2090_v14 = vpop.f32.mrf.mxu1  ;;  %v1771_v26 = vadd.f32 %v4485_v6, %v1751_v7 }
 0x396   : > { %v1229_v16 = vld [vmem:[%s3453_s2 + $0x1bd8] sm:$0xff]  ;;  %2609 = vmatmul.f32.vlgmr.msra.gmra.mxu3 %v3084_v27  ;;  %2614 = vmatpush.msrb.mxu0 %v1165_v3  ;;  %v2091_v27 = vadd.f32 %v2090_v14, %v2071_v8 }
 0x397   : > { %v1293_v21 = vld [vmem:[%s3453_s2 + $0x1dd8] sm:$0xff]  ;;  %2634 = vmatpush.msrb.mxu1 %v1229_v16  ;;  %v1451_v16 = vadd.f32 %v4387_v41, %v1431_v62  ;;  %v1791_v40 = vadd.f32 %v4497_v13, %v1771_v26 }
 0x398   : > { %v1361_v22 = vld [vmem:[%s3453_s2 + $0x1ff8] sm:$0xff]  ;;  %2654 = vmatpush.msrb.mxu2 %v1293_v21 }
 0x399   : > { %v1161_v30 = vld [vmem:[%s3453_s2 + $0x19b8] sm:$0xff]  ;;  %2673 = vmatpush.msrb.mxu3 %v1361_v22  ;;  %v1471_v6 = vadd.f32 %v4397_v54, %v1451_v16 }
 0x39a   : > { %v1225_v33 = vld [vmem:[%s3453_s2 + $0x1bb8] sm:$0xff]  ;;  %2615 = vmatpush.msrb.mxu0 %v1161_v30 }
 0x39b   : > { %v1289_v34 = vld [vmem:[%s3453_s2 + $0x1db8] sm:$0xff]  ;;  %2635 = vmatpush.msrb.mxu1 %v1225_v33  ;;  %v1491_v13 = vadd.f32 %v4409_v4, %v1471_v6 }
 0x39c   : > { %v1357_v35 = vld [vmem:[%s3453_s2 + $0x1fd8] sm:$0xff]  ;;  %2655 = vmatpush.msrb.mxu2 %v1289_v34  ;;  %v2110_v34 = vpop.f32.mrf.mxu2 }
 0x39d   : > { %v1157_v48 = vld [vmem:[%s3453_s2 + $0x1998] sm:$0xff]  ;;  %2674 = vmatpush.msrb.mxu3 %v1357_v35 }
 0x39e   : > { %v1221_v39 = vld [vmem:[%s3453_s2 + $0x1b98] sm:$0xff]  ;;  %2616 = vmatpush.msrb.mxu0 %v1157_v48 }
 0x39f   : > { %v1285_v45 = vld [vmem:[%s3453_s2 + $0x1d98] sm:$0xff]  ;;  %2636 = vmatpush.msrb.mxu1 %v1221_v39 }
 0x3a0   : > { %v1353_v46 = vld [vmem:[%s3453_s2 + $0x1fb8] sm:$0xff]  ;;  %2656 = vmatpush.msrb.mxu2 %v1285_v45  ;;  %v2111_v45 = vadd.f32 %v2110_v34, %v2091_v27  ;;  %v2170_v27 = vpop.f32.mrf.mxu1 }
 0x3a1   : > { %v1153_v52 = vld [vmem:[%s3453_s2 + $0x1978] sm:$0xff]  ;;  %2675 = vmatpush.msrb.mxu3 %v1353_v46 }
 0x3a2   : > { %v1217_v53 = vld [vmem:[%s3453_s2 + $0x1b78] sm:$0xff]  ;;  %2617 = vmatpush.msrb.mxu0 %v1153_v52  ;;  %v2130_v52 = vpop.f32.mrf.mxu3 }
 0x3a3   : > { %v1281_v55 = vld [vmem:[%s3453_s2 + $0x1d78] sm:$0xff]  ;;  %2637 = vmatpush.msrb.mxu1 %v1217_v53  ;;  %v2131_v7 = vadd.f32 %v2130_v52, %v2111_v45 }
 0x3a4   : > { %v1349_v58 = vld [vmem:[%s3453_s2 + $0x1f98] sm:$0xff]  ;;  %2657 = vmatpush.msrb.mxu2 %v1281_v55 }
 0x3a5   : > { %v1149_v63 = vld [vmem:[%s3453_s2 + $0x1958] sm:$0xff]  ;;  %2676 = vmatpush.msrb.mxu3 %v1349_v58 }
 0x3a6   : > { %v1213_v0 = vld [vmem:[%s3453_s2 + $0x1b58] sm:$0xff]  ;;  %2618 = vmatpush.msrb.mxu0 %v1149_v63 }
 0x3a7   : > { %v1277_v10 = vld [vmem:[%s3453_s2 + $0x1d58] sm:$0xff]  ;;  %2638 = vmatpush.msrb.mxu1 %v1213_v0  ;;  %v1811_v0 = vadd.f32 %v4509_v24, %v1791_v40  ;;  %v1511_v24 = vadd.f32 %v4403_v59, %v1491_v13  ;;  %v2729_v40 = vld [vmem:[%s3466_s16 + $0xf8] sm:$0xff] }
 0x3a8   : > { %v1345_v2 = vld [vmem:[%s3453_s2 + $0x1f78] sm:$0xff]  ;;  %2658 = vmatpush.msrb.mxu2 %v1277_v10 }
 0x3a9   : > { %v1145_v32 = vld [vmem:[%s3453_s2 + $0x1938] sm:$0xff]  ;;  %2677 = vmatpush.msrb.mxu3 %v1345_v2  ;;  %v2150_v2 = vpop.f32.mrf.mxu0  ;;  %v1831_v16 = vadd.f32 %v4503_v17, %v1811_v0  ;;  %v1531_v17 = vadd.f32 %v4415_v9, %v1511_v24  ;;  %v2713_v9 = vld [vmem:[%s3466_s16 + $0x78] sm:$0xff]  ;;  %v3088_v0 = vld.sshfl [vmem:[#allocation1 + $0x38] sm:$0xff pattern:$0x73625140] }
 0x3aa   : > { %v1209_v15 = vld [vmem:[%s3453_s2 + $0x1b38] sm:$0xff]  ;;  %2619 = vmatpush.msrb.mxu0 %v1145_v32 }
 0x3ab   : > { %v1273_v3 = vld [vmem:[%s3453_s2 + $0x1d38] sm:$0xff]  ;;  %2639 = vmatpush.msrb.mxu1 %v1209_v15  ;;  %v1551_v45 = vadd.f32 %v4425_v18, %v1531_v17  ;;  %v2723_v17 = vld [vmem:[%s3466_s16 + $0xc8] sm:$0xff] }
 0x3ac   : > { %v1341_v57 = vld [vmem:[%s3453_s2 + $0x1f58] sm:$0xff]  ;;  %2659 = vmatpush.msrb.mxu2 %v1273_v3 }
 0x3ad   : > { %v1141_v21 = vld [vmem:[%s3453_s2 + $0x1918] sm:$0xff]  ;;  %2678 = vmatpush.msrb.mxu3 %v1341_v57 }
 0x3ae   : > { %v1205_v22 = vld [vmem:[%s3453_s2 + $0x1b18] sm:$0xff]  ;;  %2620 = vmatpush.msrb.mxu0 %v1141_v21  ;;  %v2151_v21 = vadd.f32 %v2150_v2, %v2131_v7  ;;  %v2711_v7 = vld [vmem:[%s3466_s16 + $0x68] sm:$0xff] }
 0x3af   : > { %v1269_v30 = vld [vmem:[%s3453_s2 + $0x1d18] sm:$0xff]  ;;  %2640 = vmatpush.msrb.mxu1 %v1205_v22 }
 0x3b0   : > { %v1337_v33 = vld [vmem:[%s3453_s2 + $0x1f38] sm:$0xff]  ;;  %2660 = vmatpush.msrb.mxu2 %v1269_v30 }
 0x3b1   : > { %v1137_v41 = vld [vmem:[%s3453_s2 + $0x18f8] sm:$0xff]  ;;  %2679 = vmatpush.msrb.mxu3 %v1337_v33 }
 0x3b2   : > { %v1201_v35 = vld [vmem:[%s3453_s2 + $0x1af8] sm:$0xff]  ;;  %2621 = vmatpush.msrb.mxu0 %v1137_v41 }
 0x3b3   : > { %v1265_v38 = vld [vmem:[%s3453_s2 + $0x1cf8] sm:$0xff]  ;;  %2641 = vmatpush.msrb.mxu1 %v1201_v35 }
 0x3b4   : > { %v1333_v48 = vld [vmem:[%s3453_s2 + $0x1f18] sm:$0xff]  ;;  %2661 = vmatpush.msrb.mxu2 %v1265_v38  ;;  %v1851_v38 = vadd.f32 %v4515_v31, %v1831_v16  ;;  %v2745_v31 = vld [vmem:[%s3466_s16 + $0x178] sm:$0xff] }
 0x3b5   : > { %v1133_v39 = vld [vmem:[%s3453_s2 + $0x18d8] sm:$0xff]  ;;  %2680 = vmatpush.msrb.mxu3 %v1333_v48  ;;  %v2171_v48 = vadd.f32 %v2170_v27, %v2151_v21  ;;  %v2725_v16 = vld [vmem:[%s3466_s16 + $0xd8] sm:$0xff] }
 0x3b6   : > { %v1197_v49 = vld [vmem:[%s3453_s2 + $0x1ad8] sm:$0xff]  ;;  %2622 = vmatpush.msrb.mxu0 %v1133_v39 }
 0x3b7   : > { %v1261_v46 = vld [vmem:[%s3453_s2 + $0x1cd8] sm:$0xff]  ;;  %2642 = vmatpush.msrb.mxu1 %v1197_v49  ;;  %v2190_v49 = vpop.f32.mrf.mxu2 }
 0x3b8   : > { %v1329_v51 = vld [vmem:[%s3453_s2 + $0x1ef8] sm:$0xff]  ;;  %2662 = vmatpush.msrb.mxu2 %v1261_v46  ;;  %v2191_v52 = vadd.f32 %v2190_v49, %v2171_v48  ;;  %v2722_v48 = vld [vmem:[%s3466_s16 + $0xc0] sm:$0xff]  ;;  %v2721_v49 = vld [vmem:[%s3466_s16 + $0xb8] sm:$0xff] }
 0x3b9   : > { %v1129_v54 = vld [vmem:[%s3453_s2 + $0x18b8] sm:$0xff]  ;;  %2681 = vmatpush.msrb.mxu3 %v1329_v51  ;;  %v1871_v51 = vadd.f32 %v4525_v42, %v1851_v38  ;;  %v2230_v42 = vpop.f32.mrf.mxu0  ;;  %v2706_v38 = vld [vmem:[%s3466_s16 + $0x40] sm:$0xff] }
 0x3ba   : > { %v1193_v53 = vld [vmem:[%s3453_s2 + $0x1ab8] sm:$0xff]  ;;  %2623 = vmatpush.msrb.mxu0 %v1129_v54 }
 0x3bb   : > { %v1257_v55 = vld [vmem:[%s3453_s2 + $0x1cb8] sm:$0xff]  ;;  %2643 = vmatpush.msrb.mxu1 %v1193_v53  ;;  %v3086_v53 = vld.sshfl [vmem:[#allocation1 + $0x30] sm:$0xff pattern:$0x73625140] }
 0x3bc   : > { %v1325_v58 = vld [vmem:[%s3453_s2 + $0x1ed8] sm:$0xff]  ;;  %2663 = vmatpush.msrb.mxu2 %v1257_v55  ;;  %v2210_v55 = vpop.f32.mrf.mxu3 }
 0x3bd   : > { %v1125_v62 = vld [vmem:[%s3453_s2 + $0x1898] sm:$0xff]  ;;  %2682 = vmatpush.msrb.mxu3 %v1325_v58  ;;  %v2211_v2 = vadd.f32 %v2210_v55, %v2191_v52  ;;  %v2719_v55 = vld [vmem:[%s3466_s16 + $0xa8] sm:$0xff] }
 0x3be   : > { %v1189_v63 = vld [vmem:[%s3453_s2 + $0x1a98] sm:$0xff]  ;;  %2624 = vmatpush.msrb.mxu0 %v1125_v62  ;;  %v1571_v62 = vadd.f32 %v4437_v28, %v1551_v45  ;;  %v2737_v45 = vld [vmem:[%s3466_s16 + $0x138] sm:$0xff] }
 0x3bf   : > { %v1253_v8 = vld [vmem:[%s3453_s2 + $0x1c98] sm:$0xff]  ;;  %2644 = vmatpush.msrb.mxu1 %v1189_v63  ;;  %v2231_v24 = vadd.f32 %v2230_v42, %v2211_v2 }
 0x3c0   : > { %v1321_v10 = vld [vmem:[%s3453_s2 + $0x1eb8] sm:$0xff]  ;;  %2664 = vmatpush.msrb.mxu2 %v1253_v8  ;;  %v2727_v8 = vld [vmem:[%s3466_s16 + $0xe8] sm:$0xff]  ;;  %v1591_v28 = vadd.f32 %v4427_v19, %v1571_v62  ;;  %v2741_v19 = vld [vmem:[%s3466_s16 + $0x158] sm:$0xff] }
 0x3c1   : > { %v1121_v4 = vld [vmem:[%s3453_s2 + $0x1878] sm:$0xff]  ;;  %2683 = vmatpush.msrb.mxu3 %v1321_v10  ;;  %v1891_v10 = vadd.f32 %v4537_v60, %v1871_v51  ;;  %v2742_v60 = vld [vmem:[%s3466_s16 + $0x160] sm:$0xff] }
 0x3c2   : > { %v1185_v14 = vld [vmem:[%s3453_s2 + $0x1a78] sm:$0xff]  ;;  %2625 = vmatpush.msrb.mxu0 %v1121_v4  ;;  %v2743_v4 = vld [vmem:[%s3466_s16 + $0x168] sm:$0xff]  ;;  %v1611_v21 = vadd.f32 %v4439_v29, %v1591_v28 }
 0x3c3   : > { %v1249_v32 = vld [vmem:[%s3453_s2 + $0x1c78] sm:$0xff]  ;;  %2645 = vmatpush.msrb.mxu1 %v1185_v14  ;;  %v2710_v14 = vld [vmem:[%s3466_s16 + $0x60] sm:$0xff] }
 0x3c4   : > { %v1317_v15 = vld [vmem:[%s3453_s2 + $0x1e98] sm:$0xff]  ;;  %2665 = vmatpush.msrb.mxu2 %v1249_v32  ;;  %v2726_v32 = vld [vmem:[%s3466_s16 + $0xe0] sm:$0xff] }
 0x3c5   : > { %v1117_v3 = vld [vmem:[%s3453_s2 + $0x1858] sm:$0xff]  ;;  %2684 = vmatpush.msrb.mxu3 %v1317_v15  ;;  %v1911_v15 = vadd.f32 %v4527_v50, %v1891_v10 }
 0x3c6   : > { %v1181_v57 = vld [vmem:[%s3453_s2 + $0x1a58] sm:$0xff]  ;;  %2626 = vmatpush.msrb.mxu0 %v1117_v3  ;;  %v2250_v3 = vpop.f32.mrf.mxu1 }
 0x3c7   : > { %v1245_v22 = vld [vmem:[%s3453_s2 + $0x1c58] sm:$0xff]  ;;  %2646 = vmatpush.msrb.mxu1 %v1181_v57  ;;  %v2709_v57 = vld [vmem:[%s3466_s16 + $0x58] sm:$0xff]  ;;  %v1931_v27 = vadd.f32 %v4539_v61, %v1911_v15  ;;  %v2739_v61 = vld [vmem:[%s3466_s16 + $0x148] sm:$0xff] }
 0x3c8   : > { %v1313_v26 = vld [vmem:[%s3453_s2 + $0x1e78] sm:$0xff]  ;;  %2666 = vmatpush.msrb.mxu2 %v1245_v22  ;;  %v2270_v22 = vpop.f32.mrf.mxu2 }
 0x3c9   : > { %v1113_v59 = vld [vmem:[%s3453_s2 + $0x1838] sm:$0xff]  ;;  %2685 = vmatpush.msrb.mxu3 %v1313_v26  ;;  %v1951_v29 = vadd.f32 %v4547_v1, %v1931_v27  ;;  %v2705_v1 = vld [vmem:[%s3466_s16 + $0x38] sm:$0xff] }
 0x3ca   : > { %v1177_v30 = vld [vmem:[%s3453_s2 + $0x1a38] sm:$0xff]  ;;  %2627 = vmatpush.msrb.mxu0 %v1113_v59  ;;  %v2251_v59 = vadd.f32 %v2250_v3, %v2231_v24  ;;  %v2698_v3 = vld [vmem:[%s3466_s16] sm:$0xff]  ;;  %v2757_v27 = vld [vmem:[%s3466_s16 + $0x1d8] sm:$0xff] }
 0x3cb   : > { %v1241_v33 = vld [vmem:[%s3453_s2 + $0x1c38] sm:$0xff]  ;;  %2647 = vmatpush.msrb.mxu1 %v1177_v30 }
 0x3cc   : > { %v1309_v34 = vld [vmem:[%s3453_s2 + $0x1e58] sm:$0xff]  ;;  %2667 = vmatpush.msrb.mxu2 %v1241_v33  ;;  %v1631_v33 = vadd.f32 %v4448_v36, %v1611_v21  ;;  %v2738_v36 = vld [vmem:[%s3466_s16 + $0x140] sm:$0xff] }
 0x3cd   : > { %v1109_v41 = vld [vmem:[%s3453_s2 + $0x1818] sm:$0xff]  ;;  %2686 = vmatpush.msrb.mxu3 %v1309_v34  ;;  %v2707_v34 = vld [vmem:[%s3466_s16 + $0x48] sm:$0xff] }
 0x3ce   : > { %v1173_v35 = vld [vmem:[%s3453_s2 + $0x1a18] sm:$0xff]  ;;  %2628 = vmatpush.msrb.mxu0 %v1109_v41  ;;  %v2271_v41 = vadd.f32 %v2270_v22, %v2251_v59 }
 0x3cf   : > { %v1237_v6 = vld [vmem:[%s3453_s2 + $0x1c18] sm:$0xff]  ;;  %2648 = vmatpush.msrb.mxu1 %v1173_v35  ;;  %v2290_v35 = vpop.f32.mrf.mxu3 }
 0x3d0   : > { %v1305_v39 = vld [vmem:[%s3453_s2 + $0x1e38] sm:$0xff]  ;;  %2668 = vmatpush.msrb.mxu2 %v1237_v6  ;;  %2762 = vmatpush.msra.mxu0 %v2713_v9  ;;  %v1651_v6 = vadd.f32 %v4461_v43, %v1631_v33  ;;  %v1971_v9 = vadd.f32 %v4560_v23, %v1951_v29  ;;  %v1367_v33 = vperm.slane %v4556_v20, 3  ;;  %v2753_v29 = vld [vmem:[%s3466_s16 + $0x1b8] sm:$0xff] }
 0x3d1   : > { %2687 = vmatpush.msrb.mxu3 %v1305_v39  ;;  %v1301_v46 = vld [vmem:[%s3453_s2 + $0x1e18] sm:$0xff]  ;;  %2669 = vmatmul.f32.vlgmr.msrb.gmra.mxu2 %v3086_v53  ;;  %v2310_v39 = vpop.f32.mrf.mxu0  ;;  %v2703_v53 = vld [vmem:[%s3466_s16 + $0x28] sm:$0xff] }
 0x3d2   : > { %v3085_v54 = vld.sshfl [vmem:[#allocation1 + $0x20] sm:$0xff pattern:$0x73625140]  ;;  %2782 = vmatpush.msra.mxu1 %v2729_v40  ;;  %2802 = vmatpush.msra.mxu2 %v2745_v31  ;;  %v3087_v63 = vld.sshfl [vmem:[#allocation1 + $0x28] sm:$0xff pattern:$0x73625140]  ;;  %v2291_v40 = vadd.f32 %v2290_v35, %v2271_v41  ;;  %v1671_v31 = vadd.f32 %v4450_v37, %v1651_v6  ;;  %v1991_v43 = vadd.f32 %v4549_v11, %v1971_v9 }
 0x3d3   : > { %2629 = vmatmul.f32.vlgmr.msrb.gmra.mxu0 %v3085_v54  ;;  %v2712_v58 = vld [vmem:[%s3466_s16 + $0x70] sm:$0xff]  ;;  %2688 = vmatpush.msrb.mxu3 %v1301_v46  ;;  %v2330_v54 = vpop.f32.mrf.mxu1  ;;  %v2735_v37 = vld [vmem:[%s3466_s16 + $0x128] sm:$0xff]  ;;  %v2702_v11 = vld [vmem:[%s3466_s16 + $0x20] sm:$0xff] }
 0x3d4   : > { %v2728_v13 = vld [vmem:[%s3466_s16 + $0xf0] sm:$0xff]  ;;  %2649 = vmatmul.f32.vlgmr.msrb.gmra.mxu1 %v3087_v63  ;;  %2689 = vmatmul.f32.vlgmr.msrb.gmra.mxu3 %v3088_v0  ;;  %v2311_v52 = vadd.f32 %v2310_v39, %v2291_v40  ;;  %v2011_v62 = vadd.f32 %v4562_v25, %v1991_v43  ;;  %v2734_v63 = vld [vmem:[%s3466_s16 + $0x120] sm:$0xff]  ;;  %v2733_v25 = vld [vmem:[%s3466_s16 + $0x118] sm:$0xff] }
 0x3d5   : > { %v2744_v18 = vld [vmem:[%s3466_s16 + $0x170] sm:$0xff]  ;;  %2763 = vmatpush.msra.mxu0 %v2712_v58  ;;  %2783 = vmatpush.msra.mxu1 %v2728_v13  ;;  %v1691_v58 = vadd.f32 %v4463_v44, %v1671_v31  ;;  %v2350_v13 = vpop.f32.mrf.mxu2  ;;  %v2717_v44 = vld [vmem:[%s3466_s16 + $0x98] sm:$0xff]  ;;  %v2747_v43 = vld [vmem:[%s3466_s16 + $0x188] sm:$0xff] }
 0x3d6   : > { %2803 = vmatpush.msra.mxu2 %v2744_v18  ;;  %v2708_v50 = vld [vmem:[%s3466_s16 + $0x50] sm:$0xff]  ;;  %v2718_v18 = vld [vmem:[%s3466_s16 + $0xa0] sm:$0xff]  ;;  %v2331_v42 = vadd.f32 %v2330_v54, %v2311_v52  ;;  %v2749_v40 = vld [vmem:[%s3466_s16 + $0x198] sm:$0xff] }
 0x3d7   : > { %2764 = vmatpush.msra.mxu0 %v2711_v7  ;;  %2784 = vmatpush.msra.mxu1 %v2727_v8  ;;  %v2724_v26 = vld [vmem:[%s3466_s16 + $0xd0] sm:$0xff]  ;;  %v1711_v0 = vadd.f32 %v4472_v56, %v1691_v58  ;;  %v2701_v7 = vld [vmem:[%s3466_s16 + $0x18] sm:$0xff]  ;;  %v2031_v8 = vadd.f32 %v4575_v47, %v2011_v62  ;;  %v2370_v2 = vpop.f32.mrf.mxu3  ;;  %v2715_v47 = vld [vmem:[%s3466_s16 + $0x88] sm:$0xff] }
 0x3d8   : > { %2804 = vmatpush.msra.mxu2 %v2743_v4  ;;  %v2740_v30 = vld [vmem:[%s3466_s16 + $0x150] sm:$0xff]  ;;  %v2351_v10 = vadd.f32 %v2350_v13, %v2331_v42  ;;  %v2746_v52 = vld [vmem:[%s3466_s16 + $0x180] sm:$0xff] }
 0x3d9   : > { %2765 = vmatpush.msra.mxu0 %v2710_v14  ;;  %2785 = vmatpush.msra.mxu1 %v2726_v32  ;;  %v2704_v46 = vld [vmem:[%s3466_s16 + $0x30] sm:$0xff]  ;;  %v1731_v14 = vadd.f32 %v4483_v5, %v1711_v0  ;;  %v2699_v32 = vld [vmem:[%s3466_s16 + $0x8] sm:$0xff]  ;;  %v2051_v15 = vadd.f32 %v4587_v12, %v2031_v8  ;;  %v2761_v12 = vld [vmem:[%s3466_s16 + $0x1f8] sm:$0xff] }
 0x3da   : > { %2805 = vmatpush.msra.mxu2 %v2742_v60  ;;  %v2720_v51 = vld [vmem:[%s3466_s16 + $0xb0] sm:$0xff]  ;;  %v2371_v24 = vadd.f32 %v2370_v2, %v2351_v10  ;;  %v2731_v60 = vld [vmem:[%s3466_s16 + $0x108] sm:$0xff]  ;;  %2822 = vmatpush.msra.mxu3 %v2761_v12 }
 0x3db   : > { %2766 = vmatpush.msra.mxu0 %v2709_v57  ;;  %2786 = vmatpush.msra.mxu1 %v2725_v16  ;;  %v2736_v23 = vld [vmem:[%s3466_s16 + $0x130] sm:$0xff]  ;;  %v2714_v57 = vld [vmem:[%s3466_s16 + $0x80] sm:$0xff]  ;;  %v2693_v5 = vmax.f32 %v1731_v14, 0.0 }
 0x3dc   : > { %2806 = vmatpush.msra.mxu2 %v2741_v19  ;;  %v2700_v4 = vld [vmem:[%s3466_s16 + $0x10] sm:$0xff]  ;;  %v2730_v16 = vld [vmem:[%s3466_s16 + $0x100] sm:$0xff]  ;;  %v2694_v19 = vmax.f32 %v2051_v15, 0.0  ;;  %v2695_v21 = vmax.f32 %v2371_v24, 0.0 }
 0x3dd   : > { %2767 = vmatpush.msra.mxu0 %v2708_v50  ;;  %2787 = vmatpush.msra.mxu1 %v2724_v26  ;;  %v2716_v28 = vld [vmem:[%s3466_s16 + $0x90] sm:$0xff]  ;;  %v2759_v50 = vld [vmem:[%s3466_s16 + $0x1e8] sm:$0xff]  ;;  %v2758_v26 = vld [vmem:[%s3466_s16 + $0x1e0] sm:$0xff] }
 0x3de   : > { %2807 = vmatpush.msra.mxu2 %v2740_v30  ;;  %v2732_v56 = vld [vmem:[%s3466_s16 + $0x110] sm:$0xff]  ;;  %v2755_v30 = vld [vmem:[%s3466_s16 + $0x1c8] sm:$0xff] }
 0x3df   : > { %2768 = vmatpush.msra.mxu0 %v2707_v34  ;;  %2788 = vmatpush.msra.mxu1 %v2723_v17  ;;  %v2760_v22 = vld [vmem:[%s3466_s16 + $0x1f0] sm:$0xff]  ;;  %v2390_v34 = vpop.f32.mrf.mxu0  ;;  %v2754_v17 = vld [vmem:[%s3466_s16 + $0x1c0] sm:$0xff] }
 0x3e0   : > { %2808 = vmatpush.msra.mxu2 %v2739_v61  ;;  %2823 = vmatpush.msra.mxu3 %v2760_v22  ;;  %v2756_v59 = vld [vmem:[%s3466_s16 + $0x1d0] sm:$0xff]  ;;  %v2391_v41 = vadd.f32 %v2390_v34, %v1367_v33  ;;  %v2410_v61 = vpop.f32.mrf.mxu1 }
 0x3e1   : > { %2769 = vmatpush.msra.mxu0 %v2706_v38  ;;  %2789 = vmatpush.msra.mxu1 %v2722_v48  ;;  %v2430_v38 = vpop.f32.mrf.mxu2  ;;  %v2752_v6 = vld [vmem:[%s3466_s16 + $0x1b0] sm:$0xff] }
 0x3e2   : > { %2809 = vmatpush.msra.mxu2 %v2738_v36  ;;  %2824 = vmatpush.msra.mxu3 %v2759_v50  ;;  %v2411_v35 = vadd.f32 %v2410_v61, %v2391_v41  ;;  %v2450_v36 = vpop.f32.mrf.mxu3  ;;  %v2748_v31 = vld [vmem:[%s3466_s16 + $0x190] sm:$0xff] }
 0x3e3   : > { %2770 = vmatpush.msra.mxu0 %v2705_v1  ;;  %2790 = vmatpush.msra.mxu1 %v2721_v49  ;;  %v2751_v1 = vld [vmem:[%s3466_s16 + $0x1a8] sm:$0xff]  ;;  %v2750_v49 = vld [vmem:[%s3466_s16 + $0x1a0] sm:$0xff]  ;;  %v2697_v15 = vld [vmem:[#allocation2] sm:$0x3] }
 0x3e4   : > { %2810 = vmatpush.msra.mxu2 %v2737_v45  ;;  %2825 = vmatpush.msra.mxu3 %v2758_v26  ;;  %v2431_v48 = vadd.f32 %v2430_v38, %v2411_v35 }
 0x3e5   : > { %2771 = vmatpush.msra.mxu0 %v2704_v46  ;;  %2791 = vmatpush.msra.mxu1 %v2720_v51 }
 0x3e6   : > { %2811 = vmatpush.msra.mxu2 %v2736_v23  ;;  %2826 = vmatpush.msra.mxu3 %v2757_v27  ;;  %v2451_v20 = vadd.f32 %v2450_v36, %v2431_v48 }
 0x3e7   : > { %2772 = vmatpush.msra.mxu0 %v2703_v53  ;;  %2792 = vmatpush.msra.mxu1 %v2719_v55  ;;  %v2470_v39 = vpop.f32.mrf.mxu0 }
 0x3e8   : > { %2812 = vmatpush.msra.mxu2 %v2735_v37  ;;  %2827 = vmatpush.msra.mxu3 %v2756_v59  ;;  %v2471_v9 = vadd.f32 %v2470_v39, %v2451_v20  ;;  %v2490_v45 = vpop.f32.mrf.mxu1 }
 0x3e9   : > { %2773 = vmatpush.msra.mxu0 %v2702_v11  ;;  %2793 = vmatpush.msra.mxu1 %v2718_v18  ;;  %v2510_v51 = vpop.f32.mrf.mxu2 }
 0x3ea   : > { %2813 = vmatpush.msra.mxu2 %v2734_v63  ;;  %2828 = vmatpush.msra.mxu3 %v2755_v30  ;;  %v2491_v46 = vadd.f32 %v2490_v45, %v2471_v9  ;;  %v2530_v54 = vpop.f32.mrf.mxu3 }
 0x3eb   : > { %2774 = vmatpush.msra.mxu0 %v2701_v7  ;;  %2794 = vmatpush.msra.mxu1 %v2717_v44 }
 0x3ec   : > { %2814 = vmatpush.msra.mxu2 %v2733_v25  ;;  %2829 = vmatpush.msra.mxu3 %v2754_v17  ;;  %v2511_v23 = vadd.f32 %v2510_v51, %v2491_v46 }
 0x3ed   : > { %2775 = vmatpush.msra.mxu0 %v2700_v4  ;;  %2795 = vmatpush.msra.mxu1 %v2716_v28 }
 0x3ee   : > { %2815 = vmatpush.msra.mxu2 %v2732_v56  ;;  %2830 = vmatpush.msra.mxu3 %v2753_v29  ;;  %v2531_v55 = vadd.f32 %v2530_v54, %v2511_v23 }
 0x3ef   : > { %2776 = vmatpush.msra.mxu0 %v2699_v32  ;;  %2796 = vmatpush.msra.mxu1 %v2715_v47 }
 0x3f0   : > { %2816 = vmatpush.msra.mxu2 %v2731_v60  ;;  %2831 = vmatpush.msra.mxu3 %v2752_v6 }
 0x3f1   : > { %2777 = vmatpush.msra.mxu0 %v2698_v3  ;;  %2797 = vmatpush.msra.mxu1 %v2714_v57 }
 0x3f2   : > { %2817 = vmatpush.msra.mxu2 %v2730_v16  ;;  %2778 = vmatmul.f32.vlgmr.msra.gmra.mxu0 %v2693_v5 }
 0x3f3   : > { %2798 = vmatmul.f32.vlgmr.msra.gmra.mxu1 %v2694_v19  ;;  %2818 = vmatmul.f32.vlgmr.msra.gmra.mxu2 %v2695_v21 }
 0x3f4   : > { %2832 = vmatpush.msra.mxu3 %v2751_v1 }
 0x3f6   : > { %2833 = vmatpush.msra.mxu3 %v2750_v49 }
 0x3f8   : > { %2834 = vmatpush.msra.mxu3 %v2749_v40 }
 0x3fa   : > { %2835 = vmatpush.msra.mxu3 %v2748_v31 }
 0x3fc   : > { %2836 = vmatpush.msra.mxu3 %v2747_v43 }
 0x3fe   : > { %2837 = vmatpush.msra.mxu3 %v2746_v52 }
 0x412   : > { %v2550_v53 = vpop.f32.mrf.mxu0  ;;  %v2570_v58 = vpop.f32.mrf.mxu1 }
 0x413   : > { %v2551_v37 = vadd.f32 %v2550_v53, %v2531_v55  ;;  %v2590_v13 = vpop.f32.mrf.mxu2 }
 0x415   : > { %v2571_v11 = vadd.f32 %v2570_v58, %v2551_v37 }
 0x417   : > { %v2591_v18 = vadd.f32 %v2590_v13, %v2571_v11 }
 0x419   : > { %v2610_v62 = vpop.f32.mrf.mxu3 }
 0x41a   : > { %v2611_v42 = vadd.f32 %v2610_v62, %v2591_v18 }
 0x450   : > { %v2630_v63 = vpop.f32.mrf.mxu0 }
 0x451   : > { %v2631_v0 = vadd.f32 %v2630_v63, %v2611_v42  ;;  %v2650_v7 = vpop.f32.mrf.mxu1 }
 0x453   : > { %v2651_v44 = vadd.f32 %v2650_v7, %v2631_v0 }
 0x454   : > { %v2670_v8 = vpop.f32.mrf.mxu2 }
 0x455   : > { %v2671_v10 = vadd.f32 %v2670_v8, %v2651_v44 }
 0x457   : > { %v2690_v25 = vpop.f32.mrf.mxu3 }
 0x458   : > { %v2691_v2 = vadd.f32 %v2690_v25, %v2671_v10 }
 0x45a   : > { %v2696_v4 = vmax.f32 %v2691_v2, 0.0 }
 0x45c   : > { %2838 = vmatmul.f32.vlgmr.msra.gmra.mxu3 %v2696_v4 }
 0x46f   : > { %v2779_v28 = vpop.f32.mrf.mxu0 }
 0x470   : > { %v2799_v56 = vpop.f32.mrf.mxu1 }
 0x471   : > { %v2800_v32 = vadd.f32 %v2799_v56, %v2779_v28 }
 0x476   : > { %v2819_v14 = vpop.f32.mrf.mxu2 }
 0x477   : > { %v2820_v47 = vadd.f32 %v2819_v14, %v2800_v32 }
 0x4df   : > { %v2839_v24 = vpop.f32.mrf.mxu3 }
 0x4e0   : > { %v2840_v60 = vadd.f32 %v2839_v24, %v2820_v47  ;;  %2847 = sbr.rel (%p2985_p5) target bundleno = 1263 (0x4ef), region = 64 }
 0x4e2   : > { %v2842_v3 = vadd.f32 %v2840_v60, %v2697_v15 }
 0x4e4   : > { %2843 = vst [vmem:[#allocation2] sm:$0x3] %v2842_v3 }
 0x4e5   : > { %v3089_v16 = vld [vmem:[#allocation9] ss:$0 sm:$0xff] }
 0x4eb   : > { %v2848_v57 = vld [vmem:[#allocation2] sm:$0x3] }
 0x4ec   : > { %v2853_v5 = vadd.f32 %v3089_v16, %v2848_v57 }
 0x4ee   : > { %2854 = vst [vmem:[#allocation11] sm:$0x3] %v2853_v5 }
 0x4ef PF: > { %p3023_p7 = scmp.eq.s32.totalorder %s3389_s28, 1  ;;  %s3293_s6 = smov [#allocation11]  }
 0x4f0   : > { %s2861_s8 = sshll.u32 %s3293_s6, 4  ;;  %s2863_s12 = sshll.u32 %s4748_s5, 4  ;;  %s2862_s8 = int_to_ptr.vmem [resolvable:$true] %s2861_s8  ;;  %s2864_s12 = int_to_ptr.hbm [resolvable:$true] %s2863_s12 }
 0x4f1   : > { %3003 = dma.vmem_to_hbm [thread:$0]  (%p3023_p7), %s2862_s8, 32, %s2864_s12, [#allocation5]  }
 0x4f2   : > { %3267 = dma.done.wait (%p3023_p7), [#allocation5], 32  }
 0x4f3   : > { %3269 = vsyncadd (%p3023_p7), [#allocation5], 4294967264 }
 0x4f4 PF: > { %p20_p0 = scmp.ge.s32.totalorder %s3345_s22, 4   ;;  %s4757_s18 = smov %s3276_s19 }
 0x4f5   : > { %s4758_s19 = smov %s3280_s20  ;;  %s4759_s20 = smov %s3355_s25 }
 0x4f6   : > { %s4760_s21 = smov %s3345_s22  ;;  %22 = sbr.rel (!%p20_p0) target bundleno = 10 (0xa), region = 114 }
 0x4fb   :  { %2877 = vsyncpa [#allocation4], 1 }
 0x4fc   :  { %2879 = vsyncpa [#allocation4 + $0x1], 1 }
 0x4fd   :  { %2880 = vsyncpa [#allocation7], 1 }
 0x4fe   :  { %2882 = vsyncpa [#allocation7 + $0x1], 1 }
 0x4ff   :  { %2883 = vsyncpa [#allocation10], 1 }
 0x500   :  { %2884 = vsyncpa [#allocation5], 1 }
 0x501   :  { %2886 = vsyncpa [#allocation5 + $0x1], 1 }

</bundles_post_ra>
